<compile_context>
chip_gen: v6e
topology: v6e:2x2x1
jax: 0.10.0
libtpu: 0.0.40
codegen_flags: <defaults>
</compile_context>

<pallas_src>
import functools

import jax
import jax.numpy as jnp
from jax import lax
from jax.experimental import pallas as pl
from jax.experimental.pallas import tpu as pltpu

_HIGH = jax.lax.Precision.HIGHEST


def _row_tile(d, cap=256):
    """Largest sublane-friendly tile (multiple of 8, or the whole dim)."""
    if d <= cap:
        return d
    for t in (cap, 128, 64, 32, 16, 8):
        if d % t == 0:
            return t
    return d


def _col_tile(d, cap=512):
    """Largest lane-friendly tile (multiple of 128, or the whole dim)."""
    if d <= cap:
        return d
    for t in (cap, 384, 256, 128):
        if d % t == 0:
            return t
    return d


# ----------------------------------------------------------- embedding gather ---

def _embed_kernel(ids_ref, row_ref, o_ref):
    del ids_ref                      # consumed only by the index_maps
    o_ref[...] = row_ref[...]


def embed_rows(ids_flat, table_up):
    """Gather rows of the pre-fused (V, M) table by token id."""
    n = ids_flat.shape[0]
    v, m = table_up.shape
    out = pl.pallas_call(
        _embed_kernel,
        out_shape=jax.ShapeDtypeStruct((n, 1, m), jnp.float32),
        grid_spec=pltpu.PrefetchScalarGridSpec(
            num_scalar_prefetch=1,
            grid=(n,),
            # data-dependent row fetch: block index along dim 0 == token id
            in_specs=[pl.BlockSpec((1, 1, m), lambda i, ids: (ids[i], 0, 0))],
            out_specs=pl.BlockSpec((1, 1, m), lambda i, ids: (i, 0, 0)),
        ),
        compiler_params=pltpu.CompilerParams(dimension_semantics=("arbitrary",)),
    )(ids_flat.astype(jnp.int32), table_up.reshape(v, 1, m))
    return out.reshape(n, m)


# --------------------------------------------------------------- tiled linear ---

def _linear_kernel(x_ref, w_ref, b_ref, o_ref, acc_ref):
    @pl.when(pl.program_id(2) == 0)
    def _():
        acc_ref[...] = jnp.zeros_like(acc_ref)

    acc_ref[...] += jnp.dot(x_ref[...], w_ref[...],
                            preferred_element_type=jnp.float32, precision=_HIGH)

    @pl.when(pl.program_id(2) == pl.num_programs(2) - 1)
    def _():
        o_ref[...] = acc_ref[...] + b_ref[...]


def linear(x, w, b):
    """y = x @ w + b with a (rows, cols, K) grid and a VMEM f32 accumulator."""
    n, k = x.shape
    f = w.shape[1]
    tm, tn, tk = _row_tile(n), _col_tile(f), _col_tile(k)
    return pl.pallas_call(
        _linear_kernel,
        out_shape=jax.ShapeDtypeStruct((n, f), jnp.float32),
        grid=(n // tm, f // tn, k // tk),
        in_specs=[pl.BlockSpec((tm, tk), lambda i, j, kx: (i, kx)),
                  pl.BlockSpec((tk, tn), lambda i, j, kx: (kx, j)),
                  pl.BlockSpec((1, tn), lambda i, j, kx: (0, j))],
        out_specs=pl.BlockSpec((tm, tn), lambda i, j, kx: (i, j)),
        scratch_shapes=[pltpu.VMEM((tm, tn), jnp.float32)],
        compiler_params=pltpu.CompilerParams(
            dimension_semantics=("parallel", "parallel", "arbitrary")),
    )(x, w, b.reshape(1, f))


# -------------------------------------------------- fused down_proj + fc head ---

def _down_fc_kernel(x_ref, dw_ref, db_ref, fw_ref, fb_ref, o_ref, mid_ref):
    # mid = x @ down_w + down_b kept in VMEM scratch, computed once per row tile;
    # the vocab axis of fc streams through as the inner ("arbitrary") grid axis.
    @pl.when(pl.program_id(1) == 0)
    def _():
        mid_ref[...] = (jnp.dot(x_ref[...], dw_ref[...],
                                preferred_element_type=jnp.float32, precision=_HIGH)
                        + db_ref[...])

    o_ref[...] = (jnp.dot(mid_ref[...], fw_ref[...],
                          preferred_element_type=jnp.float32, precision=_HIGH)
                  + fb_ref[...])


def down_fc(x, dw, db, fw, fb):
    n, m = x.shape
    e = dw.shape[1]
    v = fw.shape[1]
    tm, tn = _row_tile(n), _col_tile(v)
    return pl.pallas_call(
        _down_fc_kernel,
        out_shape=jax.ShapeDtypeStruct((n, v), jnp.float32),
        grid=(n // tm, v // tn),
        in_specs=[pl.BlockSpec((tm, m), lambda i, j: (i, 0)),
                  pl.BlockSpec((m, e), lambda i, j: (0, 0)),
                  pl.BlockSpec((1, e), lambda i, j: (0, 0)),
                  pl.BlockSpec((e, tn), lambda i, j: (0, j)),
                  pl.BlockSpec((1, tn), lambda i, j: (0, j))],
        out_specs=pl.BlockSpec((tm, tn), lambda i, j: (i, j)),
        scratch_shapes=[pltpu.VMEM((tm, e), jnp.float32)],
        compiler_params=pltpu.CompilerParams(
            dimension_semantics=("parallel", "arbitrary")),
    )(x, dw, db.reshape(1, e), fw, fb.reshape(1, v))


# ------------------------------------------------ bidirectional LSTM recurrence ---

def _lstm_kernel(xg_f_ref, xg_b_ref, whh_ref, lens_ref,
                 out_f_ref, out_b_ref, h_ref, c_ref):
    # xg_*_ref : (1, B, 4H) per-timestep gate pre-activations (x W_ih^T + b_ih + b_hh)
    #            forward slab is time t, backward slab is time S-1-t.
    # whh_ref  : (2H, 8H) block-diagonal [[Whh_f, 0], [0, Whh_b]] (transposed).
    # lens_ref : (B, 1) int32 sequence lengths.
    # h_ref/c_ref : (B, 2H) VMEM state, columns [:H]=forward, [H:]=backward.
    t = pl.program_id(0)
    s = pl.num_programs(0)
    hdim = out_f_ref.shape[2]

    @pl.when(t == 0)
    def _():
        h_ref[...] = jnp.zeros_like(h_ref)
        c_ref[...] = jnp.zeros_like(c_ref)

    lens = lens_ref[...]                                    # (B, 1) int32
    m_f = (t < lens).astype(jnp.float32)                    # (B, 1)
    m_b = ((s - 1 - t) < lens).astype(jnp.float32)          # (B, 1)

    # single fused recurrent matmul for both directions (one MXU push per step)
    xg = jnp.concatenate([xg_f_ref[0], xg_b_ref[0]], axis=-1)      # (B, 8H)
    gates = xg + jnp.dot(h_ref[...], whh_ref[...],
                         preferred_element_type=jnp.float32, precision=_HIGH)

    def gate(k):   # (B, 2H) = [forward gate k | backward gate k]
        return jnp.concatenate([gates[:, k * hdim:(k + 1) * hdim],
                                gates[:, (4 + k) * hdim:(5 + k) * hdim]], axis=-1)

    i = jax.nn.sigmoid(gate(0))
    f = jax.nn.sigmoid(gate(1))
    g = jnp.tanh(gate(2))
    o = jax.nn.sigmoid(gate(3))
    c_new = f * c_ref[...] + i * g
    h_new = o * jnp.tanh(c_new)

    bsz = h_new.shape[0]
    mask = jnp.concatenate([jnp.broadcast_to(m_f, (bsz, hdim)),
                            jnp.broadcast_to(m_b, (bsz, hdim))], axis=-1)
    # packed-sequence semantics: freeze state and emit zeros past each length
    h_ref[...] = mask * h_new + (1.0 - mask) * h_ref[...]
    c_ref[...] = mask * c_new + (1.0 - mask) * c_ref[...]
    out_f_ref[0] = m_f * h_new[:, :hdim]
    out_b_ref[0] = m_b * h_new[:, hdim:]


def lstm_bidir(xg, whh_bd, lens_col):
    # xg: (S, B, 8H) time-major fused gate pre-activations; whh_bd: (2H, 8H).
    # NOTE: 4H must be a multiple of 128 (H multiple of 32) for the half-width
    #       lane blocks below; pad the hidden dim at realistic sizes if needed.
    s, b, g8 = xg.shape
    h = g8 // 8
    return pl.pallas_call(
        _lstm_kernel,
        out_shape=(jax.ShapeDtypeStruct((s, b, h), jnp.float32),
                   jax.ShapeDtypeStruct((s, b, h), jnp.float32)),
        grid=(s,),
        in_specs=[
            pl.BlockSpec((1, b, 4 * h), lambda t: (t, 0, 0)),          # fwd half, time t
            pl.BlockSpec((1, b, 4 * h), lambda t: (s - 1 - t, 0, 1)),  # bwd half, reversed
            pl.BlockSpec((2 * h, 8 * h), lambda t: (0, 0)),            # resident weights
            pl.BlockSpec((b, 1), lambda t: (0, 0)),                    # lengths
        ],
        out_specs=(pl.BlockSpec((1, b, h), lambda t: (t, 0, 0)),
                   pl.BlockSpec((1, b, h), lambda t: (s - 1 - t, 0, 0))),
        scratch_shapes=[pltpu.VMEM((b, 2 * h), jnp.float32),
                        pltpu.VMEM((b, 2 * h), jnp.float32)],
        compiler_params=pltpu.CompilerParams(dimension_semantics=("arbitrary",)),
    )(xg, xg, whh_bd, lens_col)


# --------------------------------------- fused concat + layer_norm + residual ---

def _ln_res_kernel(hf_ref, hb_ref, emb_ref, raw_ref, ln_ref, new_ref):
    # F.layer_norm over (S, model_dim) per batch element (no affine, eps=1e-5),
    # fused with the fwd/bwd concat and the residual add `embedded += hidden`.
    hf = hf_ref[...]                                        # (S, bt, H)
    hb = hb_ref[...]                                        # (S, bt, H)
    s, _, h = hf.shape
    n = float(s * 2 * h)
    mean = (jnp.sum(hf, axis=(0, 2), keepdims=True)
            + jnp.sum(hb, axis=(0, 2), keepdims=True)) / n          # (1, bt, 1)
    cf = hf - mean
    cb = hb - mean
    var = (jnp.sum(cf * cf, axis=(0, 2), keepdims=True)
           + jnp.sum(cb * cb, axis=(0, 2), keepdims=True)) / n
    inv = lax.rsqrt(var + 1e-5)
    raw_ref[...] = jnp.concatenate([hf, hb], axis=-1)
    ln = jnp.concatenate([cf * inv, cb * inv], axis=-1)
    ln_ref[...] = ln
    new_ref[...] = emb_ref[...] + ln


def layernorm_concat_residual(out_f, out_b, embedded):
    s, b, h = out_f.shape
    m = embedded.shape[2]
    bt = 8 if (b > 8 and b % 8 == 0) else b
    shp = jax.ShapeDtypeStruct((s, b, m), jnp.float32)
    return pl.pallas_call(
        _ln_res_kernel,
        out_shape=(shp, shp, shp),
        grid=(b // bt,),
        in_specs=[pl.BlockSpec((s, bt, h), lambda i: (0, i, 0)),
                  pl.BlockSpec((s, bt, h), lambda i: (0, i, 0)),
                  pl.BlockSpec((s, bt, m), lambda i: (0, i, 0))],
        out_specs=(pl.BlockSpec((s, bt, m), lambda i: (0, i, 0)),
                   pl.BlockSpec((s, bt, m), lambda i: (0, i, 0)),
                   pl.BlockSpec((s, bt, m), lambda i: (0, i, 0))),
        compiler_params=pltpu.CompilerParams(dimension_semantics=("parallel",)),
    )(out_f, out_b, embedded)


# -------------------------------------------------------------------- forward ---

def prepare_params(params):
    """One-time weight re-packing for the fused kernels."""
    h = params["lstm"][0]["w_hh_f"].shape[0]
    prepared = {
        # embedding folded with up_proj:  up_proj(emb[ids]) == (emb @ up_w + up_b)[ids]
        "table_up": jnp.dot(params["emb"], params["up_w"], precision=_HIGH)
                    + params["up_b"],
        "down_w": params["down_w"], "down_b": params["down_b"],
        "fc_w": params["fc_w"], "fc_b": params["fc_b"],
        "lstm": [],
    }
    z = jnp.zeros((h, 4 * h), jnp.float32)
    for lp in params["lstm"]:
        prepared["lstm"].append({
            "w_ih": jnp.concatenate([lp["w_ih_f"], lp["w_ih_b"]], axis=1),   # (M, 8H)
            "b": jnp.concatenate([lp["b_f"], lp["b_b"]]),                    # (8H,)
            "whh_bd": jnp.block([[lp["w_hh_f"], z], [z, lp["w_hh_b"]]]),     # (2H, 8H)
        })
    return prepared


def lstm_mlm_forward(prepared, tokens, input_len):
    b, s = tokens.shape
    m_dim = prepared["table_up"].shape[1]
    h_dim = m_dim // 2
    vocab = prepared["fc_w"].shape[1]

    # time-major layout throughout
    ids_tm = tokens.T.reshape(-1)                                     # (S*B,)
    embedded = embed_rows(ids_tm, prepared["table_up"]).reshape(s, b, m_dim)
    lens_col = input_len.astype(jnp.int32).reshape(b, 1)

    hidden_states = []
    ln_hidden = embedded
    for lp in prepared["lstm"]:
        xg = linear(embedded.reshape(s * b, m_dim), lp["w_ih"], lp["b"]
                    ).reshape(s, b, 8 * h_dim)                        # fused fwd+bwd gates
        out_f, out_b = lstm_bidir(xg, lp["whh_bd"], lens_col)         # (S,B,H) each
        raw, ln_hidden, embedded = layernorm_concat_residual(out_f, out_b, embedded)
        hidden_states.append(raw)

    logits = down_fc(ln_hidden.reshape(s * b, m_dim),
                     prepared["down_w"], prepared["down_b"],
                     prepared["fc_w"], prepared["fc_b"]).reshape(s, b, vocab)
    logits = logits.transpose(1, 0, 2)                                # (B, S, V)
    hs = jnp.stack(hidden_states).transpose(0, 2, 1, 3)               # (L, B, S, M)
    return logits, hs


# ------------------------------------------------------- pure-JAX reference ---

def _lstm_dir_ref(xg, whh_t, mask):
    s, b, g = xg.shape
    h_dim = g // 4

    def step(carry, inp):
        h, c = carry
        gx, m = inp
        gates = gx + jnp.dot(h, whh_t, precision=_HIGH)
        i = jax.nn.sigmoid(gates[:, :h_dim])
        f = jax.nn.sigmoid(gates[:, h_dim:2 * h_dim])
        gg = jnp.tanh(gates[:, 2 * h_dim:3 * h_dim])
        o = jax.nn.sigmoid(gates[:, 3 * h_dim:])
        c_new = f * c + i * gg
        h_new = o * jnp.tanh(c_new)
        return (m * h_new + (1 - m) * h, m * c_new + (1 - m) * c), m * h_new

    init = (jnp.zeros((b, h_dim)), jnp.zeros((b, h_dim)))
    _, out = lax.scan(step, init, (xg, mask))
    return out


def _ln_ref(x):
    mean = jnp.mean(x, axis=(1, 2), keepdims=True)
    var = jnp.mean((x - mean) ** 2, axis=(1, 2), keepdims=True)
    return (x - mean) * lax.rsqrt(var + 1e-5)


def lstm_mlm_forward_ref(params, tokens, input_len):
    b, s = tokens.shape
    m_dim = params["up_w"].shape[1]
    h_dim = m_dim // 2
    emb = params["emb"][tokens.reshape(-1)]
    embedded = (jnp.dot(emb, params["up_w"], precision=_HIGH)
                + params["up_b"]).reshape(b, s, m_dim)
    t_idx = jnp.arange(s)[:, None]
    mask = jnp.broadcast_to(
        (t_idx < input_len[None, :]).astype(jnp.float32)[:, :, None], (s, b, h_dim))
    hidden = embedded
    hs = []
    for lp in params["lstm"]:
        x2 = embedded.reshape(b * s, m_dim)
        xg_f = (jnp.dot(x2, lp["w_ih_f"], precision=_HIGH) + lp["b_f"]
                ).reshape(b, s, 4 * h_dim).transpose(1, 0, 2)
        xg_b = (jnp.dot(x2, lp["w_ih_b"], precision=_HIGH) + lp["b_b"]
                ).reshape(b, s, 4 * h_dim).transpose(1, 0, 2)
        out_f = _lstm_dir_ref(xg_f, lp["w_hh_f"], mask)
        out_b = _lstm_dir_ref(xg_b[::-1], lp["w_hh_b"], mask[::-1])[::-1]
        hidden = jnp.concatenate([out_f, out_b], axis=-1).transpose(1, 0, 2)
        hs.append(hidden)
        hidden = _ln_ref(hidden)
        embedded = embedded + hidden
    out = jnp.dot(hidden.reshape(b * s, m_dim), params["down_w"], precision=_HIGH) \
        + params["down_b"]
    out = jnp.dot(out, params["fc_w"], precision=_HIGH) + params["fc_b"]
    return out.reshape(b, s, -1), jnp.stack(hs)


# --------------------------------------------------------------------- setup ---

def init_params(key, num_tokens, e_dim, m_dim, n_layers):
    h_dim = m_dim // 2
    keys = iter(jax.random.split(key, 7 + 6 * n_layers))

    def u(shape, fan_in):
        s = 1.0 / (fan_in ** 0.5)
        return jax.random.uniform(next(keys), shape, jnp.float32, -s, s)

    params = {
        "emb": jax.random.normal(next(keys), (num_tokens, e_dim), jnp.float32),
        "up_w": u((e_dim, m_dim), e_dim),
        "up_b": u((m_dim,), e_dim),
        "down_w": u((m_dim, e_dim), m_dim),
        "down_b": u((e_dim,), m_dim),
        "fc_w": u((e_dim, num_tokens), e_dim),
        "fc_b": u((num_tokens,), e_dim),
        "lstm": [],
    }
    for _ in range(n_layers):
        params["lstm"].append({
            "w_ih_f": u((m_dim, 4 * h_dim), h_dim),   # weight_ih_l0 transposed
            "w_hh_f": u((h_dim, 4 * h_dim), h_dim),   # weight_hh_l0 transposed
            "b_f": u((4 * h_dim,), h_dim),            # b_ih + b_hh (combined)
            "w_ih_b": u((m_dim, 4 * h_dim), h_dim),   # reverse direction
            "w_hh_b": u((h_dim, 4 * h_dim), h_dim),
            "b_b": u((4 * h_dim,), h_dim),
        })
    return params


if __name__ == "__main__":
    num_tokens, e_dim, m_dim, n_layers = 128, 32, 64, 2
    batch, seq = 2, 8

    kp, kt = jax.random.split(jax.random.PRNGKey(0))
    params = init_params(kp, num_tokens, e_dim, m_dim, n_layers)
    tokens = jax.random.randint(kt, (batch, seq), 0, num_tokens, jnp.int32)
    input_len = jnp.array([seq, seq - 3], dtype=jnp.int32)   # max len == seq

    prepared = prepare_params(params)
    fwd = jax.jit(functools.partial(lstm_mlm_forward, prepared))
    logits, hidden_states = fwd(tokens, input_len)
    jax.block_until_ready((logits, hidden_states))

    assert logits.shape == (batch, seq, num_tokens)
    assert hidden_states.shape == (n_layers, batch, seq, m_dim)

    ref_logits, ref_hidden = lstm_mlm_forward_ref(params, tokens, input_len)
    assert jnp.allclose(logits, ref_logits, atol=1e-3, rtol=1e-3)
    assert jnp.allclose(hidden_states, ref_hidden, atol=1e-3, rtol=1e-3)

    print("KERNEL_OK")
</pallas_src>

<mosaic_0001>
module attributes {stable_mosaic.version = 11 : i64} {
  func.func @_embed_kernel(%arg0: i32, %arg1: memref<16xi32, #tpu.memory_space<smem>>, %arg2: memref<1x1x64xf32, #tpu.memory_space<vmem>>, %arg3: memref<1x1x64xf32, #tpu.memory_space<vmem>>) attributes {dimension_semantics = [#tpu.dimension_semantics<arbitrary>], iteration_bounds = array<i64: 16>, scalar_prefetch = 1 : i64, scratch_operands = 0 : i64, tpu.core_type = #tpu.core_type<tc>, window_params = [{transform_indices = @transform_0, window_bounds = array<i64: 1, 1, 64>}, {transform_indices = @transform_1, window_bounds = array<i64: 1, 1, 64>}]} {
    %c0 = arith.constant 0 : index
    %c0_0 = arith.constant 0 : index
    %c0_1 = arith.constant 0 : index
    %0 = vector.load %arg2[%c0, %c0_0, %c0_1] : memref<1x1x64xf32, #tpu.memory_space<vmem>>, vector<1x1x64xf32>
    %c0_2 = arith.constant 0 : index
    %c0_3 = arith.constant 0 : index
    %c0_4 = arith.constant 0 : index
    %1 = vector.load %arg3[%c0_2, %c0_3, %c0_4] : memref<1x1x64xf32, #tpu.memory_space<vmem>>, vector<1x1x64xf32>
    tpu.vector_store %arg3[%c0_2, %c0_3, %c0_4], %0 {strides = array<i32>} : memref<1x1x64xf32, #tpu.memory_space<vmem>>, vector<1x1x64xf32>,
    return
  }
  func.func @transform_0(%arg0: i32, %arg1: memref<16xi32, #tpu.memory_space<smem>>) -> (i32, i32, i32) {
    %0 = arith.index_cast %arg0 : i32 to index
    %1 = memref.load %arg1[%0] : memref<16xi32, #tpu.memory_space<smem>>
    %c0_i32 = arith.constant 0 : i32
    %c0_i32_0 = arith.constant 0 : i32
    %c0_i32_1 = arith.constant 0 : i32
    return %1, %c0_i32, %c0_i32_0 : i32, i32, i32
  }
  func.func @transform_1(%arg0: i32, %arg1: memref<16xi32, #tpu.memory_space<smem>>) -> (i32, i32, i32) {
    %c0_i32 = arith.constant 0 : i32
    %c0_i32_0 = arith.constant 0 : i32
    %c0_i32_1 = arith.constant 0 : i32
    return %arg0, %c0_i32, %c0_i32_0 : i32, i32, i32
  }
}

module attributes {stable_mosaic.version = 11 : i64} {
  func.func @_linear_kernel(%arg0: i32, %arg1: i32, %arg2: i32, %arg3: memref<16x64xf32, #tpu.memory_space<vmem>>, %arg4: memref<64x256xf32, #tpu.memory_space<vmem>>, %arg5: memref<1x256xf32, #tpu.memory_space<vmem>>, %arg6: memref<16x256xf32, #tpu.memory_space<vmem>>, %arg7: memref<16x256xf32, #tpu.memory_space<vmem>>) attributes {dimension_semantics = [#tpu.dimension_semantics<parallel>, #tpu.dimension_semantics<parallel>, #tpu.dimension_semantics<arbitrary>], iteration_bounds = array<i64: 1, 1, 1>, scalar_prefetch = 0 : i64, scratch_operands = 1 : i64, tpu.core_type = #tpu.core_type<tc>, window_params = [{transform_indices = @transform_0, window_bounds = array<i64: 16, 64>}, {transform_indices = @transform_1, window_bounds = array<i64: 64, 256>}, {transform_indices = @transform_2, window_bounds = array<i64: 1, 256>}, {transform_indices = @transform_3, window_bounds = array<i64: 16, 256>}]} {
    %c0_i32 = arith.constant 0 : i32
    %0 = arith.cmpi eq, %arg2, %c0_i32 : i32
    %1 = arith.extui %0 : i1 to i32
    %c0_i32_0 = arith.constant 0 : i32
    %2 = arith.cmpi ne, %1, %c0_i32_0 : i32
    scf.if %2 {
      %cst_10 = arith.constant 0.000000e+00 : f32
      %12 = vector.broadcast %cst_10 : f32 to vector<16x256xf32>
      %c0_11 = arith.constant 0 : index
      %c0_12 = arith.constant 0 : index
      %13 = vector.load %arg7[%c0_11, %c0_12] : memref<16x256xf32, #tpu.memory_space<vmem>>, vector<16x256xf32>
      tpu.vector_store %arg7[%c0_11, %c0_12], %12 {strides = array<i32>} : memref<16x256xf32, #tpu.memory_space<vmem>>, vector<16x256xf32>,
    } else {
    }
    %c0 = arith.constant 0 : index
    %c0_1 = arith.constant 0 : index
    %3 = vector.load %arg7[%c0, %c0_1] : memref<16x256xf32, #tpu.memory_space<vmem>>, vector<16x256xf32>
    %c0_2 = arith.constant 0 : index
    %c0_3 = arith.constant 0 : index
    %4 = vector.load %arg3[%c0_2, %c0_3] : memref<16x64xf32, #tpu.memory_space<vmem>>, vector<16x64xf32>
    %c0_4 = arith.constant 0 : index
    %c0_5 = arith.constant 0 : index
    %5 = vector.load %arg4[%c0_4, %c0_5] : memref<64x256xf32, #tpu.memory_space<vmem>>, vector<64x256xf32>
    %cst = arith.constant dense<0.000000e+00> : vector<16x256xf32>
    %6 = tpu.matmul %4, %5, %cst {dimension_numbers = #tpu.dot_dimension_numbers<[1], [0], [0], [1], [0, 0, 1, 1], [], []>, precision = #tpu.contract_precision<fp32>} : vector<16x64xf32>, vector<64x256xf32>, vector<16x256xf32> -> vector<16x256xf32>
    %7 = arith.addf %3, %6 : vector<16x256xf32>
    %c0_6 = arith.constant 0 : index
    %c0_7 = arith.constant 0 : index
    %8 = vector.load %arg7[%c0_6, %c0_7] : memref<16x256xf32, #tpu.memory_space<vmem>>, vector<16x256xf32>
    tpu.vector_store %arg7[%c0_6, %c0_7], %7 {strides = array<i32>} : memref<16x256xf32, #tpu.memory_space<vmem>>, vector<16x256xf32>,
    %c0_i32_8 = arith.constant 0 : i32
    %9 = arith.cmpi eq, %arg2, %c0_i32_8 : i32
    %10 = arith.extui %9 : i1 to i32
    %c0_i32_9 = arith.constant 0 : i32
    %11 = arith.cmpi ne, %10, %c0_i32_9 : i32
    scf.if %11 {
      %c0_10 = arith.constant 0 : index
      %c0_11 = arith.constant 0 : index
      %12 = vector.load %arg7[%c0_10, %c0_11] : memref<16x256xf32, #tpu.memory_space<vmem>>, vector<16x256xf32>
      %c0_12 = arith.constant 0 : index
      %c0_13 = arith.constant 0 : index
      %13 = vector.load %arg5[%c0_12, %c0_13] : memref<1x256xf32, #tpu.memory_space<vmem>>, vector<1x256xf32>
      %14 = vector.broadcast %13 : vector<1x256xf32> to vector<16x256xf32>
      %15 = arith.addf %12, %14 : vector<16x256xf32>
      %c0_14 = arith.constant 0 : index
      %c0_15 = arith.constant 0 : index
      %16 = vector.load %arg6[%c0_14, %c0_15] : memref<16x256xf32, #tpu.memory_space<vmem>>, vector<16x256xf32>
      tpu.vector_store %arg6[%c0_14, %c0_15], %15 {strides = array<i32>} : memref<16x256xf32, #tpu.memory_space<vmem>>, vector<16x256xf32>,
    } else {
    }
    return
  }
  func.func @transform_0(%arg0: i32, %arg1: i32, %arg2: i32) -> (i32, i32) {
    %c0_i32 = arith.constant 0 : i32
    return %arg0, %arg2 : i32, i32
  }
  func.func @transform_1(%arg0: i32, %arg1: i32, %arg2: i32) -> (i32, i32) {
    %c0_i32 = arith.constant 0 : i32
    return %arg2, %arg1 : i32, i32
  }
  func.func @transform_2(%arg0: i32, %arg1: i32, %arg2: i32) -> (i32, i32) {
    %c0_i32 = arith.constant 0 : i32
    %c0_i32_0 = arith.constant 0 : i32
    return %c0_i32, %arg1 : i32, i32
  }
  func.func @transform_3(%arg0: i32, %arg1: i32, %arg2: i32) -> (i32, i32) {
    %c0_i32 = arith.constant 0 : i32
    return %arg0, %arg1 : i32, i32
  }
}

module attributes {stable_mosaic.version = 11 : i64} {
  func.func @_lstm_kernel(%arg0: i32, %arg1: memref<1x2x128xf32, #tpu.memory_space<vmem>>, %arg2: memref<1x2x128xf32, #tpu.memory_space<vmem>>, %arg3: memref<64x256xf32, #tpu.memory_space<vmem>>, %arg4: memref<2x1xi32, #tpu.memory_space<vmem>>, %arg5: memref<1x2x32xf32, #tpu.memory_space<vmem>>, %arg6: memref<1x2x32xf32, #tpu.memory_space<vmem>>, %arg7: memref<2x64xf32, #tpu.memory_space<vmem>>, %arg8: memref<2x64xf32, #tpu.memory_space<vmem>>) attributes {dimension_semantics = [#tpu.dimension_semantics<arbitrary>], iteration_bounds = array<i64: 8>, scalar_prefetch = 0 : i64, scratch_operands = 2 : i64, tpu.core_type = #tpu.core_type<tc>, window_params = [{transform_indices = @transform_0, window_bounds = array<i64: 1, 2, 128>}, {transform_indices = @transform_1, window_bounds = array<i64: 1, 2, 128>}, {pipeline_mode = #tpu.pipeline_mode<synchronous>, transform_indices = @transform_2, window_bounds = array<i64: 64, 256>}, {pipeline_mode = #tpu.pipeline_mode<synchronous>, transform_indices = @transform_3, window_bounds = array<i64: 2, 1>}, {transform_indices = @transform_4, window_bounds = array<i64: 1, 2, 32>}, {transform_indices = @transform_5, window_bounds = array<i64: 1, 2, 32>}]} {
    %c0_i32 = arith.constant 0 : i32
    %0 = arith.cmpi eq, %arg0, %c0_i32 : i32
    %1 = arith.extui %0 : i1 to i32
    %c0_i32_0 = arith.constant 0 : i32
    %2 = arith.cmpi ne, %1, %c0_i32_0 : i32
    scf.if %2 {
      %cst_33 = arith.constant 0.000000e+00 : f32
      %87 = vector.broadcast %cst_33 : f32 to vector<2x64xf32>
      %c0_34 = arith.constant 0 : index
      %c0_35 = arith.constant 0 : index
      %88 = vector.load %arg7[%c0_34, %c0_35] : memref<2x64xf32, #tpu.memory_space<vmem>>, vector<2x64xf32>
      tpu.vector_store %arg7[%c0_34, %c0_35], %87 {strides = array<i32>} : memref<2x64xf32, #tpu.memory_space<vmem>>, vector<2x64xf32>,
      %cst_36 = arith.constant 0.000000e+00 : f32
      %89 = vector.broadcast %cst_36 : f32 to vector<2x64xf32>
      %c0_37 = arith.constant 0 : index
      %c0_38 = arith.constant 0 : index
      %90 = vector.load %arg8[%c0_37, %c0_38] : memref<2x64xf32, #tpu.memory_space<vmem>>, vector<2x64xf32>
      tpu.vector_store %arg8[%c0_37, %c0_38], %89 {strides = array<i32>} : memref<2x64xf32, #tpu.memory_space<vmem>>, vector<2x64xf32>,
    } else {
    }
    %c0 = arith.constant 0 : index
    %c0_1 = arith.constant 0 : index
    %3 = vector.load %arg4[%c0, %c0_1] : memref<2x1xi32, #tpu.memory_space<vmem>>, vector<2x1xi32>
    %4 = vector.broadcast %arg0 : i32 to vector<2x1xi32>
    %5 = arith.cmpi slt, %4, %3 : vector<2x1xi32>
    %6 = arith.extui %5 : vector<2x1xi1> to vector<2x1xi32>
    %7 = arith.sitofp %6 : vector<2x1xi32> to vector<2x1xf32>
    %c7_i32 = arith.constant 7 : i32
    %8 = arith.subi %c7_i32, %arg0 : i32
    %9 = vector.broadcast %8 : i32 to vector<2x1xi32>
    %10 = arith.cmpi slt, %9, %3 : vector<2x1xi32>
    %11 = arith.extui %10 : vector<2x1xi1> to vector<2x1xi32>
    %12 = arith.sitofp %11 : vector<2x1xi32> to vector<2x1xf32>
    %c0_2 = arith.constant 0 : index
    %c0_3 = arith.constant 0 : index
    %c0_4 = arith.constant 0 : index
    %13 = vector.load %arg1[%c0_2, %c0_3, %c0_4] : memref<1x2x128xf32, #tpu.memory_space<vmem>>, vector<1x2x128xf32>
    %14 = vector.shape_cast %13 : vector<1x2x128xf32> to vector<2x128xf32>
    %c0_5 = arith.constant 0 : index
    %c0_6 = arith.constant 0 : index
    %c0_7 = arith.constant 0 : index
    %15 = vector.load %arg2[%c0_5, %c0_6, %c0_7] : memref<1x2x128xf32, #tpu.memory_space<vmem>>, vector<1x2x128xf32>
    %16 = vector.shape_cast %15 : vector<1x2x128xf32> to vector<2x128xf32>
    %17 = tpu.concatenate %14, %16 in 1 : vector<2x128xf32>, vector<2x128xf32> -> vector<2x256xf32>
    %c0_8 = arith.constant 0 : index
    %c0_9 = arith.constant 0 : index
    %18 = vector.load %arg7[%c0_8, %c0_9] : memref<2x64xf32, #tpu.memory_space<vmem>>, vector<2x64xf32>
    %c0_10 = arith.constant 0 : index
    %c0_11 = arith.constant 0 : index
    %19 = vector.load %arg3[%c0_10, %c0_11] : memref<64x256xf32, #tpu.memory_space<vmem>>, vector<64x256xf32>
    %cst = arith.constant dense<0.000000e+00> : vector<2x256xf32>
    %20 = tpu.matmul %18, %19, %cst {dimension_numbers = #tpu.dot_dimension_numbers<[1], [0], [0], [1], [0, 0, 1, 1], [], []>, precision = #tpu.contract_precision<fp32>} : vector<2x64xf32>, vector<64x256xf32>, vector<2x256xf32> -> vector<2x256xf32>
    %21 = arith.addf %17, %20 : vector<2x256xf32>
    %22 = vector.extract_strided_slice %21 {offsets = [0, 0], sizes = [2, 32], strides = [1, 1]} : vector<2x256xf32> to vector<2x32xf32>
    %23 = vector.extract_strided_slice %21 {offsets = [0, 128], sizes = [2, 32], strides = [1, 1]} : vector<2x256xf32> to vector<2x32xf32>
    %24 = tpu.concatenate %22, %23 in 1 : vector<2x32xf32>, vector<2x32xf32> -> vector<2x64xf32>
    %25 = arith.negf %24 : vector<2x64xf32>
    %26 = math.exp %25 : vector<2x64xf32>
    %cst_12 = arith.constant 1.000000e+00 : f32
    %27 = vector.broadcast %cst_12 : f32 to vector<2x64xf32>
    %28 = arith.addf %27, %26 : vector<2x64xf32>
    %29 = arith.divf %27, %28 : vector<2x64xf32>
    %30 = vector.extract_strided_slice %21 {offsets = [0, 32], sizes = [2, 32], strides = [1, 1]} : vector<2x256xf32> to vector<2x32xf32>
    %31 = vector.extract_strided_slice %21 {offsets = [0, 160], sizes = [2, 32], strides = [1, 1]} : vector<2x256xf32> to vector<2x32xf32>
    %32 = tpu.concatenate %30, %31 in 1 : vector<2x32xf32>, vector<2x32xf32> -> vector<2x64xf32>
    %33 = arith.negf %32 : vector<2x64xf32>
    %34 = math.exp %33 : vector<2x64xf32>
    %cst_13 = arith.constant 1.000000e+00 : f32
    %35 = vector.broadcast %cst_13 : f32 to vector<2x64xf32>
    %36 = arith.addf %35, %34 : vector<2x64xf32>
    %37 = arith.divf %35, %36 : vector<2x64xf32>
    %38 = vector.extract_strided_slice %21 {offsets = [0, 64], sizes = [2, 32], strides = [1, 1]} : vector<2x256xf32> to vector<2x32xf32>
    %39 = vector.extract_strided_slice %21 {offsets = [0, 192], sizes = [2, 32], strides = [1, 1]} : vector<2x256xf32> to vector<2x32xf32>
    %40 = tpu.concatenate %38, %39 in 1 : vector<2x32xf32>, vector<2x32xf32> -> vector<2x64xf32>
    %41 = math.tanh %40 : vector<2x64xf32>
    %42 = vector.extract_strided_slice %21 {offsets = [0, 96], sizes = [2, 32], strides = [1, 1]} : vector<2x256xf32> to vector<2x32xf32>
    %43 = vector.extract_strided_slice %21 {offsets = [0, 224], sizes = [2, 32], strides = [1, 1]} : vector<2x256xf32> to vector<2x32xf32>
    %44 = tpu.concatenate %42, %43 in 1 : vector<2x32xf32>, vector<2x32xf32> -> vector<2x64xf32>
    %45 = arith.negf %44 : vector<2x64xf32>
    %46 = math.exp %45 : vector<2x64xf32>
    %cst_14 = arith.constant 1.000000e+00 : f32
    %47 = vector.broadcast %cst_14 : f32 to vector<2x64xf32>
    %48 = arith.addf %47, %46 : vector<2x64xf32>
    %49 = arith.divf %47, %48 : vector<2x64xf32>
    %c0_15 = arith.constant 0 : index
    %c0_16 = arith.constant 0 : index
    %50 = vector.load %arg8[%c0_15, %c0_16] : memref<2x64xf32, #tpu.memory_space<vmem>>, vector<2x64xf32>
    %51 = arith.mulf %37, %50 : vector<2x64xf32>
    %52 = arith.mulf %29, %41 : vector<2x64xf32>
    %53 = arith.addf %51, %52 : vector<2x64xf32>
    %54 = math.tanh %53 : vector<2x64xf32>
    %55 = arith.mulf %49, %54 : vector<2x64xf32>
    %56 = vector.shape_cast %7 : vector<2x1xf32> to vector<2x1xf32>
    %57 = vector.broadcast %56 : vector<2x1xf32> to vector<2x32xf32>
    %58 = vector.shape_cast %12 : vector<2x1xf32> to vector<2x1xf32>
    %59 = vector.broadcast %58 : vector<2x1xf32> to vector<2x32xf32>
    %60 = tpu.concatenate %57, %59 in 1 : vector<2x32xf32>, vector<2x32xf32> -> vector<2x64xf32>
    %61 = arith.mulf %60, %55 : vector<2x64xf32>
    %cst_17 = arith.constant 1.000000e+00 : f32
    %62 = vector.broadcast %cst_17 : f32 to vector<2x64xf32>
    %63 = arith.subf %62, %60 : vector<2x64xf32>
    %c0_18 = arith.constant 0 : index
    %c0_19 = arith.constant 0 : index
    %64 = vector.load %arg7[%c0_18, %c0_19] : memref<2x64xf32, #tpu.memory_space<vmem>>, vector<2x64xf32>
    %65 = arith.mulf %63, %64 : vector<2x64xf32>
    %66 = arith.addf %61, %65 : vector<2x64xf32>
    %c0_20 = arith.constant 0 : index
    %c0_21 = arith.constant 0 : index
    %67 = vector.load %arg7[%c0_20, %c0_21] : memref<2x64xf32, #tpu.memory_space<vmem>>, vector<2x64xf32>
    tpu.vector_store %arg7[%c0_20, %c0_21], %66 {strides = array<i32>} : memref<2x64xf32, #tpu.memory_space<vmem>>, vector<2x64xf32>,
    %68 = arith.mulf %60, %53 : vector<2x64xf32>
    %cst_22 = arith.constant 1.000000e+00 : f32
    %69 = vector.broadcast %cst_22 : f32 to vector<2x64xf32>
    %70 = arith.subf %69, %60 : vector<2x64xf32>
    %c0_23 = arith.constant 0 : index
    %c0_24 = arith.constant 0 : index
    %71 = vector.load %arg8[%c0_23, %c0_24] : memref<2x64xf32, #tpu.memory_space<vmem>>, vector<2x64xf32>
    %72 = arith.mulf %70, %71 : vector<2x64xf32>
    %73 = arith.addf %68, %72 : vector<2x64xf32>
    %c0_25 = arith.constant 0 : index
    %c0_26 = arith.constant 0 : index
    %74 = vector.load %arg8[%c0_25, %c0_26] : memref<2x64xf32, #tpu.memory_space<vmem>>, vector<2x64xf32>
    tpu.vector_store %arg8[%c0_25, %c0_26], %73 {strides = array<i32>} : memref<2x64xf32, #tpu.memory_space<vmem>>, vector<2x64xf32>,
    %75 = vector.extract_strided_slice %55 {offsets = [0, 0], sizes = [2, 32], strides = [1, 1]} : vector<2x64xf32> to vector<2x32xf32>
    %76 = vector.broadcast %7 : vector<2x1xf32> to vector<2x32xf32>
    %77 = arith.mulf %76, %75 : vector<2x32xf32>
    %c0_27 = arith.constant 0 : index
    %c0_28 = arith.constant 0 : index
    %c0_29 = arith.constant 0 : index
    %78 = vector.load %arg5[%c0_27, %c0_28, %c0_29] : memref<1x2x32xf32, #tpu.memory_space<vmem>>, vector<1x2x32xf32>
    %79 = vector.shape_cast %78 : vector<1x2x32xf32> to vector<2x32xf32>
    %80 = vector.shape_cast %77 : vector<2x32xf32> to vector<1x2x32xf32>
    tpu.vector_store %arg5[%c0_27, %c0_28, %c0_29], %80 {strides = array<i32>} : memref<1x2x32xf32, #tpu.memory_space<vmem>>, vector<1x2x32xf32>,
    %81 = vector.extract_strided_slice %55 {offsets = [0, 32], sizes = [2, 32], strides = [1, 1]} : vector<2x64xf32> to vector<2x32xf32>
    %82 = vector.broadcast %12 : vector<2x1xf32> to vector<2x32xf32>
    %83 = arith.mulf %82, %81 : vector<2x32xf32>
    %c0_30 = arith.constant 0 : index
    %c0_31 = arith.constant 0 : index
    %c0_32 = arith.constant 0 : index
    %84 = vector.load %arg6[%c0_30, %c0_31, %c0_32] : memref<1x2x32xf32, #tpu.memory_space<vmem>>, vector<1x2x32xf32>
    %85 = vector.shape_cast %84 : vector<1x2x32xf32> to vector<2x32xf32>
    %86 = vector.shape_cast %83 : vector<2x32xf32> to vector<1x2x32xf32>
    tpu.vector_store %arg6[%c0_30, %c0_31, %c0_32], %86 {strides = array<i32>} : memref<1x2x32xf32, #tpu.memory_space<vmem>>, vector<1x2x32xf32>,
    return
  }
  func.func @transform_0(%arg0: i32) -> (i32, i32, i32) {
    %c0_i32 = arith.constant 0 : i32
    %c0_i32_0 = arith.constant 0 : i32
    %c0_i32_1 = arith.constant 0 : i32
    return %arg0, %c0_i32, %c0_i32_0 : i32, i32, i32
  }
  func.func @transform_1(%arg0: i32) -> (i32, i32, i32) {
    %c7_i32 = arith.constant 7 : i32
    %0 = arith.subi %c7_i32, %arg0 : i32
    %c0_i32 = arith.constant 0 : i32
    %c1_i32 = arith.constant 1 : i32
    %c0_i32_0 = arith.constant 0 : i32
    return %0, %c0_i32, %c1_i32 : i32, i32, i32
  }
  func.func @transform_2(%arg0: i32) -> (i32, i32) {
    %c0_i32 = arith.constant 0 : i32
    %c0_i32_0 = arith.constant 0 : i32
    %c0_i32_1 = arith.constant 0 : i32
    return %c0_i32, %c0_i32_0 : i32, i32
  }
  func.func @transform_3(%arg0: i32) -> (i32, i32) {
    %c0_i32 = arith.constant 0 : i32
    %c0_i32_0 = arith.constant 0 : i32
    %c0_i32_1 = arith.constant 0 : i32
    return %c0_i32, %c0_i32_0 : i32, i32
  }
  func.func @transform_4(%arg0: i32) -> (i32, i32, i32) {
    %c0_i32 = arith.constant 0 : i32
    %c0_i32_0 = arith.constant 0 : i32
    %c0_i32_1 = arith.constant 0 : i32
    return %arg0, %c0_i32, %c0_i32_0 : i32, i32, i32
  }
  func.func @transform_5(%arg0: i32) -> (i32, i32, i32) {
    %c7_i32 = arith.constant 7 : i32
    %0 = arith.subi %c7_i32, %arg0 : i32
    %c0_i32 = arith.constant 0 : i32
    %c0_i32_0 = arith.constant 0 : i32
    %c0_i32_1 = arith.constant 0 : i32
    return %0, %c0_i32, %c0_i32_0 : i32, i32, i32
  }
}

module attributes {stable_mosaic.version = 11 : i64} {
  func.func @_ln_res_kernel(%arg0: i32, %arg1: memref<8x2x32xf32, #tpu.memory_space<vmem>>, %arg2: memref<8x2x32xf32, #tpu.memory_space<vmem>>, %arg3: memref<8x2x64xf32, #tpu.memory_space<vmem>>, %arg4: memref<8x2x64xf32, #tpu.memory_space<vmem>>, %arg5: memref<8x2x64xf32, #tpu.memory_space<vmem>>, %arg6: memref<8x2x64xf32, #tpu.memory_space<vmem>>) attributes {dimension_semantics = [#tpu.dimension_semantics<parallel>], iteration_bounds = array<i64: 1>, scalar_prefetch = 0 : i64, scratch_operands = 0 : i64, tpu.core_type = #tpu.core_type<tc>, window_params = [{transform_indices = @transform_0, window_bounds = array<i64: 8, 2, 32>}, {transform_indices = @transform_1, window_bounds = array<i64: 8, 2, 32>}, {transform_indices = @transform_2, window_bounds = array<i64: 8, 2, 64>}, {transform_indices = @transform_3, window_bounds = array<i64: 8, 2, 64>}, {transform_indices = @transform_4, window_bounds = array<i64: 8, 2, 64>}, {transform_indices = @transform_5, window_bounds = array<i64: 8, 2, 64>}]} {
    %c0 = arith.constant 0 : index
    %c0_0 = arith.constant 0 : index
    %c0_1 = arith.constant 0 : index
    %0 = vector.load %arg1[%c0, %c0_0, %c0_1] : memref<8x2x32xf32, #tpu.memory_space<vmem>>, vector<8x2x32xf32>
    %c0_2 = arith.constant 0 : index
    %c0_3 = arith.constant 0 : index
    %c0_4 = arith.constant 0 : index
    %1 = vector.load %arg2[%c0_2, %c0_3, %c0_4] : memref<8x2x32xf32, #tpu.memory_space<vmem>>, vector<8x2x32xf32>
    %cst = arith.constant dense<0.000000e+00> : vector<2xf32>
    %2 = vector.multi_reduction <add>, %0, %cst [0, 2] : vector<8x2x32xf32> to vector<2xf32>
    %3 = vector.shape_cast %2 : vector<2xf32> to vector<1x2x1xf32>
    %cst_5 = arith.constant dense<0.000000e+00> : vector<2xf32>
    %4 = vector.multi_reduction <add>, %1, %cst_5 [0, 2] : vector<8x2x32xf32> to vector<2xf32>
    %5 = vector.shape_cast %4 : vector<2xf32> to vector<1x2x1xf32>
    %6 = arith.addf %3, %5 : vector<1x2x1xf32>
    %cst_6 = arith.constant 5.120000e+02 : f32
    %7 = vector.broadcast %cst_6 : f32 to vector<1x2x1xf32>
    %8 = arith.divf %6, %7 : vector<1x2x1xf32>
    %9 = vector.broadcast %8 : vector<1x2x1xf32> to vector<8x2x32xf32>
    %10 = arith.subf %0, %9 : vector<8x2x32xf32>
    %11 = vector.broadcast %8 : vector<1x2x1xf32> to vector<8x2x32xf32>
    %12 = arith.subf %1, %11 : vector<8x2x32xf32>
    %13 = arith.mulf %10, %10 : vector<8x2x32xf32>
    %cst_7 = arith.constant dense<0.000000e+00> : vector<2xf32>
    %14 = vector.multi_reduction <add>, %13, %cst_7 [0, 2] : vector<8x2x32xf32> to vector<2xf32>
    %15 = vector.shape_cast %14 : vector<2xf32> to vector<1x2x1xf32>
    %16 = arith.mulf %12, %12 : vector<8x2x32xf32>
    %cst_8 = arith.constant dense<0.000000e+00> : vector<2xf32>
    %17 = vector.multi_reduction <add>, %16, %cst_8 [0, 2] : vector<8x2x32xf32> to vector<2xf32>
    %18 = vector.shape_cast %17 : vector<2xf32> to vector<1x2x1xf32>
    %19 = arith.addf %15, %18 : vector<1x2x1xf32>
    %cst_9 = arith.constant 5.120000e+02 : f32
    %20 = vector.broadcast %cst_9 : f32 to vector<1x2x1xf32>
    %21 = arith.divf %19, %20 : vector<1x2x1xf32>
    %cst_10 = arith.constant 9.99999974E-6 : f32
    %22 = vector.broadcast %cst_10 : f32 to vector<1x2x1xf32>
    %23 = arith.addf %21, %22 : vector<1x2x1xf32>
    %24 = math.rsqrt %23 : vector<1x2x1xf32>
    %25 = tpu.concatenate %0, %1 in 2 : vector<8x2x32xf32>, vector<8x2x32xf32> -> vector<8x2x64xf32>
    %c0_11 = arith.constant 0 : index
    %c0_12 = arith.constant 0 : index
    %c0_13 = arith.constant 0 : index
    %26 = vector.load %arg4[%c0_11, %c0_12, %c0_13] : memref<8x2x64xf32, #tpu.memory_space<vmem>>, vector<8x2x64xf32>
    tpu.vector_store %arg4[%c0_11, %c0_12, %c0_13], %25 {strides = array<i32>} : memref<8x2x64xf32, #tpu.memory_space<vmem>>, vector<8x2x64xf32>,
    %27 = vector.broadcast %24 : vector<1x2x1xf32> to vector<8x2x32xf32>
    %28 = arith.mulf %10, %27 : vector<8x2x32xf32>
    %29 = vector.broadcast %24 : vector<1x2x1xf32> to vector<8x2x32xf32>
    %30 = arith.mulf %12, %29 : vector<8x2x32xf32>
    %31 = tpu.concatenate %28, %30 in 2 : vector<8x2x32xf32>, vector<8x2x32xf32> -> vector<8x2x64xf32>
    %c0_14 = arith.constant 0 : index
    %c0_15 = arith.constant 0 : index
    %c0_16 = arith.constant 0 : index
    %32 = vector.load %arg5[%c0_14, %c0_15, %c0_16] : memref<8x2x64xf32, #tpu.memory_space<vmem>>, vector<8x2x64xf32>
    tpu.vector_store %arg5[%c0_14, %c0_15, %c0_16], %31 {strides = array<i32>} : memref<8x2x64xf32, #tpu.memory_space<vmem>>, vector<8x2x64xf32>,
    %c0_17 = arith.constant 0 : index
    %c0_18 = arith.constant 0 : index
    %c0_19 = arith.constant 0 : index
    %33 = vector.load %arg3[%c0_17, %c0_18, %c0_19] : memref<8x2x64xf32, #tpu.memory_space<vmem>>, vector<8x2x64xf32>
    %34 = arith.addf %33, %31 : vector<8x2x64xf32>
    %c0_20 = arith.constant 0 : index
    %c0_21 = arith.constant 0 : index
    %c0_22 = arith.constant 0 : index
    %35 = vector.load %arg6[%c0_20, %c0_21, %c0_22] : memref<8x2x64xf32, #tpu.memory_space<vmem>>, vector<8x2x64xf32>
    tpu.vector_store %arg6[%c0_20, %c0_21, %c0_22], %34 {strides = array<i32>} : memref<8x2x64xf32, #tpu.memory_space<vmem>>, vector<8x2x64xf32>,
    return
  }
  func.func @transform_0(%arg0: i32) -> (i32, i32, i32) {
    %c0_i32 = arith.constant 0 : i32
    %c0_i32_0 = arith.constant 0 : i32
    %c0_i32_1 = arith.constant 0 : i32
    return %c0_i32, %arg0, %c0_i32_0 : i32, i32, i32
  }
  func.func @transform_1(%arg0: i32) -> (i32, i32, i32) {
    %c0_i32 = arith.constant 0 : i32
    %c0_i32_0 = arith.constant 0 : i32
    %c0_i32_1 = arith.constant 0 : i32
    return %c0_i32, %arg0, %c0_i32_0 : i32, i32, i32
  }
  func.func @transform_2(%arg0: i32) -> (i32, i32, i32) {
    %c0_i32 = arith.constant 0 : i32
    %c0_i32_0 = arith.constant 0 : i32
    %c0_i32_1 = arith.constant 0 : i32
    return %c0_i32, %arg0, %c0_i32_0 : i32, i32, i32
  }
  func.func @transform_3(%arg0: i32) -> (i32, i32, i32) {
    %c0_i32 = arith.constant 0 : i32
    %c0_i32_0 = arith.constant 0 : i32
    %c0_i32_1 = arith.constant 0 : i32
    return %c0_i32, %arg0, %c0_i32_0 : i32, i32, i32
  }
  func.func @transform_4(%arg0: i32) -> (i32, i32, i32) {
    %c0_i32 = arith.constant 0 : i32
    %c0_i32_0 = arith.constant 0 : i32
    %c0_i32_1 = arith.constant 0 : i32
    return %c0_i32, %arg0, %c0_i32_0 : i32, i32, i32
  }
  func.func @transform_5(%arg0: i32) -> (i32, i32, i32) {
    %c0_i32 = arith.constant 0 : i32
    %c0_i32_0 = arith.constant 0 : i32
    %c0_i32_1 = arith.constant 0 : i32
    return %c0_i32, %arg0, %c0_i32_0 : i32, i32, i32
  }
}

module attributes {stable_mosaic.version = 11 : i64} {
  func.func @_ln_res_kernel(%arg0: i32, %arg1: memref<8x2x32xf32, #tpu.memory_space<vmem>>, %arg2: memref<8x2x32xf32, #tpu.memory_space<vmem>>, %arg3: memref<8x2x64xf32, #tpu.memory_space<vmem>>, %arg4: memref<8x2x64xf32, #tpu.memory_space<vmem>>, %arg5: memref<8x2x64xf32, #tpu.memory_space<vmem>>, %arg6: memref<8x2x64xf32, #tpu.memory_space<vmem>>) attributes {dimension_semantics = [#tpu.dimension_semantics<parallel>], iteration_bounds = array<i64: 1>, scalar_prefetch = 0 : i64, scratch_operands = 0 : i64, tpu.core_type = #tpu.core_type<tc>, window_params = [{transform_indices = @transform_0, window_bounds = array<i64: 8, 2, 32>}, {transform_indices = @transform_1, window_bounds = array<i64: 8, 2, 32>}, {transform_indices = @transform_2, window_bounds = array<i64: 8, 2, 64>}, {transform_indices = @transform_3, window_bounds = array<i64: 8, 2, 64>}, {transform_indices = @transform_4, window_bounds = array<i64: 8, 2, 64>}, {transform_indices = @transform_5, window_bounds = array<i64: 8, 2, 64>}]} {
    %c0 = arith.constant 0 : index
    %c0_0 = arith.constant 0 : index
    %c0_1 = arith.constant 0 : index
    %0 = vector.load %arg1[%c0, %c0_0, %c0_1] : memref<8x2x32xf32, #tpu.memory_space<vmem>>, vector<8x2x32xf32>
    %c0_2 = arith.constant 0 : index
    %c0_3 = arith.constant 0 : index
    %c0_4 = arith.constant 0 : index
    %1 = vector.load %arg2[%c0_2, %c0_3, %c0_4] : memref<8x2x32xf32, #tpu.memory_space<vmem>>, vector<8x2x32xf32>
    %cst = arith.constant dense<0.000000e+00> : vector<2xf32>
    %2 = vector.multi_reduction <add>, %0, %cst [0, 2] : vector<8x2x32xf32> to vector<2xf32>
    %3 = vector.shape_cast %2 : vector<2xf32> to vector<1x2x1xf32>
    %cst_5 = arith.constant dense<0.000000e+00> : vector<2xf32>
    %4 = vector.multi_reduction <add>, %1, %cst_5 [0, 2] : vector<8x2x32xf32> to vector<2xf32>
    %5 = vector.shape_cast %4 : vector<2xf32> to vector<1x2x1xf32>
    %6 = arith.addf %3, %5 : vector<1x2x1xf32>
    %cst_6 = arith.constant 5.120000e+02 : f32
    %7 = vector.broadcast %cst_6 : f32 to vector<1x2x1xf32>
    %8 = arith.divf %6, %7 : vector<1x2x1xf32>
    %9 = vector.broadcast %8 : vector<1x2x1xf32> to vector<8x2x32xf32>
    %10 = arith.subf %0, %9 : vector<8x2x32xf32>
    %11 = vector.broadcast %8 : vector<1x2x1xf32> to vector<8x2x32xf32>
    %12 = arith.subf %1, %11 : vector<8x2x32xf32>
    %13 = arith.mulf %10, %10 : vector<8x2x32xf32>
    %cst_7 = arith.constant dense<0.000000e+00> : vector<2xf32>
    %14 = vector.multi_reduction <add>, %13, %cst_7 [0, 2] : vector<8x2x32xf32> to vector<2xf32>
    %15 = vector.shape_cast %14 : vector<2xf32> to vector<1x2x1xf32>
    %16 = arith.mulf %12, %12 : vector<8x2x32xf32>
    %cst_8 = arith.constant dense<0.000000e+00> : vector<2xf32>
    %17 = vector.multi_reduction <add>, %16, %cst_8 [0, 2] : vector<8x2x32xf32> to vector<2xf32>
    %18 = vector.shape_cast %17 : vector<2xf32> to vector<1x2x1xf32>
    %19 = arith.addf %15, %18 : vector<1x2x1xf32>
    %cst_9 = arith.constant 5.120000e+02 : f32
    %20 = vector.broadcast %cst_9 : f32 to vector<1x2x1xf32>
    %21 = arith.divf %19, %20 : vector<1x2x1xf32>
    %cst_10 = arith.constant 9.99999974E-6 : f32
    %22 = vector.broadcast %cst_10 : f32 to vector<1x2x1xf32>
    %23 = arith.addf %21, %22 : vector<1x2x1xf32>
    %24 = math.rsqrt %23 : vector<1x2x1xf32>
    %25 = tpu.concatenate %0, %1 in 2 : vector<8x2x32xf32>, vector<8x2x32xf32> -> vector<8x2x64xf32>
    %c0_11 = arith.constant 0 : index
    %c0_12 = arith.constant 0 : index
    %c0_13 = arith.constant 0 : index
    %26 = vector.load %arg4[%c0_11, %c0_12, %c0_13] : memref<8x2x64xf32, #tpu.memory_space<vmem>>, vector<8x2x64xf32>
    tpu.vector_store %arg4[%c0_11, %c0_12, %c0_13], %25 {strides = array<i32>} : memref<8x2x64xf32, #tpu.memory_space<vmem>>, vector<8x2x64xf32>,
    %27 = vector.broadcast %24 : vector<1x2x1xf32> to vector<8x2x32xf32>
    %28 = arith.mulf %10, %27 : vector<8x2x32xf32>
    %29 = vector.broadcast %24 : vector<1x2x1xf32> to vector<8x2x32xf32>
    %30 = arith.mulf %12, %29 : vector<8x2x32xf32>
    %31 = tpu.concatenate %28, %30 in 2 : vector<8x2x32xf32>, vector<8x2x32xf32> -> vector<8x2x64xf32>
    %c0_14 = arith.constant 0 : index
    %c0_15 = arith.constant 0 : index
    %c0_16 = arith.constant 0 : index
    %32 = vector.load %arg5[%c0_14, %c0_15, %c0_16] : memref<8x2x64xf32, #tpu.memory_space<vmem>>, vector<8x2x64xf32>
    tpu.vector_store %arg5[%c0_14, %c0_15, %c0_16], %31 {strides = array<i32>} : memref<8x2x64xf32, #tpu.memory_space<vmem>>, vector<8x2x64xf32>,
    %c0_17 = arith.constant 0 : index
    %c0_18 = arith.constant 0 : index
    %c0_19 = arith.constant 0 : index
    %33 = vector.load %arg3[%c0_17, %c0_18, %c0_19] : memref<8x2x64xf32, #tpu.memory_space<vmem>>, vector<8x2x64xf32>
    %34 = arith.addf %33, %31 : vector<8x2x64xf32>
    %c0_20 = arith.constant 0 : index
    %c0_21 = arith.constant 0 : index
    %c0_22 = arith.constant 0 : index
    %35 = vector.load %arg6[%c0_20, %c0_21, %c0_22] : memref<8x2x64xf32, #tpu.memory_space<vmem>>, vector<8x2x64xf32>
    tpu.vector_store %arg6[%c0_20, %c0_21, %c0_22], %34 {strides = array<i32>} : memref<8x2x64xf32, #tpu.memory_space<vmem>>, vector<8x2x64xf32>,
    return
  }
  func.func @transform_0(%arg0: i32) -> (i32, i32, i32) {
    %c0_i32 = arith.constant 0 : i32
    %c0_i32_0 = arith.constant 0 : i32
    %c0_i32_1 = arith.constant 0 : i32
    return %c0_i32, %arg0, %c0_i32_0 : i32, i32, i32
  }
  func.func @transform_1(%arg0: i32) -> (i32, i32, i32) {
    %c0_i32 = arith.constant 0 : i32
    %c0_i32_0 = arith.constant 0 : i32
    %c0_i32_1 = arith.constant 0 : i32
    return %c0_i32, %arg0, %c0_i32_0 : i32, i32, i32
  }
  func.func @transform_2(%arg0: i32) -> (i32, i32, i32) {
    %c0_i32 = arith.constant 0 : i32
    %c0_i32_0 = arith.constant 0 : i32
    %c0_i32_1 = arith.constant 0 : i32
    return %c0_i32, %arg0, %c0_i32_0 : i32, i32, i32
  }
  func.func @transform_3(%arg0: i32) -> (i32, i32, i32) {
    %c0_i32 = arith.constant 0 : i32
    %c0_i32_0 = arith.constant 0 : i32
    %c0_i32_1 = arith.constant 0 : i32
    return %c0_i32, %arg0, %c0_i32_0 : i32, i32, i32
  }
  func.func @transform_4(%arg0: i32) -> (i32, i32, i32) {
    %c0_i32 = arith.constant 0 : i32
    %c0_i32_0 = arith.constant 0 : i32
    %c0_i32_1 = arith.constant 0 : i32
    return %c0_i32, %arg0, %c0_i32_0 : i32, i32, i32
  }
  func.func @transform_5(%arg0: i32) -> (i32, i32, i32) {
    %c0_i32 = arith.constant 0 : i32
    %c0_i32_0 = arith.constant 0 : i32
    %c0_i32_1 = arith.constant 0 : i32
    return %c0_i32, %arg0, %c0_i32_0 : i32, i32, i32
  }
}

module attributes {stable_mosaic.version = 11 : i64} {
  func.func @_down_fc_kernel(%arg0: i32, %arg1: i32, %arg2: memref<16x64xf32, #tpu.memory_space<vmem>>, %arg3: memref<64x32xf32, #tpu.memory_space<vmem>>, %arg4: memref<1x32xf32, #tpu.memory_space<vmem>>, %arg5: memref<32x128xf32, #tpu.memory_space<vmem>>, %arg6: memref<1x128xf32, #tpu.memory_space<vmem>>, %arg7: memref<16x128xf32, #tpu.memory_space<vmem>>, %arg8: memref<16x32xf32, #tpu.memory_space<vmem>>) attributes {dimension_semantics = [#tpu.dimension_semantics<parallel>, #tpu.dimension_semantics<arbitrary>], iteration_bounds = array<i64: 1, 1>, scalar_prefetch = 0 : i64, scratch_operands = 1 : i64, tpu.core_type = #tpu.core_type<tc>, window_params = [{transform_indices = @transform_0, window_bounds = array<i64: 16, 64>}, {pipeline_mode = #tpu.pipeline_mode<synchronous>, transform_indices = @transform_1, window_bounds = array<i64: 64, 32>}, {pipeline_mode = #tpu.pipeline_mode<synchronous>, transform_indices = @transform_2, window_bounds = array<i64: 1, 32>}, {transform_indices = @transform_3, window_bounds = array<i64: 32, 128>}, {transform_indices = @transform_4, window_bounds = array<i64: 1, 128>}, {transform_indices = @transform_5, window_bounds = array<i64: 16, 128>}]} {
    %c0_i32 = arith.constant 0 : i32
    %0 = arith.cmpi eq, %arg1, %c0_i32 : i32
    %1 = arith.extui %0 : i1 to i32
    %c0_i32_0 = arith.constant 0 : i32
    %2 = arith.cmpi ne, %1, %c0_i32_0 : i32
    scf.if %2 {
      %c0_8 = arith.constant 0 : index
      %c0_9 = arith.constant 0 : index
      %10 = vector.load %arg2[%c0_8, %c0_9] : memref<16x64xf32, #tpu.memory_space<vmem>>, vector<16x64xf32>
      %c0_10 = arith.constant 0 : index
      %c0_11 = arith.constant 0 : index
      %11 = vector.load %arg3[%c0_10, %c0_11] : memref<64x32xf32, #tpu.memory_space<vmem>>, vector<64x32xf32>
      %cst_12 = arith.constant dense<0.000000e+00> : vector<16x32xf32>
      %12 = tpu.matmul %10, %11, %cst_12 {dimension_numbers = #tpu.dot_dimension_numbers<[1], [0], [0], [1], [0, 0, 1, 1], [], []>, precision = #tpu.contract_precision<fp32>} : vector<16x64xf32>, vector<64x32xf32>, vector<16x32xf32> -> vector<16x32xf32>
      %c0_13 = arith.constant 0 : index
      %c0_14 = arith.constant 0 : index
      %13 = vector.load %arg4[%c0_13, %c0_14] : memref<1x32xf32, #tpu.memory_space<vmem>>, vector<1x32xf32>
      %14 = vector.broadcast %13 : vector<1x32xf32> to vector<16x32xf32>
      %15 = arith.addf %12, %14 : vector<16x32xf32>
      %c0_15 = arith.constant 0 : index
      %c0_16 = arith.constant 0 : index
      %16 = vector.load %arg8[%c0_15, %c0_16] : memref<16x32xf32, #tpu.memory_space<vmem>>, vector<16x32xf32>
      tpu.vector_store %arg8[%c0_15, %c0_16], %15 {strides = array<i32>} : memref<16x32xf32, #tpu.memory_space<vmem>>, vector<16x32xf32>,
    } else {
    }
    %c0 = arith.constant 0 : index
    %c0_1 = arith.constant 0 : index
    %3 = vector.load %arg8[%c0, %c0_1] : memref<16x32xf32, #tpu.memory_space<vmem>>, vector<16x32xf32>
    %c0_2 = arith.constant 0 : index
    %c0_3 = arith.constant 0 : index
    %4 = vector.load %arg5[%c0_2, %c0_3] : memref<32x128xf32, #tpu.memory_space<vmem>>, vector<32x128xf32>
    %cst = arith.constant dense<0.000000e+00> : vector<16x128xf32>
    %5 = tpu.matmul %3, %4, %cst {dimension_numbers = #tpu.dot_dimension_numbers<[1], [0], [0], [1], [0, 0, 1, 1], [], []>, precision = #tpu.contract_precision<fp32>} : vector<16x32xf32>, vector<32x128xf32>, vector<16x128xf32> -> vector<16x128xf32>
    %c0_4 = arith.constant 0 : index
    %c0_5 = arith.constant 0 : index
    %6 = vector.load %arg6[%c0_4, %c0_5] : memref<1x128xf32, #tpu.memory_space<vmem>>, vector<1x128xf32>
    %7 = vector.broadcast %6 : vector<1x128xf32> to vector<16x128xf32>
    %8 = arith.addf %5, %7 : vector<16x128xf32>
    %c0_6 = arith.constant 0 : index
    %c0_7 = arith.constant 0 : index
    %9 = vector.load %arg7[%c0_6, %c0_7] : memref<16x128xf32, #tpu.memory_space<vmem>>, vector<16x128xf32>
    tpu.vector_store %arg7[%c0_6, %c0_7], %8 {strides = array<i32>} : memref<16x128xf32, #tpu.memory_space<vmem>>, vector<16x128xf32>,
    return
  }
  func.func @transform_0(%arg0: i32, %arg1: i32) -> (i32, i32) {
    %c0_i32 = arith.constant 0 : i32
    %c0_i32_0 = arith.constant 0 : i32
    return %arg0, %c0_i32 : i32, i32
  }
  func.func @transform_1(%arg0: i32, %arg1: i32) -> (i32, i32) {
    %c0_i32 = arith.constant 0 : i32
    %c0_i32_0 = arith.constant 0 : i32
    %c0_i32_1 = arith.constant 0 : i32
    return %c0_i32, %c0_i32_0 : i32, i32
  }
  func.func @transform_2(%arg0: i32, %arg1: i32) -> (i32, i32) {
    %c0_i32 = arith.constant 0 : i32
    %c0_i32_0 = arith.constant 0 : i32
    %c0_i32_1 = arith.constant 0 : i32
    return %c0_i32, %c0_i32_0 : i32, i32
  }
  func.func @transform_3(%arg0: i32, %arg1: i32) -> (i32, i32) {
    %c0_i32 = arith.constant 0 : i32
    %c0_i32_0 = arith.constant 0 : i32
    return %c0_i32, %arg1 : i32, i32
  }
  func.func @transform_4(%arg0: i32, %arg1: i32) -> (i32, i32) {
    %c0_i32 = arith.constant 0 : i32
    %c0_i32_0 = arith.constant 0 : i32
    return %c0_i32, %arg1 : i32, i32
  }
  func.func @transform_5(%arg0: i32, %arg1: i32) -> (i32, i32) {
    %c0_i32 = arith.constant 0 : i32
    return %arg0, %arg1 : i32, i32
  }
}

</mosaic_0001>

<bundles_post_ra>
// kernel: lstm_mlm_forward.8
= control target key start
LH: loop header
LB: loop body
LE: loop exit
PB: predicated region body
PF: predicated region fallthrough
CT: control target
= control target key end

     0   :  { %s432_s0 = inlined_call_operand.vmem [shape: s32[16], index: 0, kind: input, shape index: {}]   ;;  %s433_s1 = inlined_call_operand.hbm [shape: f32[128,1,64], index: 1, kind: input, shape index: {}]   ;;  %s434_s2 = inlined_call_operand.vmem [shape: f32[16,1,64], index: 2, kind: output, shape index: {}]  }
   0x1   :  { %s7_s11 = sshll.u32 %s432_s0, 4  ;;  %s8_s11 = int_to_ptr.vmem [resolvable:$true] %s7_s11 }
   0x2   :  { %s248_s12 = scalar_lea.vmem %s8_s11, 16  ;;  %p253_p1 = scmp.lt.s32.totalorder %s8_s11, %s8_s11 }
   0x3   :  { %p249_p0 = scmp.ne.s32.totalorder %s8_s11, %s248_s12  ;;  %p254_p2 = scmp.lt.s32.totalorder %s248_s12, %s248_s12 }
   0x5   :  { %p255_p3 = por %p254_p2, %p253_p1 }
   0x7   :  { %p256_p4 = pnand %p255_p3, %p249_p0 }
   0x9   :  { %259 = shalt.err (!%p256_p4)  }
   0xa   :  { %s326_s13 = smov [#allocation3]  }
   0xb   :  { %10 = dma.vmem_to_smem %s8_s11, 16, %s326_s13, [#allocation2] }
   0xc   :  { %304 = dma.done.wait [#allocation2], 16 }
   0xd   :  { %305 = vsyncadd [#allocation2], 4294967280 }
   0xe   :  { %12 = sfence }
   0xf   :  { %13 = vsyncpa [#allocation5], 0 }
  0x10   :  { %15 = vsyncpa [#allocation5 + $0x1], 0  ;;  %s346_s14 = smov 0   ;;  %s348_s15 = smov 0  }
  0x11   :  { %s350_s0 = smov 0   ;;  %s352_s16 = smov 0  }
  0x12 LB: > { %s362_s17 = sadd.s32 1, %s324_s16   ;;  %s364_s18 = sadd.s32 4294967295, %s324_s16   ;;  %s324_s16 = sphi %s352_s16, %s444_s16   ;;  %s320_s0 = sphi %s350_s0, %s443_s0   ;;  %s316_s15 = sphi %s348_s15, %s442_s15   ;;  %s312_s14 = sphi %s346_s14, %s441_s14  }
  0x13   : > { %s25_s19 = sld [smem:[#allocation3 + %s324_s16]]  ;;  %p37_p5 = scmp.ne.s32.totalorder %s320_s0, %s316_s15 }
  0x14   : > { %s26_s20 = sld [smem:[#allocation3 + %s362_s17]]  ;;  %p38_p6 = scmp.eq.s32.totalorder %s324_s16, 0 }
  0x15   : > { %p43_p7 = scmp.ne.s32.totalorder %s316_s15, %s312_s14  ;;  %p44_p8 = scmp.eq.s32.totalorder %s364_s18, 0 }
  0x16   : > { %p39_p9 = por %p38_p6, %p37_p5  ;;  %s93_s22 = sand.u32 1, %s320_s0  }
  0x17   : > { %p371_p10 = por %p44_p8, %p43_p7  ;;  %s30_s23 = sadd.s32 1, %s320_s0 }
  0x18   : > { %p214_p11 = scmp.lt.s32.totalorder %s324_s16, 16  ;;  %p201_p0 = scmp.ge.s32.totalorder %s324_s16, 1 }
  0x19   : > { %s436_s21 = scalar_select %p371_p10, 1, 0 }
  0x1a   : > { %s27_s24 = ssub.s32 %s25_s19, %s26_s20  ;;  %p380_p13 = pnand %p214_p11, %p39_p9 }
  0x1b   : > { %p28_p12 = scmp.eq.s32.totalorder %s27_s24, 0  ;;  %p109_p1 = scmp.lt.s32.totalorder %s324_s16, 17 }
  0x1c   : > { %s204_s25 = scalar_select %p39_p9, [#allocation3], [#allocation6] }
  0x1d   : > { %s378_s26 = scalar_select %p28_p12, %s320_s0, %s30_s23  }
  0x1e   : > { %s205_s27 = scalar_select %p39_p9, %s324_s16, 0 }
  0x1f   : > { %s446_s25 = smov (!%p214_p11, %s204_s25), [#allocation7]  ;;  %s96_s30 = scalar_lea.vmem [#allocation4], %s93_s22 }
  0x20   : > { %s448_s27 = smov (!%p214_p11, %s205_s27), 0  ;;  %s104_s3 = sshll.u32 %s96_s30, 4  ;;  %s388_s3 = int_to_ptr.vmem [resolvable:$true] %s104_s3 }
  0x21   : > { %s97_s29 = sld [smem:[%s446_s25 + %s448_s27]]  ;;  %p384_p2 = pnand %p201_p0, %p109_p1 }
  0x22   : > { %s94_s9 = scalar_lea.sflag [#allocation5], %s93_s22  ;;  %p262_p4 = pneg %p380_p13 }
  0x23   : > { %s438_s4 = scalar_select %p384_p2, 1, 0 }
  0x24   : > { %s265_s13 = scalar_lea.hbm %s433_s1, 2048 }
  0x27   : > { %s200_s5 = sshll.u32 %s97_s29, 4 }
  0x28   : > { %s102_s8 = scalar_lea.hbm %s433_s1, %s200_s5 }
  0x29   : > { %s260_s10 = scalar_lea.hbm %s102_s8, 16  ;;  %p266_p7 = scmp.lt.s32.totalorder %s102_s8, %s433_s1 }
  0x2a   : > { %p261_p3 = scmp.ne.s32.totalorder %s102_s8, %s260_s10  ;;  %p267_p8 = scmp.lt.s32.totalorder %s265_s13, %s260_s10 }
  0x2c   : > { %p263_p5 = pnand %p262_p4, %p261_p3  ;;  %p268_p9 = por %p267_p8, %p266_p7 }
  0x2e   : > { %p264_p6 = pneg %p263_p5 }
  0x30   : > { %p269_p11 = pnand %p268_p9, %p264_p6 }
  0x32   : > { %272 = shalt.err (!%p269_p11)
}
  0x33   : > { %s273_s19 = scalar_lea.vmem %s388_s3, 16  ;;  %s327_s20 = smov [#allocation4]  }
  0x34   : > { %p274_p12 = scmp.ne.s32.totalorder %s388_s3, %s273_s19  ;;  %s278_s22 = sshll.u32 %s327_s20, 4  ;;  %s279_s22 = int_to_ptr.vmem [resolvable:$false] %s278_s22 }
  0x35   : > { %s280_s23 = scalar_lea.vmem %s279_s22, 32  ;;  %p281_p3 = scmp.lt.s32.totalorder %s388_s3, %s279_s22 }
  0x36   : > { %p276_p0 = pnand %p274_p12, %p262_p4  ;;  %p282_p5 = scmp.lt.s32.totalorder %s280_s23, %s273_s19 }
  0x38   : > { %p277_p1 = pneg %p276_p0  ;;  %p283_p10 = por %p282_p5, %p281_p3 }
  0x3a   : > { %p284_p2 = pnand %p283_p10, %p277_p1 }
  0x3c   : > { %287 = shalt.err (!%p284_p2)
}
  0x3d   : > { %213 = dma.hbm_to_vmem [thread:$0]  (!%p380_p13), %s102_s8, 16, %s388_s3, %s94_s9  }
  0x3e   : > { %p439_p6 = scmp.ne.s32.totalorder %s438_s4, 0 }
  0x3f   : > { %s115_s24 = sand.u32 (!%p439_p6), 1, %s316_s15   ;;  %p440_p4 = scmp.ne.s32.totalorder (!%p439_p6), %s436_s21, 0 }
  0x40   : > { %113 = sbr.rel (%p439_p6) target bundleno = 75 (0x4b), region = 24  ;;  %s116_s25 = scalar_lea.sflag (!%p439_p6), [#allocation5], %s115_s24 }
  0x41   : > { %s118_s27 = scalar_lea.vmem (!%p439_p6), [#allocation4], %s115_s24 }
  0x45   : > { %307 = dma.done.wait (%p440_p4), %s116_s25, 16  }
  0x46   : > { %309 = vsyncadd (%p440_p4), %s116_s25, 4294967280  ;;  %p135_p10 = scmp.lt.s32.totalorder %s364_s18, 15  ;;  %vm139_vm0 = vcmask 516096   ;;  %v138_v0 = vld [vmem:[%s118_s27] sm:$0x1] }
  0x48   : > { %s450_s18 = smov (!%p135_p10, %s364_s18), 15 }
  0x49   : > { %s137_s30 = scalar_lea.vmem %s434_s2, %s450_s18 }
  0x4a   : > { %140 = vst.msk [vmem:[%s137_s30] sm:$0x1] %vm139_vm0, %v138_v0 }
  0x4b PF: > { %p18_p13 = scmp.ge.s32.totalorder %s362_s17, 18   ;;  %s441_s14 = smov %s316_s15 }
  0x4c   : > { %s442_s15 = smov %s320_s0  ;;  %s443_s0 = smov %s378_s26 }
  0x4d   : > { %s444_s16 = smov %s362_s17  ;;  %20 = sbr.rel (!%p18_p13) target bundleno = 18 (0x12), region = 64 }
  0x52   :  { %158 = vsyncpa [#allocation5], 1 }
  0x53   :  { %160 = vsyncpa [#allocation5 + $0x1], 1 }

// kernel: lstm_mlm_forward.9
= control target key start
LH: loop header
LB: loop body
LE: loop exit
PB: predicated region body
PF: predicated region fallthrough
CT: control target
= control target key end

     0   :  { %v787_v3 = vmov 0.0   ;;  %vm44_vm0 = vcmask 523264   ;;  %s1185_s1 = inlined_call_operand.vmem [shape: f32[64,256], index: 1, kind: input, shape index: {}]   ;;  %s1186_s0 = inlined_call_operand.vmem [shape: f32[16,64], index: 0, kind: input, shape index: {}]   ;;  %s1187_s2 = inlined_call_operand.vmem [shape: f32[1,256], index: 2, kind: input, shape index: {}]   ;;  %s1188_s3 = inlined_call_operand.vmem [shape: f32[16,256], index: 3, kind: output, shape index: {}]  }
   0x1   :  { %v43_v0 = vld [vmem:[%s1185_s1 + $0x78] sm:$0xff]  ;;  %v42_v1 = vld [vmem:[%s1185_s1 + $0x70] sm:$0xff]  ;;  %v41_v2 = vld [vmem:[%s1185_s1 + $0x68] sm:$0xff]  ;;  %131 = vmatprep.mubr.f32.mxu0 %v787_v3  ;;  %298 = vmatprep.mubr.f32.mxu1 %v787_v3 }
   0x2   :  { %v819_v4 = vand.u32 4294901760, %v43_v0  ;;  %v821_v5 = vand.u32 4294901760, %v42_v1  ;;  %v823_v6 = vand.u32 4294901760, %v41_v2  ;;  %v40_v7 = vld [vmem:[%s1185_s1 + $0x60] sm:$0xff]  ;;  %v39_v8 = vld [vmem:[%s1185_s1 + $0x58] sm:$0xff]  ;;  %v38_v9 = vld [vmem:[%s1185_s1 + $0x50] sm:$0xff] }
   0x3   :  { %v834_v10 = vand.u32 4294901760, %v40_v7  ;;  %v836_v11 = vand.u32 4294901760, %v39_v8  ;;  %v838_v12 = vand.u32 4294901760, %v38_v9  ;;  %v37_v13 = vld [vmem:[%s1185_s1 + $0x48] sm:$0xff]  ;;  %v36_v14 = vld [vmem:[%s1185_s1 + $0x40] sm:$0xff]  ;;  %v35_v15 = vld [vmem:[%s1185_s1 + $0x38] sm:$0xff] }
   0x4   :  { %68 = vmatprep.subr.mxu0 %v819_v4  ;;  %v850_v16 = vand.u32 4294901760, %v37_v13  ;;  %v852_v17 = vand.u32 4294901760, %v36_v14  ;;  %v854_v18 = vand.u32 4294901760, %v35_v15  ;;  %v857_v19 = vsub.f32 %v43_v0, %v819_v4  ;;  %v34_v20 = vld [vmem:[%s1185_s1 + $0x30] sm:$0xff]  ;;  %v865_v21 = vld [vmem:[%s1185_s1 + $0x28] sm:$0xff]  ;;  %v870_v22 = vld [vmem:[%s1185_s1 + $0x20] sm:$0xff] }
   0x5   :  { %70 = vmatpush1.msra.mxu0 %v821_v5  ;;  %v873_v23 = vand.u32 4294901760, %v34_v20  ;;  %v876_v24 = vsub.f32 %v42_v1, %v821_v5  ;;  %v879_v25 = vand.u32 4294901760, %v865_v21  ;;  %v882_v26 = vsub.f32 %v41_v2, %v823_v6  ;;  %v887_v27 = vld [vmem:[%s1185_s1 + $0x18] sm:$0xff]  ;;  %v892_v28 = vld [vmem:[%s1185_s1 + $0x10] sm:$0xff]  ;;  %v897_v29 = vld [vmem:[%s1185_s1 + $0x8] sm:$0xff] }
   0x6   :  { %72 = vmatprep.subr.mxu0 %v823_v6  ;;  %v172_v30 = vand.u32 4294901760, %v857_v19  ;;  %v902_v31 = vand.u32 4294901760, %v870_v22  ;;  %v905_v32 = vsub.f32 %v40_v7, %v834_v10  ;;  %v908_v33 = vand.u32 4294901760, %v887_v27  ;;  %v922_v38 = vld [vmem:[%s1185_s1] sm:$0xff]  ;;  %v27_v0 = vld [vmem:[%s1186_s0 + $0x8] sm:$0xff] }
   0x7   :  { %74 = vmatpush1.msra.mxu0 %v834_v10  ;;  %v178_v34 = vand.u32 4294901760, %v876_v24  ;;  %v184_v35 = vand.u32 4294901760, %v882_v26  ;;  %v914_v36 = vsub.f32 %v39_v8, %v836_v11  ;;  %v917_v37 = vand.u32 4294901760, %v892_v28  ;;  %v26_v51 = vld [vmem:[%s1186_s0] sm:$0xff] }
   0x8   :  { %76 = vmatprep.subr.mxu0 %v836_v11  ;;  %v173_v39 = vsub.f32 %v857_v19, %v172_v30  ;;  %v190_v40 = vand.u32 4294901760, %v905_v32  ;;  %v930_v41 = vsub.f32 %v38_v9, %v838_v12  ;;  %v933_v42 = vand.u32 4294901760, %v897_v29 }
   0x9   :  { %78 = vmatpush1.msra.mxu0 %v838_v12  ;;  %v179_v43 = vsub.f32 %v876_v24, %v178_v34  ;;  %v185_v44 = vsub.f32 %v882_v26, %v184_v35  ;;  %v196_v45 = vand.u32 4294901760, %v914_v36  ;;  %v944_v46 = vsub.f32 %v37_v13, %v850_v16 }
   0xa   :  { %80 = vmatprep.subr.mxu0 %v850_v16  ;;  %v174_v47 = vand.u32 4294901760, %v173_v39  ;;  %v191_v48 = vsub.f32 %v905_v32, %v190_v40  ;;  %v202_v49 = vand.u32 4294901760, %v930_v41  ;;  %v952_v50 = vand.u32 4294901760, %v922_v38 }
   0xb   :  { %82 = vmatpush1.msra.mxu0 %v852_v17  ;;  %v180_v52 = vand.u32 4294901760, %v179_v43  ;;  %v186_v53 = vand.u32 4294901760, %v185_v44  ;;  %v197_v54 = vsub.f32 %v914_v36, %v196_v45  ;;  %v208_v55 = vand.u32 4294901760, %v944_v46 }
   0xc   :  { %84 = vmatprep.subr.mxu0 %v854_v18  ;;  %175 = vmatprep.subr.mxu1 %v174_v47  ;;  %v192_v56 = vand.u32 4294901760, %v191_v48  ;;  %v203_v57 = vsub.f32 %v930_v41, %v202_v49  ;;  %v967_v58 = vsub.f32 %v36_v14, %v852_v17  ;;  %v970_v59 = vsub.f32 %v35_v15, %v854_v18 }
   0xd   :  { %86 = vmatpush1.msra.mxu0 %v873_v23  ;;  %181 = vmatpush1.msra.mxu1 %v180_v52  ;;  %v198_v60 = vand.u32 4294901760, %v197_v54  ;;  %v209_v61 = vsub.f32 %v944_v46, %v208_v55  ;;  %v46_v62 = vsel %vm44_vm0, %v26_v51, 0  ;;  %v978_v63 = vsub.f32 %v34_v20, %v873_v23 }
   0xe   :  { %88 = vmatprep.subr.mxu0 %v879_v25  ;;  %187 = vmatprep.subr.mxu1 %v186_v53  ;;  %v204_v1 = vand.u32 4294901760, %v203_v57  ;;  %v214_v2 = vand.u32 4294901760, %v967_v58  ;;  %v220_v7 = vand.u32 4294901760, %v970_v59  ;;  %v986_v8 = vand.u32 4294901760, %v46_v62 }
   0xf   :  { %90 = vmatpush1.msra.mxu0 %v902_v31  ;;  %193 = vmatpush1.msra.mxu1 %v192_v56  ;;  %v210_v9 = vand.u32 4294901760, %v209_v61  ;;  %v226_v13 = vand.u32 4294901760, %v978_v63  ;;  %v992_v14 = vsub.f32 %v865_v21, %v879_v25  ;;  %v996_v15 = vsub.f32 %v870_v22, %v902_v31 }
  0x10   :  { %92 = vmatprep.subr.mxu0 %v908_v33  ;;  %199 = vmatprep.subr.mxu1 %v198_v60  ;;  %v215_v20 = vsub.f32 %v967_v58, %v214_v2  ;;  %v221_v39 = vsub.f32 %v970_v59, %v220_v7  ;;  %v1006_v43 = vsub.f32 %v46_v62, %v986_v8  ;;  %v49_v21 = vsel %vm44_vm0, %v27_v0, 0 }
  0x11   :  { %94 = vmatpush1.msra.mxu0 %v917_v37  ;;  %205 = vmatpush1.msra.mxu1 %v204_v1  ;;  %v227_v22 = vsub.f32 %v978_v63, %v226_v13  ;;  %v232_v44 = vand.u32 4294901760, %v992_v14  ;;  %v238_v47 = vand.u32 4294901760, %v996_v15  ;;  %v1017_v48 = vsub.f32 %v887_v27, %v908_v33 }
  0x12   :  { %96 = vmatprep.subr.mxu0 %v933_v42  ;;  %211 = vmatprep.subr.mxu1 %v210_v9  ;;  %v216_v51 = vand.u32 4294901760, %v215_v20  ;;  %v222_v52 = vand.u32 4294901760, %v221_v39  ;;  %v134_v53 = vand.u32 4294901760, %v1006_v43  ;;  %v1023_v54 = vsub.f32 %v892_v28, %v917_v37 }
  0x13   :  { %98 = vmatpush1.msra.mxu0 %v952_v50  ;;  %v228_v56 = vand.u32 4294901760, %v227_v22  ;;  %v233_v57 = vsub.f32 %v992_v14, %v232_v44  ;;  %v239_v27 = vsub.f32 %v996_v15, %v238_v47  ;;  %v244_v60 = vand.u32 4294901760, %v1017_v48 }
  0x14   :  { %217 = vmatpush1.msra.mxu1 %v216_v51  ;;  %331 = vmatprep.subr.mxu0 %v857_v19  ;;  %v135_v28 = vsub.f32 %v1006_v43, %v134_v53  ;;  %v250_v61 = vand.u32 4294901760, %v1023_v54  ;;  %v1040_v62 = vsub.f32 %v897_v29, %v933_v42  ;;  %v1044_v0 = vsub.f32 %v922_v38, %v952_v50 }
  0x15   :  { %223 = vmatprep.subr.mxu1 %v222_v52  ;;  %v234_v1 = vand.u32 4294901760, %v233_v57  ;;  %v240_v9 = vand.u32 4294901760, %v239_v27  ;;  %v245_v20 = vsub.f32 %v1017_v48, %v244_v60  ;;  %v1049_v39 = vand.u32 4294901760, %v49_v21 }
  0x16   :  { %v136_v22 = vand.u32 4294901760, %v135_v28  ;;  %229 = vmatpush1.msra.mxu1 %v228_v56  ;;  %v251_v29 = vsub.f32 %v1023_v54, %v250_v61  ;;  %v256_v51 = vand.u32 4294901760, %v1040_v62  ;;  %v262_v38 = vand.u32 4294901760, %v1044_v0 }
  0x17   :  { %235 = vmatprep.subr.mxu1 %v234_v1  ;;  %v246_v52 = vand.u32 4294901760, %v245_v20  ;;  %v1057_v57 = vsub.f32 %v49_v21, %v1049_v39 }
  0x18   :  { %137 = vmatmul.mubr.f32.vlgmr.msra.gmra.mxu0 %v136_v22  ;;  %241 = vmatpush1.msra.mxu1 %v240_v9  ;;  %v252_v27 = vand.u32 4294901760, %v251_v29  ;;  %v257_v56 = vsub.f32 %v1040_v62, %v256_v51  ;;  %v263_v28 = vsub.f32 %v1044_v0, %v262_v38 }
  0x19   :  { %334 = vmatpush1.msra.mxu0 %v876_v24  ;;  %247 = vmatprep.subr.mxu1 %v246_v52  ;;  %v145_v1 = vand.u32 4294901760, %v1057_v57 }
  0x1a   :  { %337 = vmatprep.subr.mxu0 %v882_v26  ;;  %253 = vmatpush1.msra.mxu1 %v252_v27  ;;  %v258_v21 = vand.u32 4294901760, %v257_v56  ;;  %v264_v20 = vand.u32 4294901760, %v263_v28 }
  0x1b   :  { %340 = vmatpush1.msra.mxu0 %v905_v32  ;;  %142 = vmatprep.mubr.f32.mxu0 %v787_v3  ;;  %v146_v9 = vsub.f32 %v1057_v57, %v145_v1 }
  0x1c   :  { %343 = vmatprep.subr.mxu0 %v914_v36  ;;  %259 = vmatprep.subr.mxu1 %v258_v21 }
  0x1d   :  { %346 = vmatpush1.msra.mxu0 %v930_v41  ;;  %265 = vmatpush1.msra.mxu1 %v264_v20  ;;  %v147_v22 = vand.u32 4294901760, %v146_v9  ;;  %v762_v41 = vld [vmem:[%s1187_s2] sm:$0x3] }
  0x1e   :  { %349 = vmatprep.subr.mxu0 %v944_v46  ;;  %300 = vmatmul.mubr.f32.vlgmr.msra.gmra.mxu1 %v986_v8 }
  0x1f   :  { %352 = vmatpush1.msra.mxu0 %v967_v58  ;;  %443 = vmatprep.subr.mxu1 %v819_v4 }
  0x20   :  { %355 = vmatprep.subr.mxu0 %v970_v59  ;;  %445 = vmatpush1.msra.mxu1 %v821_v5 }
  0x21   :  { %358 = vmatpush1.msra.mxu0 %v978_v63  ;;  %447 = vmatprep.subr.mxu1 %v823_v6 }
  0x22   :  { %361 = vmatprep.subr.mxu0 %v992_v14  ;;  %449 = vmatpush1.msra.mxu1 %v834_v10 }
  0x23   :  { %364 = vmatpush1.msra.mxu0 %v996_v15  ;;  %451 = vmatprep.subr.mxu1 %v836_v11 }
  0x24   :  { %148 = vmatmul.mubr.f32.gmra.mxu0 %v147_v22  ;;  %367 = vmatprep.subr.mxu0 %v1017_v48 }
  0x25   :  { %370 = vmatpush1.msra.mxu0 %v1023_v54  ;;  %453 = vmatpush1.msra.mxu1 %v838_v12 }
  0x26   :  { %373 = vmatprep.subr.mxu0 %v1040_v62  ;;  %455 = vmatprep.subr.mxu1 %v850_v16 }
  0x27   :  { %376 = vmatpush1.msra.mxu0 %v1044_v0  ;;  %409 = vmatprep.mubr.f32.mxu0 %v787_v3 }
  0x28   :  { %457 = vmatpush1.msra.mxu1 %v852_v17  ;;  %305 = vmatprep.mubr.f32.mxu1 %v787_v3 }
  0x29   :  { %412 = vmatmul.mubr.f32.vlgmr.msra.gmra.mxu0 %v1006_v43  ;;  %459 = vmatprep.subr.mxu1 %v854_v18 }
  0x2a   :  { %544 = vmatprep.subr.mxu0 %v172_v30  ;;  %307 = vmatmul.mubr.f32.gmra.mxu1 %v1049_v39 }
  0x2b   :  { %461 = vmatpush1.msra.mxu1 %v873_v23  ;;  %548 = vmatpush1.msra.mxu0 %v178_v34 }
  0x2c   :  { %463 = vmatprep.subr.mxu1 %v879_v25  ;;  %552 = vmatprep.subr.mxu0 %v184_v35 }
  0x2d   :  { %417 = vmatprep.mubr.f32.mxu0 %v787_v3  ;;  %465 = vmatpush1.msra.mxu1 %v902_v31 }
  0x2e   :  { %556 = vmatpush1.msra.mxu0 %v190_v40  ;;  %467 = vmatprep.subr.mxu1 %v908_v33 }
  0x2f   :  { %420 = vmatmul.mubr.f32.gmra.mxu0 %v1057_v57  ;;  %560 = vmatprep.subr.mxu0 %v196_v45 }
  0x30   :  { %469 = vmatpush1.msra.mxu1 %v917_v37  ;;  %564 = vmatpush1.msra.mxu0 %v202_v49 }
  0x31   :  { %471 = vmatprep.subr.mxu1 %v933_v42  ;;  %568 = vmatprep.subr.mxu0 %v208_v55 }
  0x32   :  { %473 = vmatpush1.msra.mxu1 %v952_v50  ;;  %506 = vmatprep.mubr.f32.mxu1 %v787_v3 }
  0x33   :  { %572 = vmatpush1.msra.mxu0 %v214_v2  ;;  %510 = vmatmul.mubr.f32.vlgmr.msra.gmra.mxu1 %v134_v53 }
  0x34   :  { %576 = vmatprep.subr.mxu0 %v220_v7  ;;  %669 = vmatprep.subr.mxu1 %v819_v4 }
  0x35   :  { %580 = vmatpush1.msra.mxu0 %v226_v13  ;;  %671 = vmatpush1.msra.mxu1 %v821_v5 }
  0x36   :  { %584 = vmatprep.subr.mxu0 %v232_v44  ;;  %673 = vmatprep.subr.mxu1 %v823_v6 }
  0x37   :  { %515 = vmatprep.mubr.f32.mxu1 %v787_v3  ;;  %588 = vmatpush1.msra.mxu0 %v238_v47 }
  0x38   :  { %675 = vmatpush1.msra.mxu1 %v834_v10  ;;  %592 = vmatprep.subr.mxu0 %v244_v60 }
  0x39   :  { %519 = vmatmul.mubr.f32.gmra.mxu1 %v145_v1  ;;  %677 = vmatprep.subr.mxu1 %v836_v11 }
  0x3a   :  { %596 = vmatpush1.msra.mxu0 %v250_v61  ;;  %679 = vmatpush1.msra.mxu1 %v838_v12 }
  0x3b   :  { %600 = vmatprep.subr.mxu0 %v256_v51  ;;  %681 = vmatprep.subr.mxu1 %v850_v16 }
  0x3c   :  { %604 = vmatpush1.msra.mxu0 %v262_v38  ;;  %637 = vmatprep.mubr.f32.mxu0 %v787_v3 }
  0x3d   :  { %683 = vmatpush1.msra.mxu1 %v852_v17  ;;  %639 = vmatmul.mubr.f32.vlgmr.msra.gmra.mxu0 %v986_v8 }
  0x3e   :  { %685 = vmatprep.subr.mxu1 %v854_v18  ;;  %644 = vmatprep.mubr.f32.mxu0 %v787_v3 }
  0x3f   :  { %687 = vmatpush1.msra.mxu1 %v873_v23  ;;  %732 = vmatprep.mubr.f32.mxu1 %v787_v3 }
  0x40   :  { %689 = vmatprep.subr.mxu1 %v879_v25  ;;  %v764_v25 = vlaneseq }
  0x41   :  { %691 = vmatpush1.msra.mxu1 %v902_v31  ;;  %646 = vmatmul.mubr.f32.gmra.mxu0 %v1049_v39 }
  0x42   :  { %693 = vmatprep.subr.mxu1 %v908_v33  ;;  %v765_v32 = vshrl.u32 %v764_v25, 7 }
  0x43   :  { %695 = vmatpush1.msra.mxu1 %v917_v37 }
  0x44   :  { %697 = vmatprep.subr.mxu1 %v933_v42  ;;  %v766_v40 = vsub.s32 0, %v765_v32  ;;  %v770_v42 = vsub.s32 1, %v765_v32 }
  0x45   :  { %699 = vmatpush1.msra.mxu1 %v952_v50 }
  0x46   :  { %734 = vmatmul.mubr.f32.vlgmr.msra.gmra.mxu1 %v986_v8  ;;  %v767_v2 = vrot.slane %v762_v41, %v766_v40  ;;  %v771_v8 = vrot.slane %v762_v41, %v770_v42 }
  0x47   :  { %739 = vmatprep.mubr.f32.mxu1 %v787_v3 }
  0x4a   :  { %741 = vmatmul.mubr.f32.gmra.mxu1 %v1049_v39 }
  0xd8   :  { %v138_v4 = vpop.f32.mrf.mxu0 }
  0xda   :  { %v140_v5 = vpop.f32.mrf.mxu0 }
  0xde   :  { %v301_v11 = vpop.f32.mrf.mxu1 }
  0xdf   :  { %v302_v3 = vadd.f32 %v301_v11, %v138_v4 }
  0xe0   :  { %v303_v16 = vpop.f32.mrf.mxu1 }
  0xe1   :  { %v304_v35 = vadd.f32 %v303_v16, %v140_v5 }
  0xe4   :  { %v149_v6 = vpop.f32.mrf.mxu0 }
  0xe6   :  { %v151_v10 = vpop.f32.mrf.mxu0 }
  0xe9   :  { %v413_v12 = vpop.f32.mrf.mxu0 }
  0xea   :  { %v308_v17 = vpop.f32.mrf.mxu1  ;;  %v414_v36 = vadd.f32 %v413_v12, %v302_v3 }
  0xeb   :  { %v415_v18 = vpop.f32.mrf.mxu0  ;;  %v309_v37 = vadd.f32 %v308_v17, %v149_v6 }
  0xec   :  { %v310_v19 = vpop.f32.mrf.mxu1  ;;  %v416_v45 = vadd.f32 %v415_v18, %v304_v35 }
  0xed   :  { %v311_v46 = vadd.f32 %v310_v19, %v151_v10 }
  0xef   :  { %v421_v23 = vpop.f32.mrf.mxu0 }
  0xf0   :  { %v422_v58 = vadd.f32 %v421_v23, %v309_v37 }
  0xf1   :  { %v423_v26 = vpop.f32.mrf.mxu0 }
  0xf2   :  { %v424_v13 = vadd.f32 %v423_v26, %v311_v46 }
  0xf3   :  { %v511_v24 = vpop.f32.mrf.mxu1 }
  0xf4   :  { %v512_v49 = vadd.f32 %v511_v24, %v414_v36 }
  0xf5   :  { %v513_v30 = vpop.f32.mrf.mxu1 }
  0xf6   :  { %v514_v59 = vadd.f32 %v513_v30, %v416_v45 }
  0xf9   :  { %v520_v33 = vpop.f32.mrf.mxu1 }
  0xfa   :  { %v521_v14 = vadd.f32 %v520_v33, %v422_v58 }
  0xfb   :  { %v522_v50 = vpop.f32.mrf.mxu1 }
  0xfc   :  { %v523_v48 = vadd.f32 %v522_v50, %v424_v13 }
  0xfd   :  { %v640_v31 = vpop.f32.mrf.mxu0 }
  0xfe   :  { %v641_v63 = vadd.f32 %v640_v31, %v512_v49 }
  0xff   :  { %v642_v34 = vpop.f32.mrf.mxu0 }
 0x100   :  { %v643_v15 = vadd.f32 %v642_v34, %v514_v59 }
 0x101   :  { %v647_v55 = vpop.f32.mrf.mxu0 }
 0x102   :  { %v648_v53 = vadd.f32 %v647_v55, %v521_v14 }
 0x103   :  { %v649_v44 = vpop.f32.mrf.mxu0 }
 0x104   :  { %v650_v62 = vadd.f32 %v649_v44, %v523_v48 }
 0x106   :  { %v735_v7 = vpop.f32.mrf.mxu1 }
 0x107   :  { %v736_v43 = vadd.f32 %v735_v7, %v641_v63 }
 0x108   :  { %v737_v47 = vpop.f32.mrf.mxu1 }
 0x109   :  { %v774_v54 = vadd.f32 %v767_v2, %v736_v43  ;;  %v738_v60 = vadd.f32 %v737_v47, %v643_v15 }
 0x10a   :  { %v742_v61 = vpop.f32.mrf.mxu1 }
 0x10b   :  { %778 = vst [vmem:[%s1188_s3] sm:$0xff] %v774_v54  ;;  %v775_v0 = vadd.f32 %v771_v8, %v738_v60  ;;  %v743_v39 = vadd.f32 %v742_v61, %v648_v53 }
 0x10c   :  { %v744_v29 = vpop.f32.mrf.mxu1 }
 0x10d   :  { %779 = vst [vmem:[%s1188_s3 + $0x8] sm:$0xff] %v775_v0  ;;  %v776_v51 = vadd.f32 %v767_v2, %v743_v39  ;;  %v745_v38 = vadd.f32 %v744_v29, %v650_v62 }
 0x10f   :  { %780 = vst [vmem:[%s1188_s3 + $0x10] sm:$0xff] %v776_v51  ;;  %v777_v52 = vadd.f32 %v771_v8, %v745_v38 }
 0x111   :  { %781 = vst [vmem:[%s1188_s3 + $0x18] sm:$0xff] %v777_v52 }

// kernel: lstm_mlm_forward.11
= control target key start
LH: loop header
LB: loop body
LE: loop exit
PB: predicated region body
PF: predicated region fallthrough
CT: control target
= control target key end

     0   :  { %vm34_vm0 = vcmask 254976   ;;  %s755_s0 = inlined_call_operand.vmem [shape: f32[8,2,32], index: 0, kind: input, shape index: {}]   ;;  %s756_s1 = inlined_call_operand.vmem [shape: f32[8,2,32], index: 1, kind: input, shape index: {}]   ;;  %s757_s2 = inlined_call_operand.vmem [shape: f32[8,2,64], index: 2, kind: input, shape index: {}]   ;;  %s758_s3 = inlined_call_operand.vmem [shape: f32[8,2,64], index: 3, kind: output, shape index: {0}]   ;;  %s759_s4 = inlined_call_operand.hbm [shape: f32[8,2,64], index: 4, kind: output, shape index: {1}]   ;;  %s760_s5 = inlined_call_operand.vmem [shape: f32[8,2,64], index: 5, kind: output, shape index: {2}]  }
   0x1   :  { %v367_v0 = vld [vmem:[%s755_s0] sm:$0x3]  ;;  %v372_v1 = vld [vmem:[%s755_s0 + $0x2] sm:$0x3]  ;;  %v377_v2 = vld [vmem:[%s755_s0 + $0x4] sm:$0x3] }
   0x2   :  { %v382_v3 = vld [vmem:[%s755_s0 + $0x6] sm:$0x3]  ;;  %v35_v4 = vsel %vm34_vm0, %v367_v0, 0.0  ;;  %v36_v5 = vsel %vm34_vm0, %v372_v1, 0.0  ;;  %v38_v6 = vsel %vm34_vm0, %v377_v2, 0.0 }
   0x3   :  { %v393_v7 = vld [vmem:[%s756_s1] sm:$0x3]  ;;  %v398_v8 = vld [vmem:[%s755_s0 + $0x8] sm:$0x3]  ;;  %v37_v9 = vadd.f32 %v36_v5, %v35_v4  ;;  %v403_v10 = vld [vmem:[%s756_s1 + $0x2] sm:$0x3] }
   0x4   :  { %v40_v11 = vsel %vm34_vm0, %v382_v3, 0.0  ;;  %v410_v12 = vld [vmem:[%s756_s1 + $0x4] sm:$0x3]  ;;  %v52_v13 = vsel %vm34_vm0, %v393_v7, 0.0  ;;  %v417_v14 = vld [vmem:[%s755_s0 + $0xa] sm:$0x3] }
   0x5   :  { %v39_v15 = vadd.f32 %v38_v6, %v37_v9  ;;  %v422_v16 = vld [vmem:[%s756_s1 + $0x6] sm:$0x3]  ;;  %v42_v17 = vsel %vm34_vm0, %v398_v8, 0.0  ;;  %v53_v18 = vsel %vm34_vm0, %v403_v10, 0.0  ;;  %v55_v19 = vsel %vm34_vm0, %v410_v12, 0.0 }
   0x6   :  { %v433_v20 = vld [vmem:[%s755_s0 + $0xc] sm:$0x3]  ;;  %v438_v22 = vld [vmem:[%s756_s1 + $0x8] sm:$0x3]  ;;  %v54_v23 = vadd.f32 %v53_v18, %v52_v13 }
   0x7   :  { %v41_v21 = vadd.f32 %v40_v11, %v39_v15 }
   0x8   :  { %11 = vsyncpa [#allocation3], 0  ;;  %v44_v24 = vsel %vm34_vm0, %v417_v14, 0.0  ;;  %v57_v25 = vsel %vm34_vm0, %v422_v16, 0.0  ;;  %v447_v26 = vld [vmem:[%s755_s0 + $0xe] sm:$0x3]  ;;  %v56_v29 = vadd.f32 %v55_v19, %v54_v23 }
   0x9   :  { %v43_v27 = vadd.f32 %v42_v17, %v41_v21  ;;  %v452_v28 = vld [vmem:[%s756_s1 + $0xa] sm:$0x3]  ;;  %v46_v30 = vsel %vm34_vm0, %v433_v20, 0.0  ;;  %v59_v31 = vsel %vm34_vm0, %v438_v22, 0.0  ;;  %v461_v33 = vld [vmem:[%s756_s1 + $0xc] sm:$0x3] }
   0xa   :  { %v58_v34 = vadd.f32 %v57_v25, %v56_v29  ;;  %v48_v35 = vsel %vm34_vm0, %v447_v26, 0.0  ;;  %v61_v36 = vsel %vm34_vm0, %v452_v28, 0.0  ;;  %v470_v38 = vld [vmem:[%s756_s1 + $0xe] sm:$0x3]  ;;  %v63_v40 = vsel %vm34_vm0, %v461_v33, 0.0  ;;  %s331_s1 = smov 32  }
   0xb   :  { %v45_v32 = vadd.f32 %v44_v24, %v43_v27  ;;  %v65_v43 = vsel %vm34_vm0, %v470_v38, 0.0  ;;  %vm174_vm1 = vcmask 261120   ;;  %vm183_vm2 = vcmask 517120   ;;  %s332_s11 = smov [#allocation2]  }
   0xc   :  { %v60_v39 = vadd.f32 %v59_v31, %v58_v34  ;;  %s287_s12 = sshll.u32 %s332_s11, 4  ;;  %s288_s12 = int_to_ptr.vmem [resolvable:$true] %s287_s12 }
   0xd   :  { %v47_v37 = vadd.f32 %v46_v30, %v45_v32  ;;  %s309_s19 = scalar_lea.vmem %s288_s12, 256  ;;  %p314_p1 = scmp.lt.s32.totalorder %s288_s12, %s288_s12 }
   0xe   :  { %v62_v42 = vadd.f32 %v61_v36, %v60_v39  ;;  %p310_p0 = scmp.ne.s32.totalorder %s288_s12, %s309_s19  ;;  %p315_p2 = scmp.lt.s32.totalorder %s309_s19, %s309_s19 }
   0xf   :  { %v49_v41 = vadd.f32 %v48_v35, %v47_v37 }
  0x10   :  { %v64_v44 = vadd.f32 %v63_v40, %v62_v42  ;;  %p316_p3 = por %p315_p2, %p314_p1 }
  0x11   :  { %50 = vadd.xlane.f32.xlu0 %v49_v41 }
  0x12   :  { %v66_v45 = vadd.f32 %v65_v43, %v64_v44  ;;  %p317_p4 = pnand %p316_p3, %p310_p0 }
  0x15   :  { %67 = vadd.xlane.f32.xlu0 %v66_v45 }
  0x2b   :  { %150 = vrot.lane.b32.xlu0 %v393_v7, %s331_s1 }
  0x2f   :  { %154 = vrot.lane.b32.xlu0 %v410_v12, %s331_s1 }
  0x33   :  { %158 = vrot.lane.b32.xlu0 %v438_v22, %s331_s1 }
  0x9a   :  { %v51_v46 = vpop.xlane.xlu0 %50 }
  0x9e   :  { %v68_v47 = vpop.xlane.xlu0 %67 }
  0x9f   :  { %v69_v48 = vadd.f32 %v68_v47, %v51_v46 }
  0xa1   :  { %v71_v49 = vmul.f32 0.001953125, %v69_v48 }
  0xa3   :  { %v477_v50 = vsub.f32 %v367_v0, %v71_v49  ;;  %v480_v51 = vsub.f32 %v372_v1, %v71_v49  ;;  %v483_v52 = vsub.f32 %v377_v2, %v71_v49  ;;  %v486_v53 = vsub.f32 %v382_v3, %v71_v49 }
  0xa4   :  { %v489_v54 = vsub.f32 %v398_v8, %v71_v49  ;;  %v498_v58 = vsub.f32 %v417_v14, %v71_v49  ;;  %v505_v62 = vsub.f32 %v433_v20, %v71_v49  ;;  %v511_v6 = vsub.f32 %v393_v7, %v71_v49 }
  0xa5   :  { %v88_v55 = vmul.f32 %v477_v50, %v477_v50  ;;  %v89_v56 = vmul.f32 %v480_v51, %v480_v51  ;;  %v90_v57 = vmul.f32 %v483_v52, %v483_v52  ;;  %v91_v59 = vmul.f32 %v486_v53, %v486_v53 }
  0xa6   :  { %v92_v63 = vmul.f32 %v489_v54, %v489_v54  ;;  %v514_v9 = vsub.f32 %v403_v10, %v71_v49  ;;  %v517_v11 = vsub.f32 %v410_v12, %v71_v49  ;;  %v520_v13 = vsub.f32 %v447_v26, %v71_v49 }
  0xa7   :  { %v96_v60 = vsel %vm34_vm0, %v88_v55, 0.0  ;;  %v97_v61 = vsel %vm34_vm0, %v89_v56, 0.0  ;;  %v99_v5 = vsel %vm34_vm0, %v90_v57, 0.0  ;;  %v523_v17 = vsub.f32 %v422_v16, %v71_v49 }
  0xa8   :  { %v98_v4 = vadd.f32 %v97_v61, %v96_v60  ;;  %v93_v18 = vmul.f32 %v498_v58, %v498_v58  ;;  %v101_v19 = vsel %vm34_vm0, %v91_v59, 0.0  ;;  %v113_v21 = vmul.f32 %v511_v6, %v511_v6 }
  0xa9   :  { %v114_v23 = vmul.f32 %v514_v9, %v514_v9  ;;  %v533_v25 = vsub.f32 %v438_v22, %v71_v49  ;;  %v115_v27 = vmul.f32 %v517_v11, %v517_v11  ;;  %v94_v29 = vmul.f32 %v505_v62, %v505_v62 }
  0xaa   :  { %v100_v15 = vadd.f32 %v99_v5, %v98_v4  ;;  %v103_v30 = vsel %vm34_vm0, %v92_v63, 0.0  ;;  %v121_v31 = vsel %vm34_vm0, %v113_v21, 0.0  ;;  %v542_v34 = vsub.f32 %v452_v28, %v71_v49 }
  0xab   :  { %v116_v35 = vmul.f32 %v523_v17, %v523_v17  ;;  %v122_v36 = vsel %vm34_vm0, %v114_v23, 0.0  ;;  %v95_v37 = vmul.f32 %v520_v13, %v520_v13  ;;  %v105_v39 = vsel %vm34_vm0, %v93_v18, 0.0 }
  0xac   :  { %v102_v24 = vadd.f32 %v101_v19, %v100_v15  ;;  %v123_v40 = vadd.f32 %v122_v36, %v121_v31  ;;  %v551_v42 = vsub.f32 %v461_v33, %v71_v49  ;;  %v117_v43 = vmul.f32 %v533_v25, %v533_v25 }
  0xad   :  { %v124_v44 = vsel %vm34_vm0, %v115_v27, 0.0  ;;  %v107_v45 = vsel %vm34_vm0, %v94_v29, 0.0  ;;  %v558_v48 = vsub.f32 %v470_v38, %v71_v49  ;;  %v118_v55 = vmul.f32 %v542_v34, %v542_v34  ;;  %v151_v27 = vpop.permute.xlu0 %150 }
  0xae   :  { %v104_v32 = vadd.f32 %v103_v30, %v102_v24  ;;  %v125_v46 = vadd.f32 %v124_v44, %v123_v40  ;;  %v126_v56 = vsel %vm34_vm0, %v116_v35, 0.0  ;;  %v109_v57 = vsel %vm34_vm0, %v95_v37, 0.0 }
  0xaf   :  { %v119_v61 = vmul.f32 %v551_v42, %v551_v42  ;;  %v128_v63 = vsel %vm34_vm0, %v117_v43, 0.0  ;;  %v120_v49 = vmul.f32 %v558_v48, %v558_v48  ;;  %v130_v5 = vsel %vm34_vm0, %v118_v55, 0.0 }
  0xb0   :  { %v106_v41 = vadd.f32 %v105_v39, %v104_v32  ;;  %v127_v59 = vadd.f32 %v126_v56, %v125_v46  ;;  %v175_v7 = vsel %vm174_vm1, %v367_v0, %v151_v27 }
  0xb1   :  { %v132_v18 = vsel %vm34_vm0, %v119_v61, 0.0  ;;  %v134_v21 = vsel %vm34_vm0, %v120_v49, 0.0  ;;  %184 = vst.msk [vmem:[%s758_s3] sm:$0x3] %vm183_vm2, %v175_v7 }
  0xb2   :  { %v108_v47 = vadd.f32 %v107_v45, %v106_v41  ;;  %v129_v4 = vadd.f32 %v128_v63, %v127_v59  ;;  %v262_v63 = vld [vmem:[%s757_s2 + $0xc] sm:$0x3] }
  0xb4   :  { %v110_v60 = vadd.f32 %v109_v57, %v108_v47  ;;  %v131_v15 = vadd.f32 %v130_v5, %v129_v4  ;;  %v260_v47 = vld [vmem:[%s757_s2 + $0x8] sm:$0x3] }
  0xb6   :  { %111 = vadd.xlane.f32.xlu1 %v110_v60  ;;  %v133_v19 = vadd.f32 %v132_v18, %v131_v15  ;;  %v259_v60 = vld [vmem:[%s757_s2 + $0x6] sm:$0x3] }
  0xb8   :  { %v135_v23 = vadd.f32 %v134_v21, %v133_v19  ;;  %v261_v19 = vld [vmem:[%s757_s2 + $0xa] sm:$0x3] }
  0xba   :  { %136 = vadd.xlane.f32.xlu1 %v135_v23 }
  0xcb   :  { %152 = vrot.lane.b32.xlu1 %v403_v10, %s331_s1  ;;  %v155_v10 = vpop.permute.xlu0 %154 }
  0xcc   :  { %v177_v12 = vsel %vm174_vm1, %v377_v2, %v155_v10  ;;  %v263_v10 = vld [vmem:[%s757_s2 + $0xe] sm:$0x3] }
  0xcd   :  { %186 = vst.msk [vmem:[%s758_s3 + $0x4] sm:$0x3] %vm183_vm2, %v177_v12 }
  0xcf   :  { %156 = vrot.lane.b32.xlu1 %v422_v16, %s331_s1 }
  0xd3   :  { %160 = vrot.lane.b32.xlu1 %v452_v28, %s331_s1  ;;  %v159_v28 = vpop.permute.xlu0 %158 }
  0xd4   :  { %v179_v0 = vsel %vm174_vm1, %v398_v8, %v159_v28 }
  0xd5   :  { %188 = vst.msk [vmem:[%s758_s3 + $0x8] sm:$0x3] %vm183_vm2, %v179_v0 }
 0x13f   :  { %v112_v24 = vpop.xlane.xlu1 %111 }
 0x143   :  { %v137_v16 = vpop.xlane.xlu1 %136 }
 0x144   :  { %v138_v22 = vadd.f32 %v137_v16, %v112_v24 }
 0x146   :  { %v139_v29 = vmul.f32 0.001953125, %v138_v22 }
 0x147   :  { %v153_v30 = vpop.permute.xlu1 %152 }
 0x148   :  { %v140_v31 = vadd.f32 1e-05, %v139_v29  ;;  %v176_v2 = vsel %vm174_vm1, %v372_v1, %v153_v30 }
 0x149   :  { %185 = vst.msk [vmem:[%s758_s3 + $0x2] sm:$0x3] %vm183_vm2, %v176_v2 }
 0x14a   :  { %307 = vrsqrt.f32 %v140_v31 }
 0x14b   :  { %v157_v32 = vpop.permute.xlu1 %156 }
 0x14c   :  { %v178_v8 = vsel %vm174_vm1, %v382_v3, %v157_v32 }
 0x14d   :  { %187 = vst.msk [vmem:[%s758_s3 + $0x6] sm:$0x3] %vm183_vm2, %v178_v8 }
 0x14f   :  { %v161_v35 = vpop.permute.xlu1 %160 }
 0x150   :  { %v180_v36 = vsel %vm174_vm1, %v417_v14, %v161_v35 }
 0x151   :  { %189 = vst.msk [vmem:[%s758_s3 + $0xa] sm:$0x3] %vm183_vm2, %v180_v36 }
 0x157   :  { %v620_v1 = vpop.eup %307 }
 0x158   :  { %v201_v37 = vmul.f32 %v620_v1, %v514_v9  ;;  %v200_v3 = vmul.f32 %v620_v1, %v511_v6  ;;  %v202_v14 = vmul.f32 %v620_v1, %v517_v11  ;;  %v204_v39 = vmul.f32 %v620_v1, %v533_v25 }
 0x159   :  { %v203_v9 = vmul.f32 %v620_v1, %v523_v17  ;;  %v206_v6 = vmul.f32 %v620_v1, %v551_v42  ;;  %v205_v11 = vmul.f32 %v620_v1, %v542_v34  ;;  %v207_v25 = vmul.f32 %v620_v1, %v558_v48  ;;  %v257_v34 = vld [vmem:[%s757_s2 + $0x2] sm:$0x3] }
 0x15a   :  { %218 = vrot.lane.b32.xlu1 %v201_v37, %s331_s1  ;;  %216 = vrot.lane.b32.xlu0 %v200_v3, %s331_s1  ;;  %v193_v17 = vmul.f32 %v620_v1, %v480_v51  ;;  %v192_v40 = vmul.f32 %v620_v1, %v477_v50  ;;  %v194_v45 = vmul.f32 %v620_v1, %v483_v52  ;;  %v258_v50 = vld [vmem:[%s757_s2 + $0x4] sm:$0x3] }
 0x15b   :  { %v196_v46 = vmul.f32 %v620_v1, %v489_v54  ;;  %v195_v59 = vmul.f32 %v620_v1, %v486_v53  ;;  %v198_v61 = vmul.f32 %v620_v1, %v505_v62  ;;  %v197_v18 = vmul.f32 %v620_v1, %v498_v58 }
 0x15c   :  { %v199_v7 = vmul.f32 %v620_v1, %v520_v13 }
 0x15e   :  { %220 = vrot.lane.b32.xlu1 %v202_v14, %s331_s1  ;;  %224 = vrot.lane.b32.xlu0 %v204_v39, %s331_s1 }
 0x162   :  { %222 = vrot.lane.b32.xlu1 %v203_v9, %s331_s1  ;;  %228 = vrot.lane.b32.xlu0 %v206_v6, %s331_s1 }
 0x166   :  { %226 = vrot.lane.b32.xlu1 %v205_v11, %s331_s1  ;;  %162 = vrot.lane.b32.xlu0 %v461_v33, %s331_s1  ;;  %v256_v33 = vld [vmem:[%s757_s2] sm:$0x3] }
 0x16a   :  { %230 = vrot.lane.b32.xlu1 %v207_v25, %s331_s1 }
 0x16e   :  { %164 = vrot.lane.b32.xlu1 %v470_v38, %s331_s1 }
 0x1cc   :  { %v219_v41 = vpop.permute.xlu1 %218  ;;  %v217_v42 = vpop.permute.xlu0 %216 }
 0x1cd   :  { %v241_v43 = vsel %vm174_vm1, %v193_v17, %v219_v41  ;;  %v240_v38 = vsel %vm174_vm1, %v192_v40, %v217_v42 }
 0x1ce   :  { %249 = vst.msk [vmem:[#allocation2 + $0x2] sm:$0x3] %vm183_vm2, %v241_v43  ;;  %v265_v51 = vadd.f32 %v257_v34, %v241_v43  ;;  %248 = vst.msk [vmem:[#allocation2] sm:$0x3] %vm183_vm2, %v240_v38  ;;  %v264_v44 = vadd.f32 %v256_v33, %v240_v38 }
 0x1d0   :  { %273 = vst.msk [vmem:[%s760_s5 + $0x2] sm:$0x3] %vm183_vm2, %v265_v51  ;;  %272 = vst.msk [vmem:[%s760_s5] sm:$0x3] %vm183_vm2, %v264_v44  ;;  %v221_v52 = vpop.permute.xlu1 %220  ;;  %v225_v48 = vpop.permute.xlu0 %224 }
 0x1d1   :  { %v242_v55 = vsel %vm174_vm1, %v194_v45, %v221_v52  ;;  %v244_v54 = vsel %vm174_vm1, %v196_v46, %v225_v48 }
 0x1d2   :  { %250 = vst.msk [vmem:[#allocation2 + $0x4] sm:$0x3] %vm183_vm2, %v242_v55  ;;  %v266_v56 = vadd.f32 %v258_v50, %v242_v55  ;;  %252 = vst.msk [vmem:[#allocation2 + $0x8] sm:$0x3] %vm183_vm2, %v244_v54  ;;  %v268_v57 = vadd.f32 %v260_v47, %v244_v54 }
 0x1d4   :  { %274 = vst.msk [vmem:[%s760_s5 + $0x4] sm:$0x3] %vm183_vm2, %v266_v56  ;;  %276 = vst.msk [vmem:[%s760_s5 + $0x8] sm:$0x3] %vm183_vm2, %v268_v57  ;;  %v223_v53 = vpop.permute.xlu1 %222  ;;  %v229_v4 = vpop.permute.xlu0 %228 }
 0x1d5   :  { %v243_v49 = vsel %vm174_vm1, %v195_v59, %v223_v53  ;;  %v246_v62 = vsel %vm174_vm1, %v198_v61, %v229_v4 }
 0x1d6   :  { %251 = vst.msk [vmem:[#allocation2 + $0x6] sm:$0x3] %vm183_vm2, %v243_v49  ;;  %v267_v5 = vadd.f32 %v259_v60, %v243_v49  ;;  %254 = vst.msk [vmem:[#allocation2 + $0xc] sm:$0x3] %vm183_vm2, %v246_v62  ;;  %v270_v15 = vadd.f32 %v262_v63, %v246_v62 }
 0x1d8   :  { %275 = vst.msk [vmem:[%s760_s5 + $0x6] sm:$0x3] %vm183_vm2, %v267_v5  ;;  %278 = vst.msk [vmem:[%s760_s5 + $0xc] sm:$0x3] %vm183_vm2, %v270_v15  ;;  %v227_v21 = vpop.permute.xlu1 %226  ;;  %v163_v23 = vpop.permute.xlu0 %162 }
 0x1d9   :  { %v245_v24 = vsel %vm174_vm1, %v197_v18, %v227_v21  ;;  %v181_v58 = vsel %vm174_vm1, %v433_v20, %v163_v23 }
 0x1da   :  { %253 = vst.msk [vmem:[#allocation2 + $0xa] sm:$0x3] %vm183_vm2, %v245_v24  ;;  %v269_v27 = vadd.f32 %v261_v19, %v245_v24  ;;  %190 = vst.msk [vmem:[%s758_s3 + $0xc] sm:$0x3] %vm183_vm2, %v181_v58 }
 0x1dc   :  { %277 = vst.msk [vmem:[%s760_s5 + $0xa] sm:$0x3] %vm183_vm2, %v269_v27  ;;  %v231_v20 = vpop.permute.xlu1 %230 }
 0x1dd   :  { %v247_v12 = vsel %vm174_vm1, %v199_v7, %v231_v20 }
 0x1de   :  { %255 = vst.msk [vmem:[#allocation2 + $0xe] sm:$0x3] %vm183_vm2, %v247_v12  ;;  %v271_v16 = vadd.f32 %v263_v10, %v247_v12 }
 0x1df   :  { %320 = shalt.err (!%p317_p4)
}
 0x1e0   :  { %s333_s2 = smov 2   ;;  %279 = vst.msk [vmem:[%s760_s5 + $0xe] sm:$0x3] %vm183_vm2, %v271_v16  ;;  %v165_v13 = vpop.permute.xlu1 %164 }
 0x1e1   :  { %293 = dma.vmem_to_hbm [thread:$0]  %s288_s12, 256, %s759_s4, [#allocation3], %s331_s1, %s331_s1, %s333_s2   ;;  %v182_v22 = vsel %vm174_vm1, %v447_v26, %v165_v13 }
 0x1e2   :  { %191 = vst.msk [vmem:[%s758_s3 + $0xe] sm:$0x3] %vm183_vm2, %v182_v22 }
 0x1e3   :  { %329 = dma.done.wait [#allocation3], 256  }
 0x1e4   :  { %330 = vsyncadd [#allocation3], 4294967040 }
 0x1e5   :  { %303 = vsyncpa [#allocation3], 1 }

// kernel: lstm_mlm_forward.10
= control target key start
LH: loop header
LB: loop body
LE: loop exit
PB: predicated region body
PF: predicated region fallthrough
CT: control target
= control target key end

     0   :  { %s1242_s18 = smov 0   ;;  %s1640_s0 = inlined_call_operand.vmem [shape: f32[8,2,256], index: 0, kind: input, shape index: {}, may-alias: {0,1}]   ;;  %s1641_s1 = inlined_call_operand.vmem [shape: f32[8,2,256], index: 1, kind: input, shape index: {}, may-alias: {0,1}]   ;;  %s1642_s2 = inlined_call_operand.vmem [shape: f32[64,256], index: 2, kind: input, shape index: {}]   ;;  %s1643_s3 = inlined_call_operand.vmem [shape: s32[2,1], index: 3, kind: input, shape index: {}]   ;;  %s1644_s4 = inlined_call_operand.vmem [shape: f32[8,2,32], index: 4, kind: output, shape index: {0}]   ;;  %s1645_s5 = inlined_call_operand.vmem [shape: f32[8,2,32], index: 5, kind: output, shape index: {1}]  }
   0x1 LB: > { %s1248_s19 = sadd.s32 4294967295, %s1204_s18   ;;  %p1148_p0 = scmp.ge.s32.totalorder %s1204_s18, 1  ;;  %s1204_s18 = sphi %s1242_s18, %s16_s18  }
   0x2   : > { %p207_p1 = scmp.lt.s32.totalorder %s1204_s18, 9 }
   0x4   : > { %p208_p2 = pnand %p1148_p0, %p207_p1 }
   0x5   : > { %p246_p3 = scmp.lt.s32.totalorder (!%p208_p2), %s1248_s19, 7  ;;  %s1254_s20 = ssub.s32 (!%p208_p2), 7, %s1248_s19 }
   0x6   : > { %211 = sbr.rel (%p208_p2) target bundleno = 577 (0x241), region = 36  ;;  %p252_p4 = scmp.lt.s32.totalorder (!%p208_p2), %s1254_s20, 7 }
   0x7   : > { %p1155_p5 = scmp.ne.s32.totalorder (!%p208_p2), %s1248_s19, 0 }
   0xb   : > { %s247_s21 = scalar_select %p246_p3, %s1248_s19, 7 }
   0xc   : > { %s253_s22 = scalar_select %p252_p4, %s1254_s20, 7 }
   0xd   : > { %s1164_s23 = sshll.u32 %s247_s21, 2  ;;  %s1153_s24 = sshll.u32 %s247_s21, 1 }
   0xe   : > { %s1262_s27 = scalar_lea.vmem %s1640_s0, %s1164_s23  ;;  %s1165_s28 = sshll.u32 %s253_s22, 2 }
   0xf   : > { %s1267_s6 = scalar_lea.vmem %s1641_s1, %s1165_s28  ;;  %s1272_s9 = scalar_lea.vmem %s1644_s4, %s1153_s24 }
  0x10   : > { %s1154_s10 = sshll.u32 %s253_s22, 1  ;;  %272 = sbr.rel (%p1155_p5) target bundleno = 23 (0x17), region = 40 }
  0x11   : > { %s1277_s13 = scalar_lea.vmem %s1645_s5, %s1154_s10 }
  0x15   : > { %vm273_vm0 = vcmask 517120   ;;  %v1206_v0 = vmov 0.0  }
  0x16   : > { %274 = vst.msk [vmem:[#allocation2] sm:$0x3] %vm273_vm0, %v1206_v0  ;;  %275 = vst.msk [vmem:[#allocation3] sm:$0x3] %vm273_vm0, %v1206_v0 }
  0x17 PF: > { %v304_v1 = vld [vmem:[%s1642_s2 + $0x78] sm:$0xff]  ;;  %v303_v2 = vld [vmem:[%s1642_s2 + $0x70] sm:$0xff]  ;;  %v302_v3 = vld [vmem:[%s1642_s2 + $0x68] sm:$0xff]  ;;  %v1207_v10 = vmov 0.0   ;;  %vm305_vm1 = vcmask 523264   ;;  %s1209_s8 = smov 64  }
  0x18   : > { %v1289_v4 = vand.u32 4294901760, %v304_v1  ;;  %v1291_v5 = vand.u32 4294901760, %v303_v2  ;;  %v1293_v6 = vand.u32 4294901760, %v302_v3  ;;  %v301_v7 = vld [vmem:[%s1642_s2 + $0x60] sm:$0xff]  ;;  %v300_v8 = vld [vmem:[%s1642_s2 + $0x58] sm:$0xff]  ;;  %v299_v9 = vld [vmem:[%s1642_s2 + $0x50] sm:$0xff]  ;;  %389 = vmatprep.mubr.f32.mxu0 %v1207_v10  ;;  %545 = vmatprep.mubr.f32.mxu1 %v1207_v10 }
  0x19   : > { %v1306_v11 = vand.u32 4294901760, %v301_v7  ;;  %v1308_v12 = vand.u32 4294901760, %v300_v8  ;;  %v1310_v13 = vand.u32 4294901760, %v299_v9  ;;  %v298_v14 = vld [vmem:[%s1642_s2 + $0x48] sm:$0xff]  ;;  %v297_v15 = vld [vmem:[%s1642_s2 + $0x40] sm:$0xff]  ;;  %v296_v16 = vld [vmem:[%s1642_s2 + $0x38] sm:$0xff] }
  0x1a   : > { %326 = vmatprep.subr.mxu0 %v1289_v4  ;;  %v1322_v17 = vand.u32 4294901760, %v298_v14  ;;  %v1324_v18 = vand.u32 4294901760, %v297_v15  ;;  %v1326_v19 = vand.u32 4294901760, %v296_v16  ;;  %v1329_v20 = vsub.f32 %v304_v1, %v1289_v4  ;;  %v295_v21 = vld [vmem:[%s1642_s2 + $0x30] sm:$0xff]  ;;  %v1337_v22 = vld [vmem:[%s1642_s2 + $0x28] sm:$0xff]  ;;  %v1342_v23 = vld [vmem:[%s1642_s2 + $0x20] sm:$0xff] }
  0x1b   : > { %328 = vmatpush1.msra.mxu0 %v1291_v5  ;;  %v1345_v24 = vand.u32 4294901760, %v295_v21  ;;  %v1348_v25 = vsub.f32 %v303_v2, %v1291_v5  ;;  %v1351_v26 = vand.u32 4294901760, %v1337_v22  ;;  %v1354_v27 = vsub.f32 %v302_v3, %v1293_v6  ;;  %v1359_v28 = vld [vmem:[%s1642_s2 + $0x18] sm:$0xff]  ;;  %v1364_v29 = vld [vmem:[%s1642_s2 + $0x10] sm:$0xff]  ;;  %v1369_v30 = vld [vmem:[%s1642_s2 + $0x8] sm:$0xff]  ;;  %s1210_s10 = smov 32  }
  0x1c   : > { %330 = vmatprep.subr.mxu0 %v1293_v6  ;;  %v419_v31 = vand.u32 4294901760, %v1329_v20  ;;  %v1374_v32 = vand.u32 4294901760, %v1342_v23  ;;  %v1377_v33 = vsub.f32 %v301_v7, %v1306_v11  ;;  %v1380_v34 = vand.u32 4294901760, %v1359_v28  ;;  %v1394_v39 = vld [vmem:[%s1642_s2] sm:$0xff]  ;;  %s1211_s14 = smov 96  }
  0x1d   : > { %332 = vmatpush1.msra.mxu0 %v1306_v11  ;;  %v425_v35 = vand.u32 4294901760, %v1348_v25  ;;  %v431_v36 = vand.u32 4294901760, %v1354_v27  ;;  %v1386_v37 = vsub.f32 %v300_v8, %v1308_v12  ;;  %v1389_v38 = vand.u32 4294901760, %v1364_v29  ;;  %v1426_v52 = vld [vmem:[#allocation2] sm:$0x3] }
  0x1e   : > { %334 = vmatprep.subr.mxu0 %v1308_v12  ;;  %v420_v40 = vsub.f32 %v1329_v20, %v419_v31  ;;  %v437_v41 = vand.u32 4294901760, %v1377_v33  ;;  %v1402_v42 = vsub.f32 %v299_v9, %v1310_v13  ;;  %v1405_v43 = vand.u32 4294901760, %v1369_v30 }
  0x1f   : > { %336 = vmatpush1.msra.mxu0 %v1310_v13  ;;  %v426_v44 = vsub.f32 %v1348_v25, %v425_v35  ;;  %v432_v45 = vsub.f32 %v1354_v27, %v431_v36  ;;  %v443_v46 = vand.u32 4294901760, %v1386_v37  ;;  %v1416_v47 = vsub.f32 %v298_v14, %v1322_v17 }
  0x20   : > { %338 = vmatprep.subr.mxu0 %v1322_v17  ;;  %v421_v48 = vand.u32 4294901760, %v420_v40  ;;  %v438_v49 = vsub.f32 %v1377_v33, %v437_v41  ;;  %v449_v50 = vand.u32 4294901760, %v1402_v42  ;;  %v1424_v51 = vand.u32 4294901760, %v1394_v39 }
  0x21   : > { %340 = vmatpush1.msra.mxu0 %v1324_v18  ;;  %v427_v53 = vand.u32 4294901760, %v426_v44  ;;  %v433_v54 = vand.u32 4294901760, %v432_v45  ;;  %v444_v55 = vsub.f32 %v1386_v37, %v443_v46  ;;  %v455_v56 = vand.u32 4294901760, %v1416_v47 }
  0x22   : > { %342 = vmatprep.subr.mxu0 %v1326_v19  ;;  %422 = vmatprep.subr.mxu1 %v421_v48  ;;  %v439_v57 = vand.u32 4294901760, %v438_v49  ;;  %v450_v58 = vsub.f32 %v1402_v42, %v449_v50  ;;  %v1438_v59 = vsub.f32 %v297_v15, %v1324_v18  ;;  %v1441_v60 = vsub.f32 %v296_v16, %v1326_v19 }
  0x23   : > { %344 = vmatpush1.msra.mxu0 %v1345_v24  ;;  %428 = vmatpush1.msra.mxu1 %v427_v53  ;;  %v445_v61 = vand.u32 4294901760, %v444_v55  ;;  %v456_v62 = vsub.f32 %v1416_v47, %v455_v56  ;;  %v307_v63 = vsel %vm305_vm1, %v1426_v52, 0  ;;  %v1450_v0 = vsub.f32 %v295_v21, %v1345_v24 }
  0x24   : > { %346 = vmatprep.subr.mxu0 %v1351_v26  ;;  %434 = vmatprep.subr.mxu1 %v433_v54  ;;  %v451_v1 = vand.u32 4294901760, %v450_v58  ;;  %v461_v2 = vand.u32 4294901760, %v1438_v59  ;;  %v467_v3 = vand.u32 4294901760, %v1441_v60  ;;  %v1455_v7 = vand.u32 4294901760, %v307_v63 }
  0x25   : > { %348 = vmatpush1.msra.mxu0 %v1374_v32  ;;  %440 = vmatpush1.msra.mxu1 %v439_v57  ;;  %v457_v8 = vand.u32 4294901760, %v456_v62  ;;  %v473_v9 = vand.u32 4294901760, %v1450_v0  ;;  %v1461_v14 = vsub.f32 %v1337_v22, %v1351_v26  ;;  %v1465_v15 = vsub.f32 %v1342_v23, %v1374_v32 }
  0x26   : > { %350 = vmatprep.subr.mxu0 %v1380_v34  ;;  %446 = vmatprep.subr.mxu1 %v445_v61  ;;  %v462_v16 = vsub.f32 %v1438_v59, %v461_v2  ;;  %v468_v21 = vsub.f32 %v1441_v60, %v467_v3  ;;  %v1475_v40 = vsub.f32 %v307_v63, %v1455_v7  ;;  %vm962_vm4 = vcmask 261120  }
  0x27   : > { %352 = vmatpush1.msra.mxu0 %v1389_v38  ;;  %452 = vmatpush1.msra.mxu1 %v451_v1  ;;  %v474_v22 = vsub.f32 %v1450_v0, %v473_v9  ;;  %v479_v23 = vand.u32 4294901760, %v1461_v14  ;;  %v485_v44 = vand.u32 4294901760, %v1465_v15  ;;  %v1485_v45 = vsub.f32 %v1359_v28, %v1380_v34 }
  0x28   : > { %354 = vmatprep.subr.mxu0 %v1405_v43  ;;  %458 = vmatprep.subr.mxu1 %v457_v8  ;;  %v463_v48 = vand.u32 4294901760, %v462_v16  ;;  %v469_v49 = vand.u32 4294901760, %v468_v21  ;;  %v392_v53 = vand.u32 4294901760, %v1475_v40  ;;  %v1491_v54 = vsub.f32 %v1364_v29, %v1389_v38 }
  0x29   : > { %356 = vmatpush1.msra.mxu0 %v1424_v51  ;;  %v475_v55 = vand.u32 4294901760, %v474_v22  ;;  %v480_v57 = vsub.f32 %v1461_v14, %v479_v23  ;;  %v486_v28 = vsub.f32 %v1465_v15, %v485_v44  ;;  %v491_v58 = vand.u32 4294901760, %v1485_v45 }
  0x2a   : > { %464 = vmatpush1.msra.mxu1 %v463_v48  ;;  %571 = vmatprep.subr.mxu0 %v1329_v20  ;;  %v393_v29 = vsub.f32 %v1475_v40, %v392_v53  ;;  %v497_v61 = vand.u32 4294901760, %v1491_v54  ;;  %v1508_v62 = vsub.f32 %v1369_v30, %v1405_v43  ;;  %v1512_v63 = vsub.f32 %v1394_v39, %v1424_v51 }
  0x2b   : > { %470 = vmatprep.subr.mxu1 %v469_v49  ;;  %v481_v1 = vand.u32 4294901760, %v480_v57  ;;  %v487_v8 = vand.u32 4294901760, %v486_v28  ;;  %v492_v16 = vsub.f32 %v1485_v45, %v491_v58  ;;  %vm1023_vm5 = vcmask 517120  }
  0x2c   : > { %v394_v21 = vand.u32 4294901760, %v393_v29  ;;  %476 = vmatpush1.msra.mxu1 %v475_v55  ;;  %v498_v22 = vsub.f32 %v1491_v54, %v497_v61  ;;  %v503_v30 = vand.u32 4294901760, %v1508_v62  ;;  %v509_v48 = vand.u32 4294901760, %v1512_v63 }
  0x2d   : > { %482 = vmatprep.subr.mxu1 %v481_v1  ;;  %v493_v39 = vand.u32 4294901760, %v492_v16  ;;  %vm1031_vm6 = vcmask 254976  }
  0x2e   : > { %395 = vmatmul.mubr.f32.vlgmr.msra.gmra.mxu0 %v394_v21  ;;  %488 = vmatpush1.msra.mxu1 %v487_v8  ;;  %v499_v49 = vand.u32 4294901760, %v498_v22  ;;  %v504_v57 = vsub.f32 %v1508_v62, %v503_v30  ;;  %v510_v55 = vsub.f32 %v1512_v63, %v509_v48  ;;  %v1002_v22 = vld [vmem:[#allocation3] sm:$0x3] }
  0x2f   : > { %574 = vmatpush1.msra.mxu0 %v1348_v25  ;;  %494 = vmatprep.subr.mxu1 %v493_v39 }
  0x30   : > { %577 = vmatprep.subr.mxu0 %v1354_v27  ;;  %500 = vmatpush1.msra.mxu1 %v499_v49  ;;  %v505_v28 = vand.u32 4294901760, %v504_v57  ;;  %v511_v29 = vand.u32 4294901760, %v510_v55  ;;  %v1026_v57 = vld [vmem:[#allocation3] sm:$0x3] }
  0x31   : > { %580 = vmatpush1.msra.mxu0 %v1377_v33  ;;  %649 = vmatprep.mubr.f32.mxu0 %v1207_v10 }
  0x32   : > { %583 = vmatprep.subr.mxu0 %v1386_v37  ;;  %506 = vmatprep.subr.mxu1 %v505_v28 }
  0x33   : > { %586 = vmatpush1.msra.mxu0 %v1402_v42  ;;  %512 = vmatpush1.msra.mxu1 %v511_v29 }
  0x34   : > { %589 = vmatprep.subr.mxu0 %v1416_v47  ;;  %547 = vmatmul.mubr.f32.vlgmr.msra.gmra.mxu1 %v1455_v7 }
  0x35   : > { %592 = vmatpush1.msra.mxu0 %v1438_v59  ;;  %675 = vmatprep.subr.mxu1 %v1289_v4 }
  0x36   : > { %595 = vmatprep.subr.mxu0 %v1441_v60  ;;  %677 = vmatpush1.msra.mxu1 %v1291_v5 }
  0x37   : > { %598 = vmatpush1.msra.mxu0 %v1450_v0  ;;  %679 = vmatprep.subr.mxu1 %v1293_v6 }
  0x38   : > { %601 = vmatprep.subr.mxu0 %v1461_v14  ;;  %681 = vmatpush1.msra.mxu1 %v1306_v11 }
  0x39   : > { %604 = vmatpush1.msra.mxu0 %v1465_v15  ;;  %683 = vmatprep.subr.mxu1 %v1308_v12 }
  0x3a   : > { %607 = vmatprep.subr.mxu0 %v1485_v45  ;;  %685 = vmatpush1.msra.mxu1 %v1310_v13 }
  0x3b   : > { %610 = vmatpush1.msra.mxu0 %v1491_v54  ;;  %687 = vmatprep.subr.mxu1 %v1322_v17 }
  0x3c   : > { %613 = vmatprep.subr.mxu0 %v1508_v62  ;;  %689 = vmatpush1.msra.mxu1 %v1324_v18 }
  0x3d   : > { %616 = vmatpush1.msra.mxu0 %v1512_v63  ;;  %691 = vmatprep.subr.mxu1 %v1326_v19 }
  0x3e   : > { %652 = vmatmul.mubr.f32.vlgmr.msra.gmra.mxu0 %v1475_v40  ;;  %767 = vmatprep.subr.mxu0 %v419_v31 }
  0x3f   : > { %693 = vmatpush1.msra.mxu1 %v1345_v24  ;;  %771 = vmatpush1.msra.mxu0 %v425_v35  ;;  %v286_v35 = vld [vmem:[%s1262_s27] sm:$0x3] }
  0x40   : > { %695 = vmatprep.subr.mxu1 %v1351_v26  ;;  %775 = vmatprep.subr.mxu0 %v431_v36 }
  0x41   : > { %697 = vmatpush1.msra.mxu1 %v1374_v32  ;;  %779 = vmatpush1.msra.mxu0 %v437_v41  ;;  %v1158_v41 = vld [vmem:[%s1267_s6 + $0x2] sm:$0x3] }
  0x42   : > { %699 = vmatprep.subr.mxu1 %v1380_v34  ;;  %783 = vmatprep.subr.mxu0 %v443_v46 }
  0x43   : > { %701 = vmatpush1.msra.mxu1 %v1389_v38  ;;  %787 = vmatpush1.msra.mxu0 %v449_v50  ;;  %v276_v50 = vld [vmem:[%s1643_s3] sm:$0x3] }
  0x44   : > { %703 = vmatprep.subr.mxu1 %v1405_v43  ;;  %791 = vmatprep.subr.mxu0 %v455_v56  ;;  %v282_v56 = vstv %s1254_s20 }
  0x45   : > { %705 = vmatpush1.msra.mxu1 %v1424_v51  ;;  %738 = vmatprep.mubr.f32.mxu1 %v1207_v10  ;;  %vm283_vm3 = vcmp.lt.s32.totalorder %v282_v56, %v276_v50 }
  0x46   : > { %795 = vmatpush1.msra.mxu0 %v461_v2  ;;  %742 = vmatmul.mubr.f32.vlgmr.msra.gmra.mxu1 %v392_v53  ;;  %v1157_v60 = vsel %vm283_vm3, 1.0, %v1207_v10 }
  0x47   : > { %799 = vmatprep.subr.mxu0 %v467_v3  ;;  %885 = vmatprep.subr.mxu1 %v1289_v4  ;;  %v1208_v4 = vmov 0  }
  0x48   : > { %803 = vmatpush1.msra.mxu0 %v473_v9  ;;  %887 = vmatpush1.msra.mxu1 %v1291_v5 }
  0x49   : > { %807 = vmatprep.subr.mxu0 %v479_v23  ;;  %889 = vmatprep.subr.mxu1 %v1293_v6 }
  0x4a   : > { %811 = vmatpush1.msra.mxu0 %v485_v44  ;;  %891 = vmatpush1.msra.mxu1 %v1306_v11 }
  0x4b   : > { %815 = vmatprep.subr.mxu0 %v491_v58  ;;  %893 = vmatprep.subr.mxu1 %v1308_v12 }
  0x4c   : > { %819 = vmatpush1.msra.mxu0 %v497_v61  ;;  %895 = vmatpush1.msra.mxu1 %v1310_v13 }
  0x4d   : > { %823 = vmatprep.subr.mxu0 %v503_v30  ;;  %897 = vmatprep.subr.mxu1 %v1322_v17 }
  0x4e   : > { %827 = vmatpush1.msra.mxu0 %v509_v48  ;;  %860 = vmatprep.mubr.f32.mxu0 %v1207_v10 }
  0x4f   : > { %899 = vmatpush1.msra.mxu1 %v1324_v18  ;;  %862 = vmatmul.mubr.f32.vlgmr.msra.gmra.mxu0 %v1455_v7 }
  0x50   : > { %901 = vmatprep.subr.mxu1 %v1326_v19  ;;  %948 = vmatprep.mubr.f32.mxu1 %v1207_v10 }
  0x51   : > { %903 = vmatpush1.msra.mxu1 %v1345_v24  ;;  %1181 = vset.pattern.permute.xlu1 %v1208_v4 }
  0x52   : > { %905 = vmatprep.subr.mxu1 %v1351_v26  ;;  %1180 = vset.pattern.permute.xlu0 %v1208_v4 }
  0x53   : > { %907 = vmatpush1.msra.mxu1 %v1374_v32 }
  0x54   : > { %909 = vmatprep.subr.mxu1 %v1380_v34 }
  0x55   : > { %911 = vmatpush1.msra.mxu1 %v1389_v38 }
  0x56   : > { %913 = vmatprep.subr.mxu1 %v1405_v43 }
  0x57   : > { %915 = vmatpush1.msra.mxu1 %v1424_v51  ;;  %v277_v51 = vstv %s1248_s19 }
  0x58   : > { %950 = vmatmul.mubr.f32.vlgmr.msra.gmra.mxu1 %v1455_v7  ;;  %vm278_vm2 = vcmp.lt.s32.totalorder %v277_v51, %v276_v50 }
  0x59   : > { %v1156_v59 = vsel %vm278_vm2, 1.0, %v1207_v10 }
  0xee   : > { %v396_v5 = vpop.f32.mrf.mxu0 }
  0xf0   : > { %v398_v6 = vpop.f32.mrf.mxu0 }
  0xf4   : > { %v548_v11 = vpop.f32.mrf.mxu1 }
  0xf5   : > { %v549_v19 = vadd.f32 %v548_v11, %v396_v5 }
  0xf6   : > { %v550_v13 = vpop.f32.mrf.mxu1 }
  0xf7   : > { %v551_v24 = vadd.f32 %v550_v13, %v398_v6 }
  0xfe   : > { %v653_v12 = vpop.f32.mrf.mxu0 }
  0xff   : > { %v654_v25 = vadd.f32 %v653_v12, %v549_v19 }
 0x100   : > { %v655_v17 = vpop.f32.mrf.mxu0 }
 0x101   : > { %v656_v27 = vadd.f32 %v655_v17, %v551_v24 }
 0x106   : > { %v743_v18 = vpop.f32.mrf.mxu1 }
 0x107   : > { %v744_v31 = vadd.f32 %v743_v18, %v654_v25 }
 0x108   : > { %v745_v26 = vpop.f32.mrf.mxu1 }
 0x109   : > { %v746_v33 = vadd.f32 %v745_v26, %v656_v27 }
 0x10f   : > { %v863_v20 = vpop.f32.mrf.mxu0 }
 0x110   : > { %v864_v34 = vadd.f32 %v863_v20, %v744_v31 }
 0x111   : > { %v865_v32 = vpop.f32.mrf.mxu0 }
 0x112   : > { %v866_v37 = vadd.f32 %v865_v32, %v746_v33 }
 0x118   : > { %v951_v36 = vpop.f32.mrf.mxu1 }
 0x119   : > { %v952_v38 = vadd.f32 %v951_v36, %v864_v34 }
 0x11a   : > { %v953_v42 = vpop.f32.mrf.mxu1 }
 0x11b   : > { %v956_v43 = vadd.f32 %v952_v38, %v286_v35  ;;  %v954_v46 = vadd.f32 %v953_v42, %v866_v37 }
 0x11d   : > { %v957_v47 = vadd.f32 %v1158_v41, %v954_v46  ;;  %981 = vrot.lane.b32.xlu1 %v956_v43, %s1209_s8 }
 0x11f   : > { %959 = vrot.lane.b32.xlu0 %v957_v47, %s1210_s10 }
 0x121   : > { %984 = vrot.lane.b32.xlu1 %v957_v47, %s1211_s14 }
 0x123   : > { %971 = vrot.lane.b32.xlu0 %v956_v43, %s1211_s14 }
 0x125   : > { %992 = vrot.lane.b32.xlu1 %v957_v47, %s1209_s8 }
 0x127   : > { %989 = vrot.lane.b32.xlu0 %v956_v43, %s1210_s10 }
 0x129   : > { %1010 = vperm.xlu1 %1181, %v1156_v59  }
 0x12b   : > { %1015 = vperm.xlu0 %1180, %v1157_v60  }
 0x18f   : > { %v982_v2 = vpop.permute.xlu1 %981 }
 0x191   : > { %v960_v0 = vpop.permute.xlu0 %959 }
 0x192   : > { %v963_v3 = vsel %vm962_vm4, %v956_v43, %v960_v0 }
 0x193   : > { %v1159_v7 = vmul.f32 -1.442695, %v963_v3  ;;  %v985_v40 = vpop.permute.xlu1 %984 }
 0x194   : > { %v987_v58 = vsel %vm962_vm4, %v982_v2, %v985_v40 }
 0x195   : > { %1182 = vpow2.f32 %v1159_v7  ;;  %v972_v9 = vpop.permute.xlu0 %971 }
 0x196   : > { %v974_v14 = vsel %vm962_vm4, %v972_v9, %v957_v47 }
 0x197   : > { %v1160_v15 = vmul.f32 -1.442695, %v974_v14  ;;  %v993_v44 = vpop.permute.xlu1 %992 }
 0x199   : > { %1184 = vpow2.f32 %v1160_v15  ;;  %v990_v23 = vpop.permute.xlu0 %989 }
 0x19a   : > { %v995_v45 = vsel %vm962_vm4, %v990_v23, %v993_v44 }
 0x19b   : > { %v1161_v53 = vmul.f32 -1.442695, %v995_v45 }
 0x19d   : > { %1186 = vpow2.f32 %v1161_v53 }
 0x1a2   : > { %v1183_v10 = vpop.eup %1182 }
 0x1a3   : > { %v967_v54 = vadd.f32 1.0, %v1183_v10 }
 0x1a4   : > { %v1011_v1 = vpop.permute.xlu1 %1010 }
 0x1a5   : > { %1188 = vrcp.f32 %v967_v54 }
 0x1a6   : > { %v1185_v61 = vpop.eup %1184  ;;  %1190 = vtanh.f32 %v987_v58  ;;  %v1016_v63 = vpop.permute.xlu0 %1015 }
 0x1a7   : > { %v978_v62 = vadd.f32 1.0, %v1185_v61  ;;  %v1018_v8 = vsel %vm962_vm4, %v1011_v1, %v1016_v63 }
 0x1a8   : > { %v1020_v48 = vsub.f32 1.0, %v1018_v8 }
 0x1a9   : > { %1192 = vrcp.f32 %v978_v62 }
 0x1aa   : > { %v1187_v16 = vpop.eup %1186  ;;  %v1027_v4 = vmul.f32 %v1026_v57, %v1020_v48  ;;  %v1021_v17 = vmul.f32 %v1020_v48, %v1426_v52 }
 0x1ab   : > { %v999_v49 = vadd.f32 1.0, %v1187_v16 }
 0x1ad   : > { %1194 = vrcp.f32 %v999_v49 }
 0x1b2   : > { %v1189_v21 = vpop.eup %1188 }
 0x1b3   : > { %v1191_v30 = vpop.eup %1190 }
 0x1b4   : > { %v1004_v55 = vmul.f32 %v1191_v30, %v1189_v21 }
 0x1b6   : > { %v1193_v39 = vpop.eup %1192 }
 0x1b7   : > { %v1003_v28 = vmul.f32 %v1193_v39, %v1002_v22 }
 0x1b9   : > { %v1005_v29 = vadd.f32 %v1004_v55, %v1003_v28 }
 0x1ba   : > { %v1195_v11 = vpop.eup %1194 }
 0x1bb   : > { %1196 = vtanh.f32 %v1005_v29  ;;  %v1025_v5 = vmul.f32 %v1018_v8, %v1005_v29 }
 0x1bd   : > { %v1028_v6 = vadd.f32 %v1027_v4, %v1025_v5 }
 0x1bf   : > { %1029 = vst.msk [vmem:[#allocation3] sm:$0x3] %vm1023_vm5, %v1028_v6 }
 0x1c8   : > { %v1197_v12 = vpop.eup %1196 }
 0x1c9   : > { %v1007_v13 = vmul.f32 %v1197_v12, %v1195_v11 }
 0x1cb   : > { %v1033_v18 = vmul.f32 %v1016_v63, %v1007_v13  ;;  %v1019_v19 = vmul.f32 %v1018_v8, %v1007_v13  ;;  %v1030_v20 = vmul.f32 %v1011_v1, %v1007_v13 }
 0x1cd   : > { %v1022_v24 = vadd.f32 %v1021_v17, %v1019_v19  ;;  %1035 = vrot.lane.b32.xlu1 %v1033_v18, %s1211_s14  ;;  %1032 = vst.msk [vmem:[%s1272_s9] sm:$0x3] %vm1031_vm6, %v1030_v20 }
 0x1cf   : > { %1024 = vst.msk [vmem:[#allocation2] sm:$0x3] %vm1023_vm5, %v1022_v24 }
 0x23f   : > { %v1036_v25 = vpop.permute.xlu1 %1035 }
 0x240   : > { %1038 = vst.msk [vmem:[%s1277_s13] sm:$0x3] %vm1031_vm6, %v1036_v25 }
 0x241 PF: > { %s16_s18 = sadd.s32 1, %s1204_s18  }
 0x242   : > { %p13_p6 = scmp.ge.s32.totalorder %s16_s18, 10  }
 0x244   :  { %15 = sbr.rel (!%p13_p6) target bundleno = 1 (0x1), region = 85 }

// kernel: lstm_mlm_forward.14
= control target key start
LH: loop header
LB: loop body
LE: loop exit
PB: predicated region body
PF: predicated region fallthrough
CT: control target
= control target key end

     0   :  { %vm34_vm0 = vcmask 254976   ;;  %s755_s0 = inlined_call_operand.vmem [shape: f32[8,2,32], index: 0, kind: input, shape index: {}]   ;;  %s756_s1 = inlined_call_operand.vmem [shape: f32[8,2,32], index: 1, kind: input, shape index: {}]   ;;  %s757_s2 = inlined_call_operand.vmem [shape: f32[8,2,64], index: 2, kind: input, shape index: {}]   ;;  %s758_s3 = inlined_call_operand.vmem [shape: f32[8,2,64], index: 3, kind: output, shape index: {0}]   ;;  %s759_s4 = inlined_call_operand.vmem [shape: f32[8,2,64], index: 4, kind: output, shape index: {1}]   ;;  %s760_s5 = inlined_call_operand.hbm [shape: f32[8,2,64], index: 5, kind: output, shape index: {2}]  }
   0x1   :  { %v367_v0 = vld [vmem:[%s755_s0] sm:$0x3]  ;;  %v372_v1 = vld [vmem:[%s755_s0 + $0x2] sm:$0x3]  ;;  %v377_v2 = vld [vmem:[%s755_s0 + $0x4] sm:$0x3] }
   0x2   :  { %v382_v3 = vld [vmem:[%s755_s0 + $0x6] sm:$0x3]  ;;  %v35_v4 = vsel %vm34_vm0, %v367_v0, 0.0  ;;  %v36_v5 = vsel %vm34_vm0, %v372_v1, 0.0  ;;  %v38_v6 = vsel %vm34_vm0, %v377_v2, 0.0 }
   0x3   :  { %v393_v7 = vld [vmem:[%s756_s1] sm:$0x3]  ;;  %v398_v8 = vld [vmem:[%s755_s0 + $0x8] sm:$0x3]  ;;  %v37_v9 = vadd.f32 %v36_v5, %v35_v4  ;;  %v403_v10 = vld [vmem:[%s756_s1 + $0x2] sm:$0x3] }
   0x4   :  { %v40_v11 = vsel %vm34_vm0, %v382_v3, 0.0  ;;  %v410_v12 = vld [vmem:[%s756_s1 + $0x4] sm:$0x3]  ;;  %v52_v13 = vsel %vm34_vm0, %v393_v7, 0.0  ;;  %v417_v14 = vld [vmem:[%s755_s0 + $0xa] sm:$0x3] }
   0x5   :  { %v39_v15 = vadd.f32 %v38_v6, %v37_v9  ;;  %v422_v16 = vld [vmem:[%s756_s1 + $0x6] sm:$0x3]  ;;  %v42_v17 = vsel %vm34_vm0, %v398_v8, 0.0  ;;  %v53_v18 = vsel %vm34_vm0, %v403_v10, 0.0  ;;  %v55_v19 = vsel %vm34_vm0, %v410_v12, 0.0 }
   0x6   :  { %v433_v20 = vld [vmem:[%s755_s0 + $0xc] sm:$0x3]  ;;  %v438_v22 = vld [vmem:[%s756_s1 + $0x8] sm:$0x3]  ;;  %v54_v23 = vadd.f32 %v53_v18, %v52_v13 }
   0x7   :  { %v41_v21 = vadd.f32 %v40_v11, %v39_v15 }
   0x8   :  { %11 = vsyncpa [#allocation3], 0  ;;  %v44_v24 = vsel %vm34_vm0, %v417_v14, 0.0  ;;  %v57_v25 = vsel %vm34_vm0, %v422_v16, 0.0  ;;  %v447_v26 = vld [vmem:[%s755_s0 + $0xe] sm:$0x3]  ;;  %v56_v29 = vadd.f32 %v55_v19, %v54_v23 }
   0x9   :  { %v43_v27 = vadd.f32 %v42_v17, %v41_v21  ;;  %v452_v28 = vld [vmem:[%s756_s1 + $0xa] sm:$0x3]  ;;  %v46_v30 = vsel %vm34_vm0, %v433_v20, 0.0  ;;  %v59_v31 = vsel %vm34_vm0, %v438_v22, 0.0  ;;  %v461_v33 = vld [vmem:[%s756_s1 + $0xc] sm:$0x3] }
   0xa   :  { %v58_v34 = vadd.f32 %v57_v25, %v56_v29  ;;  %v48_v35 = vsel %vm34_vm0, %v447_v26, 0.0  ;;  %v61_v36 = vsel %vm34_vm0, %v452_v28, 0.0  ;;  %v470_v38 = vld [vmem:[%s756_s1 + $0xe] sm:$0x3]  ;;  %v63_v40 = vsel %vm34_vm0, %v461_v33, 0.0  ;;  %s331_s1 = smov 32  }
   0xb   :  { %v45_v32 = vadd.f32 %v44_v24, %v43_v27  ;;  %v65_v43 = vsel %vm34_vm0, %v470_v38, 0.0  ;;  %vm174_vm1 = vcmask 261120   ;;  %vm183_vm2 = vcmask 517120   ;;  %s332_s17 = smov [#allocation2]  }
   0xc   :  { %v60_v39 = vadd.f32 %v59_v31, %v58_v34  ;;  %s289_s18 = sshll.u32 %s332_s17, 4  ;;  %s290_s18 = int_to_ptr.vmem [resolvable:$true] %s289_s18 }
   0xd   :  { %v47_v37 = vadd.f32 %v46_v30, %v45_v32  ;;  %p314_p1 = scmp.lt.s32.totalorder %s290_s18, %s290_s18 }
   0xe   :  { %v62_v42 = vadd.f32 %v61_v36, %v60_v39 }
   0xf   :  { %v49_v41 = vadd.f32 %v48_v35, %v47_v37 }
  0x10   :  { %v64_v44 = vadd.f32 %v63_v40, %v62_v42 }
  0x11   :  { %50 = vadd.xlane.f32.xlu0 %v49_v41 }
  0x12   :  { %v66_v45 = vadd.f32 %v65_v43, %v64_v44 }
  0x15   :  { %67 = vadd.xlane.f32.xlu0 %v66_v45 }
  0x2b   :  { %150 = vrot.lane.b32.xlu0 %v393_v7, %s331_s1 }
  0x2f   :  { %154 = vrot.lane.b32.xlu0 %v410_v12, %s331_s1 }
  0x33   :  { %158 = vrot.lane.b32.xlu0 %v438_v22, %s331_s1 }
  0x9a   :  { %v51_v46 = vpop.xlane.xlu0 %50 }
  0x9e   :  { %v68_v47 = vpop.xlane.xlu0 %67 }
  0x9f   :  { %v69_v48 = vadd.f32 %v68_v47, %v51_v46 }
  0xa1   :  { %v71_v49 = vmul.f32 0.001953125, %v69_v48 }
  0xa3   :  { %v477_v50 = vsub.f32 %v367_v0, %v71_v49  ;;  %v480_v51 = vsub.f32 %v372_v1, %v71_v49  ;;  %v483_v52 = vsub.f32 %v377_v2, %v71_v49  ;;  %v486_v53 = vsub.f32 %v382_v3, %v71_v49 }
  0xa4   :  { %v489_v54 = vsub.f32 %v398_v8, %v71_v49  ;;  %v498_v58 = vsub.f32 %v417_v14, %v71_v49  ;;  %v505_v62 = vsub.f32 %v433_v20, %v71_v49  ;;  %v511_v6 = vsub.f32 %v393_v7, %v71_v49 }
  0xa5   :  { %v88_v55 = vmul.f32 %v477_v50, %v477_v50  ;;  %v89_v56 = vmul.f32 %v480_v51, %v480_v51  ;;  %v90_v57 = vmul.f32 %v483_v52, %v483_v52  ;;  %v91_v59 = vmul.f32 %v486_v53, %v486_v53 }
  0xa6   :  { %v92_v63 = vmul.f32 %v489_v54, %v489_v54  ;;  %v514_v9 = vsub.f32 %v403_v10, %v71_v49  ;;  %v517_v11 = vsub.f32 %v410_v12, %v71_v49  ;;  %v520_v13 = vsub.f32 %v447_v26, %v71_v49 }
  0xa7   :  { %v96_v60 = vsel %vm34_vm0, %v88_v55, 0.0  ;;  %v97_v61 = vsel %vm34_vm0, %v89_v56, 0.0  ;;  %v99_v5 = vsel %vm34_vm0, %v90_v57, 0.0  ;;  %v523_v17 = vsub.f32 %v422_v16, %v71_v49 }
  0xa8   :  { %v98_v4 = vadd.f32 %v97_v61, %v96_v60  ;;  %v93_v18 = vmul.f32 %v498_v58, %v498_v58  ;;  %v101_v19 = vsel %vm34_vm0, %v91_v59, 0.0  ;;  %v113_v21 = vmul.f32 %v511_v6, %v511_v6 }
  0xa9   :  { %v114_v23 = vmul.f32 %v514_v9, %v514_v9  ;;  %v533_v25 = vsub.f32 %v438_v22, %v71_v49  ;;  %v115_v27 = vmul.f32 %v517_v11, %v517_v11  ;;  %v94_v29 = vmul.f32 %v505_v62, %v505_v62 }
  0xaa   :  { %v100_v15 = vadd.f32 %v99_v5, %v98_v4  ;;  %v103_v30 = vsel %vm34_vm0, %v92_v63, 0.0  ;;  %v121_v31 = vsel %vm34_vm0, %v113_v21, 0.0  ;;  %v542_v34 = vsub.f32 %v452_v28, %v71_v49 }
  0xab   :  { %v116_v35 = vmul.f32 %v523_v17, %v523_v17  ;;  %v122_v36 = vsel %vm34_vm0, %v114_v23, 0.0  ;;  %v95_v37 = vmul.f32 %v520_v13, %v520_v13  ;;  %v105_v39 = vsel %vm34_vm0, %v93_v18, 0.0 }
  0xac   :  { %v102_v24 = vadd.f32 %v101_v19, %v100_v15  ;;  %v123_v40 = vadd.f32 %v122_v36, %v121_v31  ;;  %v551_v42 = vsub.f32 %v461_v33, %v71_v49  ;;  %v117_v43 = vmul.f32 %v533_v25, %v533_v25 }
  0xad   :  { %v124_v44 = vsel %vm34_vm0, %v115_v27, 0.0  ;;  %v107_v45 = vsel %vm34_vm0, %v94_v29, 0.0  ;;  %v558_v48 = vsub.f32 %v470_v38, %v71_v49  ;;  %v118_v55 = vmul.f32 %v542_v34, %v542_v34  ;;  %v151_v27 = vpop.permute.xlu0 %150 }
  0xae   :  { %v104_v32 = vadd.f32 %v103_v30, %v102_v24  ;;  %v125_v46 = vadd.f32 %v124_v44, %v123_v40  ;;  %v126_v56 = vsel %vm34_vm0, %v116_v35, 0.0  ;;  %v109_v57 = vsel %vm34_vm0, %v95_v37, 0.0 }
  0xaf   :  { %v119_v61 = vmul.f32 %v551_v42, %v551_v42  ;;  %v128_v63 = vsel %vm34_vm0, %v117_v43, 0.0  ;;  %v120_v49 = vmul.f32 %v558_v48, %v558_v48  ;;  %v130_v5 = vsel %vm34_vm0, %v118_v55, 0.0 }
  0xb0   :  { %v106_v41 = vadd.f32 %v105_v39, %v104_v32  ;;  %v127_v59 = vadd.f32 %v126_v56, %v125_v46  ;;  %v175_v7 = vsel %vm174_vm1, %v367_v0, %v151_v27 }
  0xb1   :  { %v132_v18 = vsel %vm34_vm0, %v119_v61, 0.0  ;;  %v134_v21 = vsel %vm34_vm0, %v120_v49, 0.0  ;;  %184 = vst.msk [vmem:[%s758_s3] sm:$0x3] %vm183_vm2, %v175_v7 }
  0xb2   :  { %v108_v47 = vadd.f32 %v107_v45, %v106_v41  ;;  %v129_v4 = vadd.f32 %v128_v63, %v127_v59  ;;  %v258_v45 = vld [vmem:[%s757_s2 + $0x4] sm:$0x3]  ;;  %v262_v63 = vld [vmem:[%s757_s2 + $0xc] sm:$0x3] }
  0xb4   :  { %v110_v60 = vadd.f32 %v109_v57, %v108_v47  ;;  %v131_v15 = vadd.f32 %v130_v5, %v129_v4  ;;  %v260_v47 = vld [vmem:[%s757_s2 + $0x8] sm:$0x3] }
  0xb6   :  { %111 = vadd.xlane.f32.xlu1 %v110_v60  ;;  %v133_v19 = vadd.f32 %v132_v18, %v131_v15  ;;  %v259_v60 = vld [vmem:[%s757_s2 + $0x6] sm:$0x3] }
  0xb8   :  { %v135_v23 = vadd.f32 %v134_v21, %v133_v19  ;;  %v261_v19 = vld [vmem:[%s757_s2 + $0xa] sm:$0x3] }
  0xba   :  { %136 = vadd.xlane.f32.xlu1 %v135_v23 }
  0xcb   :  { %152 = vrot.lane.b32.xlu1 %v403_v10, %s331_s1  ;;  %v155_v10 = vpop.permute.xlu0 %154 }
  0xcc   :  { %v177_v12 = vsel %vm174_vm1, %v377_v2, %v155_v10  ;;  %v263_v10 = vld [vmem:[%s757_s2 + $0xe] sm:$0x3] }
  0xcd   :  { %186 = vst.msk [vmem:[%s758_s3 + $0x4] sm:$0x3] %vm183_vm2, %v177_v12 }
  0xcf   :  { %156 = vrot.lane.b32.xlu1 %v422_v16, %s331_s1 }
  0xd3   :  { %160 = vrot.lane.b32.xlu1 %v452_v28, %s331_s1  ;;  %v159_v28 = vpop.permute.xlu0 %158 }
  0xd4   :  { %v179_v0 = vsel %vm174_vm1, %v398_v8, %v159_v28 }
  0xd5   :  { %188 = vst.msk [vmem:[%s758_s3 + $0x8] sm:$0x3] %vm183_vm2, %v179_v0 }
 0x13f   :  { %v112_v24 = vpop.xlane.xlu1 %111 }
 0x143   :  { %v137_v16 = vpop.xlane.xlu1 %136 }
 0x144   :  { %v138_v22 = vadd.f32 %v137_v16, %v112_v24 }
 0x146   :  { %v139_v29 = vmul.f32 0.001953125, %v138_v22 }
 0x147   :  { %v153_v30 = vpop.permute.xlu1 %152 }
 0x148   :  { %v140_v31 = vadd.f32 1e-05, %v139_v29  ;;  %v176_v2 = vsel %vm174_vm1, %v372_v1, %v153_v30 }
 0x149   :  { %185 = vst.msk [vmem:[%s758_s3 + $0x2] sm:$0x3] %vm183_vm2, %v176_v2 }
 0x14a   :  { %307 = vrsqrt.f32 %v140_v31 }
 0x14b   :  { %v157_v32 = vpop.permute.xlu1 %156 }
 0x14c   :  { %v178_v8 = vsel %vm174_vm1, %v382_v3, %v157_v32 }
 0x14d   :  { %187 = vst.msk [vmem:[%s758_s3 + $0x6] sm:$0x3] %vm183_vm2, %v178_v8 }
 0x14f   :  { %v161_v35 = vpop.permute.xlu1 %160 }
 0x150   :  { %v180_v36 = vsel %vm174_vm1, %v417_v14, %v161_v35 }
 0x151   :  { %189 = vst.msk [vmem:[%s758_s3 + $0xa] sm:$0x3] %vm183_vm2, %v180_v36 }
 0x157   :  { %v620_v1 = vpop.eup %307 }
 0x158   :  { %v201_v37 = vmul.f32 %v620_v1, %v514_v9  ;;  %v200_v3 = vmul.f32 %v620_v1, %v511_v6  ;;  %v202_v14 = vmul.f32 %v620_v1, %v517_v11  ;;  %v204_v39 = vmul.f32 %v620_v1, %v533_v25 }
 0x159   :  { %v203_v9 = vmul.f32 %v620_v1, %v523_v17  ;;  %v206_v6 = vmul.f32 %v620_v1, %v551_v42  ;;  %v205_v11 = vmul.f32 %v620_v1, %v542_v34  ;;  %v207_v25 = vmul.f32 %v620_v1, %v558_v48  ;;  %v257_v34 = vld [vmem:[%s757_s2 + $0x2] sm:$0x3] }
 0x15a   :  { %218 = vrot.lane.b32.xlu1 %v201_v37, %s331_s1  ;;  %216 = vrot.lane.b32.xlu0 %v200_v3, %s331_s1  ;;  %v193_v17 = vmul.f32 %v620_v1, %v480_v51  ;;  %v192_v40 = vmul.f32 %v620_v1, %v477_v50  ;;  %v194_v44 = vmul.f32 %v620_v1, %v483_v52 }
 0x15b   :  { %v196_v46 = vmul.f32 %v620_v1, %v489_v54  ;;  %v195_v59 = vmul.f32 %v620_v1, %v486_v53  ;;  %v198_v61 = vmul.f32 %v620_v1, %v505_v62  ;;  %v197_v18 = vmul.f32 %v620_v1, %v498_v58 }
 0x15c   :  { %v199_v7 = vmul.f32 %v620_v1, %v520_v13 }
 0x15e   :  { %220 = vrot.lane.b32.xlu1 %v202_v14, %s331_s1  ;;  %224 = vrot.lane.b32.xlu0 %v204_v39, %s331_s1 }
 0x162   :  { %222 = vrot.lane.b32.xlu1 %v203_v9, %s331_s1  ;;  %228 = vrot.lane.b32.xlu0 %v206_v6, %s331_s1 }
 0x166   :  { %226 = vrot.lane.b32.xlu1 %v205_v11, %s331_s1  ;;  %162 = vrot.lane.b32.xlu0 %v461_v33, %s331_s1  ;;  %v256_v33 = vld [vmem:[%s757_s2] sm:$0x3]  ;;  %s309_s2 = scalar_lea.vmem %s290_s18, 256 }
 0x167   :  { %p310_p0 = scmp.ne.s32.totalorder %s290_s18, %s309_s2  ;;  %p315_p2 = scmp.lt.s32.totalorder %s309_s2, %s309_s2 }
 0x169   :  { %p316_p3 = por %p315_p2, %p314_p1 }
 0x16a   :  { %230 = vrot.lane.b32.xlu1 %v207_v25, %s331_s1 }
 0x16b   :  { %p317_p4 = pnand %p316_p3, %p310_p0 }
 0x16e   :  { %164 = vrot.lane.b32.xlu1 %v470_v38, %s331_s1 }
 0x1cc   :  { %v219_v41 = vpop.permute.xlu1 %218  ;;  %v217_v42 = vpop.permute.xlu0 %216 }
 0x1cd   :  { %v241_v43 = vsel %vm174_vm1, %v193_v17, %v219_v41  ;;  %v240_v38 = vsel %vm174_vm1, %v192_v40, %v217_v42 }
 0x1ce   :  { %249 = vst.msk [vmem:[%s759_s4 + $0x2] sm:$0x3] %vm183_vm2, %v241_v43  ;;  %v265_v51 = vadd.f32 %v257_v34, %v241_v43  ;;  %248 = vst.msk [vmem:[%s759_s4] sm:$0x3] %vm183_vm2, %v240_v38  ;;  %v264_v50 = vadd.f32 %v256_v33, %v240_v38 }
 0x1d0   :  { %273 = vst.msk [vmem:[#allocation2 + $0x2] sm:$0x3] %vm183_vm2, %v265_v51  ;;  %272 = vst.msk [vmem:[#allocation2] sm:$0x3] %vm183_vm2, %v264_v50  ;;  %v221_v48 = vpop.permute.xlu1 %220  ;;  %v225_v55 = vpop.permute.xlu0 %224 }
 0x1d1   :  { %v242_v56 = vsel %vm174_vm1, %v194_v44, %v221_v48  ;;  %v244_v52 = vsel %vm174_vm1, %v196_v46, %v225_v55 }
 0x1d2   :  { %250 = vst.msk [vmem:[%s759_s4 + $0x4] sm:$0x3] %vm183_vm2, %v242_v56  ;;  %v266_v54 = vadd.f32 %v258_v45, %v242_v56  ;;  %252 = vst.msk [vmem:[%s759_s4 + $0x8] sm:$0x3] %vm183_vm2, %v244_v52  ;;  %v268_v57 = vadd.f32 %v260_v47, %v244_v52 }
 0x1d4   :  { %274 = vst.msk [vmem:[#allocation2 + $0x4] sm:$0x3] %vm183_vm2, %v266_v54  ;;  %276 = vst.msk [vmem:[#allocation2 + $0x8] sm:$0x3] %vm183_vm2, %v268_v57  ;;  %v223_v4 = vpop.permute.xlu1 %222  ;;  %v229_v49 = vpop.permute.xlu0 %228 }
 0x1d5   :  { %v243_v5 = vsel %vm174_vm1, %v195_v59, %v223_v4  ;;  %v246_v53 = vsel %vm174_vm1, %v198_v61, %v229_v49 }
 0x1d6   :  { %251 = vst.msk [vmem:[%s759_s4 + $0x6] sm:$0x3] %vm183_vm2, %v243_v5  ;;  %v267_v62 = vadd.f32 %v259_v60, %v243_v5  ;;  %254 = vst.msk [vmem:[%s759_s4 + $0xc] sm:$0x3] %vm183_vm2, %v246_v53  ;;  %v270_v15 = vadd.f32 %v262_v63, %v246_v53 }
 0x1d8   :  { %275 = vst.msk [vmem:[#allocation2 + $0x6] sm:$0x3] %vm183_vm2, %v267_v62  ;;  %278 = vst.msk [vmem:[#allocation2 + $0xc] sm:$0x3] %vm183_vm2, %v270_v15  ;;  %v227_v21 = vpop.permute.xlu1 %226  ;;  %v163_v23 = vpop.permute.xlu0 %162 }
 0x1d9   :  { %v245_v24 = vsel %vm174_vm1, %v197_v18, %v227_v21  ;;  %v181_v27 = vsel %vm174_vm1, %v433_v20, %v163_v23 }
 0x1da   :  { %253 = vst.msk [vmem:[%s759_s4 + $0xa] sm:$0x3] %vm183_vm2, %v245_v24  ;;  %v269_v58 = vadd.f32 %v261_v19, %v245_v24  ;;  %190 = vst.msk [vmem:[%s758_s3 + $0xc] sm:$0x3] %vm183_vm2, %v181_v27 }
 0x1dc   :  { %277 = vst.msk [vmem:[#allocation2 + $0xa] sm:$0x3] %vm183_vm2, %v269_v58  ;;  %v231_v20 = vpop.permute.xlu1 %230 }
 0x1dd   :  { %v247_v12 = vsel %vm174_vm1, %v199_v7, %v231_v20 }
 0x1de   :  { %255 = vst.msk [vmem:[%s759_s4 + $0xe] sm:$0x3] %vm183_vm2, %v247_v12  ;;  %v271_v16 = vadd.f32 %v263_v10, %v247_v12 }
 0x1e0   :  { %279 = vst.msk [vmem:[#allocation2 + $0xe] sm:$0x3] %vm183_vm2, %v271_v16  ;;  %v165_v13 = vpop.permute.xlu1 %164 }
 0x1e1   :  { %v182_v22 = vsel %vm174_vm1, %v447_v26, %v165_v13 }
 0x1e2   :  { %320 = shalt.err (!%p317_p4)
}
 0x1e3   :  { %s333_s21 = smov 2   ;;  %191 = vst.msk [vmem:[%s758_s3 + $0xe] sm:$0x3] %vm183_vm2, %v182_v22 }
 0x1e4   :  { %295 = dma.vmem_to_hbm [thread:$0]  %s290_s18, 256, %s760_s5, [#allocation3], %s331_s1, %s331_s1, %s333_s21  }
 0x1e5   :  { %329 = dma.done.wait [#allocation3], 256  }
 0x1e6   :  { %330 = vsyncadd [#allocation3], 4294967040 }
 0x1e7   :  { %303 = vsyncpa [#allocation3], 1 }

// kernel: lstm_mlm_forward.15
= control target key start
LH: loop header
LB: loop body
LE: loop exit
PB: predicated region body
PF: predicated region fallthrough
CT: control target
= control target key end

     0   :  { %vm41_vm0 = vcmask 523264   ;;  %vm628_vm1 = vcmask 261120   ;;  %s1807_s1 = inlined_call_operand.vmem [shape: f32[64,32], index: 1, kind: input, shape index: {}]   ;;  %s1808_s0 = inlined_call_operand.vmem [shape: f32[16,64], index: 0, kind: input, shape index: {}]   ;;  %s1809_s3 = inlined_call_operand.vmem [shape: f32[32,128], index: 3, kind: input, shape index: {}]   ;;  %s1810_s2 = inlined_call_operand.vmem [shape: f32[1,32], index: 2, kind: input, shape index: {}]   ;;  %s1811_s4 = inlined_call_operand.vmem [shape: f32[1,128], index: 4, kind: input, shape index: {}]   ;;  %s1812_s5 = inlined_call_operand.vmem [shape: f32[16,128], index: 5, kind: output, shape index: {}]  }
   0x1   :  { %v33_v0 = vld [vmem:[%s1807_s1 + $0x38] sm:$0xff]  ;;  %v32_v1 = vld [vmem:[%s1807_s1 + $0x30] sm:$0xff]  ;;  %v31_v2 = vld [vmem:[%s1807_s1 + $0x28] sm:$0xff] }
   0x2   :  { %v1502_v3 = vand.u32 4294901760, %v33_v0  ;;  %v1504_v4 = vand.u32 4294901760, %v32_v1  ;;  %v1506_v5 = vand.u32 4294901760, %v31_v2  ;;  %v30_v6 = vld [vmem:[%s1807_s1 + $0x20] sm:$0xff]  ;;  %v29_v7 = vld [vmem:[%s1807_s1 + $0x18] sm:$0xff]  ;;  %v28_v8 = vld [vmem:[%s1807_s1 + $0x10] sm:$0xff] }
   0x3   :  { %v1517_v9 = vand.u32 4294901760, %v30_v6  ;;  %v1519_v10 = vand.u32 4294901760, %v29_v7  ;;  %v1521_v11 = vand.u32 4294901760, %v28_v8  ;;  %v27_v12 = vld [vmem:[%s1807_s1 + $0x8] sm:$0xff]  ;;  %v26_v13 = vld [vmem:[%s1807_s1] sm:$0xff]  ;;  %v636_v62 = vld [vmem:[%s1809_s3 + $0x18] sm:$0xff] }
   0x4   :  { %v24_v14 = vld [vmem:[%s1808_s0] sm:$0xff]  ;;  %1283 = vmatprep.subr.mxu0 %v1502_v3  ;;  %v1534_v15 = vsub.f32 %v33_v0, %v1502_v3  ;;  %v1537_v16 = vsub.f32 %v32_v1, %v1504_v4  ;;  %v1539_v17 = vand.u32 4294901760, %v27_v12  ;;  %v1542_v18 = vsub.f32 %v31_v2, %v1506_v5  ;;  %v25_v19 = vld [vmem:[%s1808_s0 + $0x8] sm:$0xff]  ;;  %v635_v0 = vld [vmem:[%s1809_s3 + $0x10] sm:$0xff] }
   0x5   :  { %1284 = vmatpush3.msra.mxu0 %v1502_v3  ;;  %v1548_v20 = vand.u32 4294901760, %v26_v13  ;;  %v1551_v21 = vsub.f32 %v30_v6, %v1517_v9  ;;  %v43_v22 = vsel %vm41_vm0, %v24_v14, 0  ;;  %v46_v23 = vsel %vm41_vm0, %v25_v19, 0 }
   0x6   :  { %1285 = vmatprep.subr.mxu0 %v1504_v4  ;;  %v1557_v24 = vand.u32 4294901760, %v1534_v15  ;;  %v1560_v25 = vand.u32 4294901760, %v1537_v16  ;;  %v1563_v26 = vand.u32 4294901760, %v1542_v18  ;;  %v1565_v27 = vand.u32 4294901760, %v43_v22 }
   0x7   :  { %1286 = vmatpush3.msra.mxu0 %v1504_v4  ;;  %v1569_v28 = vand.u32 4294901760, %v1551_v21  ;;  %v1571_v29 = vand.u32 4294901760, %v46_v23  ;;  %v1574_v30 = vsub.f32 %v29_v7, %v1519_v10  ;;  %v1577_v31 = vsub.f32 %v28_v8, %v1521_v11  ;;  %v633_v7 = vld [vmem:[%s1809_s3] sm:$0xff] }
   0x8   :  { %1287 = vmatprep.subr.mxu0 %v1506_v5  ;;  %v161_v32 = vsub.f32 %v1534_v15, %v1557_v24  ;;  %v168_v33 = vsub.f32 %v1537_v16, %v1560_v25  ;;  %v175_v34 = vsub.f32 %v1542_v18, %v1563_v26  ;;  %v1587_v35 = vsub.f32 %v43_v22, %v1565_v27 }
   0x9   :  { %1288 = vmatpush3.msra.mxu0 %v1506_v5  ;;  %v1591_v36 = vand.u32 4294901760, %v1574_v30  ;;  %v1594_v37 = vsub.f32 %v46_v23, %v1571_v29  ;;  %1318 = vmatprep.mubr.f32.mxu1 %v1565_v27  ;;  %v182_v40 = vsub.f32 %v1551_v21, %v1569_v28  ;;  %v1606_v44 = vand.u32 4294901760, %v1577_v31  ;;  %v1185_v23 = vld [vmem:[%s1810_s2] ss:$0 sm:$0xff] }
   0xa   :  { %1289 = vmatprep.subr.mxu0 %v1517_v9  ;;  %v162_v38 = vand.u32 4294901760, %v161_v32  ;;  %v169_v39 = vand.u32 4294901760, %v168_v33  ;;  %v123_v41 = vand.u32 4294901760, %v1587_v35  ;;  %v176_v45 = vand.u32 4294901760, %v175_v34 }
   0xb   :  { %1290 = vmatpush3.msra.mxu0 %v1517_v9  ;;  %v189_v42 = vsub.f32 %v1574_v30, %v1591_v36  ;;  %v133_v43 = vand.u32 4294901760, %v1594_v37  ;;  %v201_v47 = vsub.f32 %v27_v12, %v1539_v17  ;;  %v208_v48 = vsub.f32 %v26_v13, %v1548_v20 }
   0xc   :  { %1291 = vmatprep.subr.mxu0 %v1519_v10  ;;  %1302 = vmatprep.subr.mxu1 %v162_v38  ;;  %v124_v46 = vsub.f32 %v1587_v35, %v123_v41  ;;  %v183_v50 = vand.u32 4294901760, %v182_v40  ;;  %v196_v52 = vsub.f32 %v1577_v31, %v1606_v44  ;;  %v1706_v63 = vand.u32 4294901760, %v636_v62 }
   0xd   :  { %1292 = vmatpush3.msra.mxu0 %v1519_v10  ;;  %1303 = vmatpush3.msra.mxu1 %v162_v38  ;;  %v134_v49 = vsub.f32 %v1594_v37, %v133_v43  ;;  %v1619_v51 = vand.u32 4294901760, %v201_v47  ;;  %v1624_v53 = vand.u32 4294901760, %v208_v48  ;;  %v190_v55 = vand.u32 4294901760, %v189_v42 }
   0xe   :  { %1293 = vmatprep.subr.mxu0 %v1521_v11  ;;  %1304 = vmatprep.subr.mxu1 %v169_v39  ;;  %v125_v54 = vand.u32 4294901760, %v124_v46  ;;  %v197_v58 = vand.u32 4294901760, %v196_v52  ;;  %v1712_v1 = vsub.f32 %v636_v62, %v1706_v63  ;;  %v1714_v2 = vand.u32 4294901760, %v635_v0  ;;  %v1186_v62 = vld [vmem:[%s1811_s4] ss:$0 sm:$0xff] }
   0xf   :  { %1294 = vmatpush3.msra.mxu0 %v1521_v11  ;;  %1305 = vmatpush3.msra.mxu1 %v169_v39  ;;  %v135_v56 = vand.u32 4294901760, %v134_v49  ;;  %v203_v57 = vsub.f32 %v201_v47, %v1619_v51  ;;  %v210_v59 = vsub.f32 %v208_v48, %v1624_v53 }
  0x10   :  { %1295 = vmatprep.subr.mxu0 %v1539_v17  ;;  %1306 = vmatprep.subr.mxu1 %v176_v45 }
  0x11   :  { %1296 = vmatpush3.msra.mxu0 %v1539_v17  ;;  %1307 = vmatpush3.msra.mxu1 %v176_v45  ;;  %v204_v60 = vand.u32 4294901760, %v203_v57  ;;  %v211_v61 = vand.u32 4294901760, %v210_v59 }
  0x12   :  { %1297 = vmatprep.subr.mxu0 %v1548_v20  ;;  %1308 = vmatprep.subr.mxu1 %v183_v50 }
  0x13   :  { %1298 = vmatpush3.msra.mxu0 %v1548_v20  ;;  %1309 = vmatpush3.msra.mxu1 %v183_v50 }
  0x14   :  { %1299 = vmatprep.mubr.f32.mxu0 %v125_v54  ;;  %1310 = vmatprep.subr.mxu1 %v190_v55 }
  0x15   :  { %1321 = vmatprep.subr.mxu0 %v1534_v15  ;;  %1300 = vmatmul.mubr.f32.vlgmr.msra.gmra.mxu0 %v135_v56 }
  0x16   :  { %1311 = vmatpush3.msra.mxu1 %v190_v55  ;;  %1322 = vmatpush3.msra.mxu0 %v1534_v15 }
  0x17   :  { %1312 = vmatprep.subr.mxu1 %v197_v58  ;;  %1323 = vmatprep.subr.mxu0 %v1537_v16 }
  0x18   :  { %1313 = vmatpush3.msra.mxu1 %v197_v58  ;;  %1324 = vmatpush3.msra.mxu0 %v1537_v16 }
  0x19   :  { %1314 = vmatprep.subr.mxu1 %v204_v60  ;;  %1325 = vmatprep.subr.mxu0 %v1542_v18 }
  0x1a   :  { %1315 = vmatpush3.msra.mxu1 %v204_v60  ;;  %1326 = vmatpush3.msra.mxu0 %v1542_v18 }
  0x1b   :  { %1316 = vmatprep.subr.mxu1 %v211_v61  ;;  %1327 = vmatprep.subr.mxu0 %v1551_v21 }
  0x1c   :  { %1317 = vmatpush3.msra.mxu1 %v211_v61  ;;  %1328 = vmatpush3.msra.mxu0 %v1551_v21 }
  0x1d   :  { %1319 = vmatmul.mubr.f32.vlgmr.msra.gmra.mxu1 %v1571_v29  ;;  %1329 = vmatprep.subr.mxu0 %v1574_v30 }
  0x1e   :  { %1340 = vmatprep.subr.mxu1 %v1502_v3  ;;  %1330 = vmatpush3.msra.mxu0 %v1574_v30 }
  0x1f   :  { %1341 = vmatpush3.msra.mxu1 %v1502_v3  ;;  %1331 = vmatprep.subr.mxu0 %v1577_v31 }
  0x20   :  { %1342 = vmatprep.subr.mxu1 %v1504_v4  ;;  %1332 = vmatpush3.msra.mxu0 %v1577_v31 }
  0x21   :  { %1343 = vmatpush3.msra.mxu1 %v1504_v4  ;;  %1333 = vmatprep.subr.mxu0 %v201_v47 }
  0x22   :  { %1344 = vmatprep.subr.mxu1 %v1506_v5  ;;  %1334 = vmatpush3.msra.mxu0 %v201_v47 }
  0x23   :  { %1345 = vmatpush3.msra.mxu1 %v1506_v5  ;;  %1335 = vmatprep.subr.mxu0 %v208_v48 }
  0x24   :  { %1346 = vmatprep.subr.mxu1 %v1517_v9  ;;  %1336 = vmatpush3.msra.mxu0 %v208_v48 }
  0x25   :  { %1337 = vmatprep.mubr.f32.mxu0 %v1587_v35  ;;  %1347 = vmatpush3.msra.mxu1 %v1517_v9 }
  0x26   :  { %1338 = vmatmul.mubr.f32.vlgmr.msra.gmra.mxu0 %v1594_v37  ;;  %1348 = vmatprep.subr.mxu1 %v1519_v10 }
  0x27   :  { %1359 = vmatprep.subr.mxu0 %v1557_v24  ;;  %1349 = vmatpush3.msra.mxu1 %v1519_v10 }
  0x28   :  { %1360 = vmatpush3.msra.mxu0 %v1557_v24  ;;  %1350 = vmatprep.subr.mxu1 %v1521_v11 }
  0x29   :  { %1361 = vmatprep.subr.mxu0 %v1560_v25  ;;  %1351 = vmatpush3.msra.mxu1 %v1521_v11 }
  0x2a   :  { %1362 = vmatpush3.msra.mxu0 %v1560_v25  ;;  %1352 = vmatprep.subr.mxu1 %v1539_v17 }
  0x2b   :  { %1363 = vmatprep.subr.mxu0 %v1563_v26  ;;  %1353 = vmatpush3.msra.mxu1 %v1539_v17 }
  0x2c   :  { %1364 = vmatpush3.msra.mxu0 %v1563_v26  ;;  %1354 = vmatprep.subr.mxu1 %v1548_v20 }
  0x2d   :  { %1365 = vmatprep.subr.mxu0 %v1569_v28  ;;  %1355 = vmatpush3.msra.mxu1 %v1548_v20 }
  0x2e   :  { %1356 = vmatprep.mubr.f32.mxu1 %v123_v41  ;;  %1366 = vmatpush3.msra.mxu0 %v1569_v28 }
  0x2f   :  { %1357 = vmatmul.mubr.f32.vlgmr.msra.gmra.mxu1 %v133_v43  ;;  %1367 = vmatprep.subr.mxu0 %v1591_v36 }
  0x30   :  { %1378 = vmatprep.subr.mxu1 %v1502_v3  ;;  %1368 = vmatpush3.msra.mxu0 %v1591_v36 }
  0x31   :  { %1379 = vmatpush3.msra.mxu1 %v1502_v3  ;;  %1369 = vmatprep.subr.mxu0 %v1606_v44  ;;  %v634_v3 = vld [vmem:[%s1809_s3 + $0x8] sm:$0xff] }
  0x32   :  { %1380 = vmatprep.subr.mxu1 %v1504_v4  ;;  %1370 = vmatpush3.msra.mxu0 %v1606_v44  ;;  %v1727_v6 = vand.u32 4294901760, %v634_v3 }
  0x33   :  { %1381 = vmatpush3.msra.mxu1 %v1504_v4  ;;  %1371 = vmatprep.subr.mxu0 %v1619_v51  ;;  %v1722_v4 = vand.u32 4294901760, %v1712_v1 }
  0x34   :  { %1382 = vmatprep.subr.mxu1 %v1506_v5  ;;  %1372 = vmatpush3.msra.mxu0 %v1619_v51 }
  0x35   :  { %1383 = vmatpush3.msra.mxu1 %v1506_v5  ;;  %1373 = vmatprep.subr.mxu0 %v1624_v53  ;;  %v1725_v5 = vsub.f32 %v635_v0, %v1714_v2  ;;  %v768_v8 = vsub.f32 %v1712_v1, %v1722_v4 }
  0x36   :  { %1384 = vmatprep.subr.mxu1 %v1517_v9  ;;  %1374 = vmatpush3.msra.mxu0 %v1624_v53 }
  0x37   :  { %1375 = vmatprep.mubr.f32.mxu0 %v1565_v27  ;;  %1385 = vmatpush3.msra.mxu1 %v1517_v9  ;;  %v1737_v9 = vand.u32 4294901760, %v1725_v5  ;;  %v769_v12 = vand.u32 4294901760, %v768_v8 }
  0x38   :  { %1376 = vmatmul.mubr.f32.vlgmr.msra.gmra.mxu0 %v1571_v29  ;;  %1386 = vmatprep.subr.mxu1 %v1519_v10 }
  0x39   :  { %1387 = vmatpush3.msra.mxu1 %v1519_v10  ;;  %1394 = vmatprep.mubr.f32.mxu1 %v1565_v27  ;;  %v1740_v10 = vsub.f32 %v634_v3, %v1727_v6  ;;  %v775_v13 = vsub.f32 %v1725_v5, %v1737_v9 }
  0x3a   :  { %1388 = vmatprep.subr.mxu1 %v1521_v11  ;;  %1397 = vmatprep.subr.mxu0 %v1706_v63 }
  0x3b   :  { %1389 = vmatpush3.msra.mxu1 %v1521_v11  ;;  %1398 = vmatpush3.msra.mxu0 %v1706_v63  ;;  %v1742_v11 = vand.u32 4294901760, %v633_v7  ;;  %v1749_v14 = vand.u32 4294901760, %v1740_v10  ;;  %v776_v16 = vand.u32 4294901760, %v775_v13 }
  0x3c   :  { %1390 = vmatprep.subr.mxu1 %v1539_v17  ;;  %1399 = vmatprep.subr.mxu0 %v1714_v2 }
  0x3d   :  { %1391 = vmatpush3.msra.mxu1 %v1539_v17  ;;  %1400 = vmatpush3.msra.mxu0 %v1714_v2  ;;  %v1752_v15 = vsub.f32 %v633_v7, %v1742_v11  ;;  %v782_v17 = vsub.f32 %v1740_v10, %v1749_v14 }
  0x3e   :  { %1392 = vmatprep.subr.mxu1 %v1548_v20  ;;  %1401 = vmatprep.subr.mxu0 %v1727_v6 }
  0x3f   :  { %1393 = vmatpush3.msra.mxu1 %v1548_v20  ;;  %1402 = vmatpush3.msra.mxu0 %v1727_v6  ;;  %v1759_v18 = vand.u32 4294901760, %v1752_v15  ;;  %v783_v19 = vand.u32 4294901760, %v782_v17 }
  0x40   :  { %1395 = vmatmul.mubr.f32.vlgmr.msra.gmra.mxu1 %v1571_v29  ;;  %1403 = vmatprep.subr.mxu0 %v1742_v11 }
  0x41   :  { %1404 = vmatpush3.msra.mxu0 %v1742_v11  ;;  %1408 = vmatprep.subr.mxu1 %v769_v12  ;;  %v789_v20 = vsub.f32 %v1752_v15, %v1759_v18 }
  0x42   :  { %1419 = vmatprep.subr.mxu0 %v1712_v1  ;;  %1409 = vmatpush3.msra.mxu1 %v769_v12 }
  0x43   :  { %1410 = vmatprep.subr.mxu1 %v776_v16  ;;  %v790_v21 = vand.u32 4294901760, %v789_v20 }
  0x44   :  { %1411 = vmatpush3.msra.mxu1 %v776_v16 }
  0x45   :  { %1412 = vmatprep.subr.mxu1 %v783_v19 }
  0x46   :  { %1413 = vmatpush3.msra.mxu1 %v783_v19 }
  0x47   :  { %1414 = vmatprep.subr.mxu1 %v790_v21 }
  0x48   :  { %1415 = vmatpush3.msra.mxu1 %v790_v21 }
  0x49   :  { %1430 = vmatprep.subr.mxu1 %v1706_v63 }
  0xd5   :  { %v1301_v22 = vpop.f32.mrf.mxu0 }
  0xd6   :  { %v138_v27 = vadd.f32 %v1301_v22, %v1185_v23 }
  0xd7   :  { %v127_v24 = vpop.f32.mrf.mxu0 }
  0xd8   :  { %v128_v29 = vadd.f32 %v1185_v23, %v127_v24 }
  0xdd   :  { %v1320_v25 = vpop.f32.mrf.mxu1 }
  0xde   :  { %v255_v32 = vadd.f32 %v1320_v25, %v138_v27 }
  0xdf   :  { %v248_v28 = vpop.f32.mrf.mxu1 }
  0xe0   :  { %v249_v34 = vadd.f32 %v248_v28, %v128_v29 }
  0xe6   :  { %v1339_v26 = vpop.f32.mrf.mxu0 }
  0xe7   :  { %v350_v35 = vadd.f32 %v1339_v26, %v255_v32 }
  0xe8   :  { %v342_v30 = vpop.f32.mrf.mxu0 }
  0xe9   :  { %v343_v37 = vadd.f32 %v342_v30, %v249_v34 }
  0xef   :  { %v1358_v31 = vpop.f32.mrf.mxu1 }
  0xf0   :  { %v439_v38 = vadd.f32 %v1358_v31, %v350_v35 }
  0xf1   :  { %v430_v36 = vpop.f32.mrf.mxu1 }
  0xf2   :  { %v431_v40 = vadd.f32 %v430_v36, %v343_v37 }
  0xf8   :  { %v1377_v33 = vpop.f32.mrf.mxu0 }
  0xf9   :  { %v540_v41 = vadd.f32 %v1377_v33, %v439_v38 }
  0xfa   :  { %v533_v39 = vpop.f32.mrf.mxu0 }
  0xfb   :  { %v534_v43 = vadd.f32 %v533_v39, %v431_v40 }
 0x100   :  { %v1396_v42 = vpop.f32.mrf.mxu1 }
 0x101   :  { %v625_v44 = vadd.f32 %v1396_v42, %v540_v41 }
 0x102   :  { %v618_v45 = vpop.f32.mrf.mxu1 }
 0x103   :  { %630 = vst.msk [vmem:[#allocation2 + $0x8] sm:$0xff] %vm628_vm1, %v625_v44  ;;  %v619_v46 = vadd.f32 %v618_v45, %v534_v43 }
 0x105   :  { %629 = vst.msk [vmem:[#allocation2] sm:$0xff] %vm628_vm1, %v619_v46 }
 0x10a   :  { %v632_v47 = vld [vmem:[#allocation2 + $0x8] sm:$0xff] }
 0x10b   :  { %v649_v48 = vsel %vm628_vm1, %v632_v47, 0 }
 0x10c   :  { %v631_v49 = vld [vmem:[#allocation2] sm:$0xff]  ;;  %v730_v50 = vand.u32 4294901760, %v649_v48 }
 0x10d   :  { %v646_v51 = vsel %vm628_vm1, %v631_v49, 0 }
 0x10e   :  { %v720_v52 = vand.u32 4294901760, %v646_v51  ;;  %v731_v53 = vsub.f32 %v649_v48, %v730_v50 }
 0x110   :  { %1416 = vmatprep.mubr.f32.mxu1 %v720_v52  ;;  %v721_v54 = vsub.f32 %v646_v51, %v720_v52  ;;  %v732_v55 = vand.u32 4294901760, %v731_v53 }
 0x111   :  { %1417 = vmatmul.mubr.f32.vlgmr.msra.gmra.mxu1 %v730_v50 }
 0x112   :  { %1431 = vmatpush3.msra.mxu1 %v1706_v63  ;;  %v722_v56 = vand.u32 4294901760, %v721_v54  ;;  %v733_v58 = vsub.f32 %v731_v53, %v732_v55 }
 0x113   :  { %1432 = vmatprep.subr.mxu1 %v1714_v2 }
 0x114   :  { %1433 = vmatpush3.msra.mxu1 %v1714_v2  ;;  %1438 = vmatprep.mubr.f32.mxu1 %v722_v56  ;;  %v723_v57 = vsub.f32 %v721_v54, %v722_v56  ;;  %v734_v60 = vand.u32 4294901760, %v733_v58 }
 0x115   :  { %1434 = vmatprep.subr.mxu1 %v1727_v6 }
 0x116   :  { %1435 = vmatpush3.msra.mxu1 %v1727_v6  ;;  %v724_v59 = vand.u32 4294901760, %v723_v57 }
 0x117   :  { %1436 = vmatprep.subr.mxu1 %v1742_v11 }
 0x118   :  { %1437 = vmatpush3.msra.mxu1 %v1742_v11  ;;  %1405 = vmatprep.mubr.f32.mxu0 %v724_v59 }
 0x119   :  { %1439 = vmatmul.mubr.f32.vlgmr.msra.gmra.mxu1 %v732_v55  ;;  %1452 = vmatprep.subr.mxu1 %v1706_v63 }
 0x11a   :  { %1406 = vmatmul.mubr.f32.vlgmr.msra.gmra.mxu0 %v734_v60  ;;  %1453 = vmatpush3.msra.mxu1 %v1706_v63 }
 0x11b   :  { %1420 = vmatpush3.msra.mxu0 %v1712_v1  ;;  %1460 = vmatprep.mubr.f32.mxu1 %v720_v52 }
 0x11c   :  { %1421 = vmatprep.subr.mxu0 %v1725_v5  ;;  %1427 = vmatprep.mubr.f32.mxu0 %v721_v54 }
 0x11d   :  { %1454 = vmatprep.subr.mxu1 %v1714_v2  ;;  %1422 = vmatpush3.msra.mxu0 %v1725_v5 }
 0x11e   :  { %1455 = vmatpush3.msra.mxu1 %v1714_v2  ;;  %1423 = vmatprep.subr.mxu0 %v1740_v10 }
 0x11f   :  { %1456 = vmatprep.subr.mxu1 %v1727_v6  ;;  %1424 = vmatpush3.msra.mxu0 %v1740_v10 }
 0x120   :  { %1457 = vmatpush3.msra.mxu1 %v1727_v6  ;;  %1425 = vmatprep.subr.mxu0 %v1752_v15 }
 0x121   :  { %1458 = vmatprep.subr.mxu1 %v1742_v11  ;;  %1426 = vmatpush3.msra.mxu0 %v1752_v15 }
 0x122   :  { %1459 = vmatpush3.msra.mxu1 %v1742_v11  ;;  %1428 = vmatmul.mubr.f32.vlgmr.msra.gmra.mxu0 %v731_v53 }
 0x123   :  { %1441 = vmatprep.subr.mxu0 %v1722_v4  ;;  %1461 = vmatmul.mubr.f32.vlgmr.msra.gmra.mxu1 %v730_v50 }
 0x124   :  { %1442 = vmatpush3.msra.mxu0 %v1722_v4  ;;  %1449 = vmatprep.mubr.f32.mxu0 %v720_v52 }
 0x125   :  { %1443 = vmatprep.subr.mxu0 %v1737_v9 }
 0x126   :  { %1444 = vmatpush3.msra.mxu0 %v1737_v9 }
 0x127   :  { %1445 = vmatprep.subr.mxu0 %v1749_v14 }
 0x128   :  { %1446 = vmatpush3.msra.mxu0 %v1749_v14 }
 0x129   :  { %1447 = vmatprep.subr.mxu0 %v1759_v18 }
 0x12a   :  { %1448 = vmatpush3.msra.mxu0 %v1759_v18 }
 0x12b   :  { %1450 = vmatmul.mubr.f32.vlgmr.msra.gmra.mxu0 %v730_v50 }
 0x1d1   :  { %v1418_v63 = vpop.f32.mrf.mxu1 }
 0x1d3   :  { %v827_v4 = vpop.f32.mrf.mxu1 }
 0x1d9   :  { %v1440_v6 = vpop.f32.mrf.mxu1 }
 0x1da   :  { %v1407_v61 = vpop.f32.mrf.mxu0 }
 0x1db   :  { %v737_v1 = vadd.f32 %v1407_v61, %v1186_v62  ;;  %v997_v11 = vpop.f32.mrf.mxu1 }
 0x1dc   :  { %v726_v0 = vpop.f32.mrf.mxu0 }
 0x1dd   :  { %v727_v2 = vadd.f32 %v1186_v62, %v726_v0  ;;  %v834_v5 = vadd.f32 %v1418_v63, %v737_v1 }
 0x1df   :  { %v828_v9 = vadd.f32 %v827_v4, %v727_v2 }
 0x1e2   :  { %v1429_v3 = vpop.f32.mrf.mxu0 }
 0x1e3   :  { %v921_v8 = vadd.f32 %v1429_v3, %v834_v5  ;;  %v1462_v13 = vpop.f32.mrf.mxu1 }
 0x1e4   :  { %v913_v7 = vpop.f32.mrf.mxu0 }
 0x1e5   :  { %v914_v10 = vadd.f32 %v913_v7, %v828_v9  ;;  %v1006_v12 = vadd.f32 %v1440_v6, %v921_v8  ;;  %v1169_v20 = vpop.f32.mrf.mxu1 }
 0x1e7   :  { %v998_v16 = vadd.f32 %v997_v11, %v914_v10 }
 0x1eb   :  { %v1451_v14 = vpop.f32.mrf.mxu0 }
 0x1ec   :  { %v1095_v15 = vadd.f32 %v1451_v14, %v1006_v12 }
 0x1ed   :  { %v1088_v17 = vpop.f32.mrf.mxu0 }
 0x1ee   :  { %v1176_v18 = vadd.f32 %v1462_v13, %v1095_v15  ;;  %v1089_v19 = vadd.f32 %v1088_v17, %v998_v16 }
 0x1f0   :  { %1180 = vst [vmem:[%s1812_s5 + $0x8] sm:$0xff] %v1176_v18  ;;  %v1170_v21 = vadd.f32 %v1169_v20, %v1089_v19 }
 0x1f2   :  { %1179 = vst [vmem:[%s1812_s5] sm:$0xff] %v1170_v21 }

</bundles_post_ra>
